<compile_context>
chip_gen: v7x
topology: tpu7x:2x2x1
jax: 0.10.0
libtpu: 0.0.40
codegen_flags: <defaults>
</compile_context>

<pallas_src>
import functools
import math

import jax
import jax.numpy as jnp
import numpy as np
from jax.experimental import pallas as pl
from jax.experimental.pallas import tpu as pltpu

# ------------------------- small, module-consistent sizes -------------------
D_IN = 8            # raw feature count
D_NUM = 6           # numeric features fed through PLR embeddings
D_OUT = 3           # number of classes (d_out > 1 -> one-hot + log path)
DIM = 32            # encoder width
D_BLOCK = 64        # residual block hidden width
N_BLOCKS = 2
N_FREQ = 16         # PLR n_frequencies
FREQ_SCALE = 0.1    # PLR frequency_scale
D_EMB = 8           # PLR d_embedding
TEMPERATURE = 1.0
BN_EPS = 1e-5
EPS = 1e-7

B = 8               # query batch
N_CAND = 128        # candidate set size

D_IN_EFF = D_NUM * D_EMB + D_IN - D_NUM   # = 50, matches ModernNCA.d_in
D_CAT = D_IN - D_NUM                      # = 2
D_PER = D_NUM * N_FREQ                    # = 96, block-diag periodic width
D_EMB_FLAT = D_NUM * D_EMB                # = 48, flattened PLR embedding


# ------------------------- fused encode + NCA kernel ------------------------
def _modern_nca_kernel(x_ref, c_ref, y_ref,
                       freq_ref, wc_ref, ws_ref, pb_ref,
                       a_emb_ref, a_cat_ref, a_b_ref,
                       mid_w_ref, mid_b_ref, c_w_ref, c_b_ref,
                       o_ref, rows_ref, *, n_query, n_cand, inv_t, apply_log):
    # Stage queries + candidates into one (n_query + n_cand, D_IN) slab so the
    # whole encode path runs as a single set of matmuls (both counts 8-aligned).
    rows_ref[pl.ds(0, n_query), :] = x_ref[...]
    rows_ref[pl.ds(n_query, n_cand), :] = c_ref[...]
    rows = rows_ref[...]                              # (R, D_IN)
    x_num = rows[:, :D_NUM]                           # (R, D_NUM)
    x_cat = rows[:, D_NUM:]                           # (R, D_CAT)

    # PeriodicEmbeddings: angles via block-diagonal matmul (MXU), cos/sin (EUP),
    # then the shared ('lite') PLR linear + bias + ReLU (also block-diagonal).
    ang = jnp.dot(x_num, freq_ref[...],
                  preferred_element_type=jnp.float32)               # (R, D_PER)
    emb = jnp.dot(jnp.cos(ang), wc_ref[...],
                  preferred_element_type=jnp.float32)
    emb = emb + jnp.dot(jnp.sin(ang), ws_ref[...],
                        preferred_element_type=jnp.float32)
    emb = jnp.maximum(emb + pb_ref[...], 0.0)                       # (R, 48)

    # encoder ∘ (eval BN of block0 folded) ∘ block0.linear0  (host-composed), ReLU
    z = jnp.dot(emb, a_emb_ref[...], preferred_element_type=jnp.float32)
    z = z + jnp.dot(x_cat, a_cat_ref[...], preferred_element_type=jnp.float32)
    z = jnp.maximum(z + a_b_ref[...], 0.0)                          # (R, D_BLOCK)

    # block(i-1).linear1 ∘ (BN_i folded) ∘ block(i).linear0 (host-composed), ReLU
    for i in range(N_BLOCKS - 1):
        z = jnp.dot(z, mid_w_ref[i], preferred_element_type=jnp.float32)
        z = jnp.maximum(z + mid_b_ref[i], 0.0)                      # (R, D_BLOCK)

    # last block.linear1 ∘ final BatchNorm affine (host-composed)
    enc = jnp.dot(z, c_w_ref[...],
                  preferred_element_type=jnp.float32) + c_b_ref[...]  # (R, DIM)

    x_enc = enc[:n_query]                             # (B, DIM)
    c_enc = enc[n_query:]                             # (N, DIM)

    # NCA retrieval: Gram identity d2 = ||x||^2 + ||c||^2 - 2 x.c^T (MXU),
    # single-pass softmax over candidates, label mix, log.
    xx = jnp.sum(x_enc * x_enc, axis=-1, keepdims=True)             # (B, 1)
    ones_row = jnp.ones((1, DIM), jnp.float32)
    cc = jax.lax.dot_general(ones_row, c_enc * c_enc, (((1,), (1,)), ((), ())),
                             preferred_element_type=jnp.float32)    # (1, N)
    xc = jax.lax.dot_general(x_enc, c_enc, (((1,), (1,)), ((), ())),
                             preferred_element_type=jnp.float32)    # (B, N)
    d2 = jnp.maximum(xx + cc - 2.0 * xc, 0.0)         # clamp cancellation
    s = -jnp.sqrt(d2) * inv_t                         # -cdist / T

    m = jnp.max(s, axis=-1, keepdims=True)
    p = jnp.exp(s - m)
    inv_denom = pl.reciprocal(jnp.sum(p, axis=-1, keepdims=True), approx=True)

    # one-hot built in-kernel from int labels (no wrapper one_hot HLO)
    onehot = (y_ref[...] == jax.lax.broadcasted_iota(
        jnp.int32, (n_cand, D_OUT), 1)).astype(jnp.float32)         # (N, D_OUT)
    logits = jnp.dot(p, onehot, preferred_element_type=jnp.float32) * inv_denom
    if apply_log:
        logits = jnp.log(logits + EPS)
    o_ref[...] = logits.astype(o_ref.dtype)


def modern_nca_pallas(kp, x, candidate_x, candidate_y, *, temperature=TEMPERATURE):
    """Fused ModernNCA eval forward: one pallas_call, everything VMEM-resident."""
    n_query, _ = x.shape
    n_cand, _ = candidate_x.shape
    y2 = candidate_y.reshape(n_cand, 1).astype(jnp.int32)

    kern = functools.partial(_modern_nca_kernel, n_query=n_query, n_cand=n_cand,
                             inv_t=1.0 / temperature, apply_log=(D_OUT > 1))

    r = n_query + n_cand
    flops = 2 * r * (D_NUM * D_PER + 2 * D_PER * D_EMB_FLAT
                     + D_EMB_FLAT * D_BLOCK + D_CAT * D_BLOCK
                     + (N_BLOCKS - 1) * D_BLOCK * D_BLOCK + D_BLOCK * DIM)
    flops += 2 * n_query * n_cand * (DIM + D_OUT) + 2 * n_cand * DIM
    transcendentals = 2 * r * D_PER + 3 * n_query * n_cand
    bytes_accessed = 4 * (r * D_IN + n_cand + n_query * D_OUT
                          + D_NUM * D_PER + 2 * D_PER * D_EMB_FLAT + D_EMB_FLAT
                          + D_EMB_FLAT * D_BLOCK + D_CAT * D_BLOCK + D_BLOCK
                          + (N_BLOCKS - 1) * (D_BLOCK * D_BLOCK + D_BLOCK)
                          + D_BLOCK * DIM + DIM)

    f2 = lambda i: (0, 0)
    f3 = lambda i: (0, 0, 0)
    return pl.pallas_call(
        kern,
        out_shape=jax.ShapeDtypeStruct((n_query, D_OUT), jnp.float32),
        grid=(1,),
        in_specs=[
            pl.BlockSpec((n_query, D_IN), f2),
            pl.BlockSpec((n_cand, D_IN), f2),
            pl.BlockSpec((n_cand, 1), f2),
            pl.BlockSpec((D_NUM, D_PER), f2),
            pl.BlockSpec((D_PER, D_EMB_FLAT), f2),
            pl.BlockSpec((D_PER, D_EMB_FLAT), f2),
            pl.BlockSpec((1, D_EMB_FLAT), f2),
            pl.BlockSpec((D_EMB_FLAT, D_BLOCK), f2),
            pl.BlockSpec((D_CAT, D_BLOCK), f2),
            pl.BlockSpec((1, D_BLOCK), f2),
            pl.BlockSpec((N_BLOCKS - 1, D_BLOCK, D_BLOCK), f3),
            pl.BlockSpec((N_BLOCKS - 1, 1, D_BLOCK), f3),
            pl.BlockSpec((D_BLOCK, DIM), f2),
            pl.BlockSpec((1, DIM), f2),
        ],
        out_specs=pl.BlockSpec((n_query, D_OUT), f2),
        scratch_shapes=[pltpu.VMEM((n_query + n_cand, D_IN), jnp.float32)],
        compiler_params=pltpu.CompilerParams(
            dimension_semantics=("arbitrary",)),
        cost_estimate=pl.CostEstimate(flops=int(flops),
                                      transcendentals=int(transcendentals),
                                      bytes_accessed=int(bytes_accessed)),
    )(x, candidate_x, y2,
      kp["freq_blk"], kp["wc_blk"], kp["ws_blk"], kp["plr_b"],
      kp["a_emb"], kp["a_cat"], kp["a_b"],
      kp["mid_w"], kp["mid_b"], kp["c_w"], kp["c_b"])


# ------------------------- parameters (deterministic, synthetic) ------------
def init_params(key):
    keys = iter(jax.random.split(key, 32))

    def uniform(k, shape, bound):
        return jax.random.uniform(k, shape, jnp.float32, -bound, bound)

    p = {}
    # PLREmbeddings: PeriodicEmbeddings + Linear(2*n_freq -> d_emb) + ReLU
    p["plr_freq"] = FREQ_SCALE * jax.random.normal(
        next(keys), (D_NUM, N_FREQ), jnp.float32)
    bnd = 1.0 / math.sqrt(2 * N_FREQ)
    p["plr_w"] = uniform(next(keys), (2 * N_FREQ, D_EMB), bnd)   # (in, out)
    p["plr_b"] = uniform(next(keys), (D_EMB,), bnd)
    # encoder: Linear(d_in_eff -> dim)
    bnd = 1.0 / math.sqrt(D_IN_EFF)
    p["enc_w"] = uniform(next(keys), (D_IN_EFF, DIM), bnd)
    p["enc_b"] = uniform(next(keys), (DIM,), bnd)
    # residual blocks: BN -> Linear(dim, d_block) -> ReLU -> Linear(d_block, dim)
    blocks = []
    for _ in range(N_BLOCKS):
        blk = {}
        blk["bn_gamma"] = 1.0 + 0.1 * jax.random.normal(next(keys), (DIM,))
        blk["bn_beta"] = 0.1 * jax.random.normal(next(keys), (DIM,))
        blk["bn_mean"] = 0.1 * jax.random.normal(next(keys), (DIM,))
        blk["bn_var"] = jnp.abs(1.0 + 0.1 * jax.random.normal(next(keys), (DIM,)))
        b0 = 1.0 / math.sqrt(DIM)
        blk["w0"] = uniform(next(keys), (DIM, D_BLOCK), b0)
        blk["b0"] = uniform(next(keys), (D_BLOCK,), b0)
        b1 = 1.0 / math.sqrt(D_BLOCK)
        blk["w1"] = uniform(next(keys), (D_BLOCK, DIM), b1)
        blk["b1"] = uniform(next(keys), (DIM,), b1)
        blocks.append(blk)
    p["blocks"] = blocks
    # final BatchNorm1d(dim) of post_encoder
    p["bn_f_gamma"] = 1.0 + 0.1 * jax.random.normal(next(keys), (DIM,))
    p["bn_f_beta"] = 0.1 * jax.random.normal(next(keys), (DIM,))
    p["bn_f_mean"] = 0.1 * jax.random.normal(next(keys), (DIM,))
    p["bn_f_var"] = jnp.abs(1.0 + 0.1 * jax.random.normal(next(keys), (DIM,)))
    return jax.tree.map(lambda a: jnp.asarray(a, jnp.float32), p)


# ------------------------- parameter prep (host-side, run ONCE) -------------
def _block_diag(w, n):
    """(a, b) -> (n*a, n*b) block-diagonal with the same block on the diag."""
    a, bb = w.shape
    eye = jnp.eye(n, dtype=w.dtype)
    t = eye[:, None, :, None] * w[None, :, None, :]   # (n, a, n, b)
    return t.reshape(n * a, n * bb)


def prepare_fused_params(p):
    """Fold eval BatchNorms into linears, compose adjacent linears, build the
    block-diagonal PLR operators. Run ONCE, outside the jitted hot path."""
    kp = {}
    # angles:  ang[:, d*F + f] = 2*pi*freq[d, f] * x_num[:, d]
    eye = jnp.eye(D_NUM, dtype=jnp.float32)
    freq_blk = (eye[:, :, None] * p["plr_freq"][:, None, :]).reshape(D_NUM, D_PER)
    kp["freq_blk"] = 2.0 * jnp.pi * freq_blk
    # shared ('lite') PLR linear, block-diagonal per numeric feature
    kp["wc_blk"] = _block_diag(p["plr_w"][:N_FREQ], D_NUM)       # cos part
    kp["ws_blk"] = _block_diag(p["plr_w"][N_FREQ:], D_NUM)       # sin part
    kp["plr_b"] = jnp.tile(p["plr_b"], (D_NUM,)).reshape(1, D_EMB_FLAT)

    # fold each block's eval BN into its first linear
    w0f, b0f = [], []
    for blk in p["blocks"]:
        scale = blk["bn_gamma"] / jnp.sqrt(blk["bn_var"] + BN_EPS)
        shift = blk["bn_beta"] - blk["bn_mean"] * scale
        w0f.append(blk["w0"] * scale[:, None])
        b0f.append(blk["b0"] + shift @ blk["w0"])

    # Stage A: encoder linear composed with block-0's BN-folded linear0
    enc_w_emb = p["enc_w"][:D_EMB_FLAT]
    enc_w_cat = p["enc_w"][D_EMB_FLAT:]
    kp["a_emb"] = enc_w_emb @ w0f[0]                              # (48, 64)
    kp["a_cat"] = enc_w_cat @ w0f[0]                              # (2, 64)
    kp["a_b"] = (p["enc_b"] @ w0f[0] + b0f[0]).reshape(1, D_BLOCK)

    # Middle stages: block(i-1).linear1 composed with block(i)'s folded linear0
    mids_w, mids_b = [], []
    for i in range(1, N_BLOCKS):
        prev = p["blocks"][i - 1]
        mids_w.append(prev["w1"] @ w0f[i])
        mids_b.append((prev["b1"] @ w0f[i] + b0f[i]).reshape(1, D_BLOCK))
    kp["mid_w"] = jnp.stack(mids_w)     # (N_BLOCKS-1, D_BLOCK, D_BLOCK)
    kp["mid_b"] = jnp.stack(mids_b)     # (N_BLOCKS-1, 1, D_BLOCK)

    # Final stage: last block's linear1 composed with the final BN affine
    scale_f = p["bn_f_gamma"] / jnp.sqrt(p["bn_f_var"] + BN_EPS)
    shift_f = p["bn_f_beta"] - p["bn_f_mean"] * scale_f
    last = p["blocks"][-1]
    kp["c_w"] = last["w1"] * scale_f[None, :]                     # (64, 32)
    kp["c_b"] = (last["b1"] * scale_f + shift_f).reshape(1, DIM)
    return kp


# ------------------------- pure-JAX reference --------------------------------
def reference_encode(params, x):
    x_num, x_cat = x[:, :D_NUM], x[:, D_NUM:]
    ang = 2.0 * jnp.pi * params["plr_freq"][None] * x_num[..., None]  # (B,Dn,F)
    per = jnp.concatenate([jnp.cos(ang), jnp.sin(ang)], axis=-1)      # (B,Dn,2F)
    emb = jnp.maximum(per @ params["plr_w"] + params["plr_b"], 0.0)   # (B,Dn,E)
    emb = emb.reshape(x.shape[0], D_NUM * D_EMB)
    h = jnp.concatenate([emb, x_cat], axis=-1)
    h = h @ params["enc_w"] + params["enc_b"]
    for blk in params["blocks"]:
        scale = blk["bn_gamma"] / jnp.sqrt(blk["bn_var"] + BN_EPS)
        shift = blk["bn_beta"] - blk["bn_mean"] * scale
        z = h * scale[None, :] + shift[None, :]
        z = jnp.maximum(z @ blk["w0"] + blk["b0"], 0.0)
        h = z @ blk["w1"] + blk["b1"]
    scale = params["bn_f_gamma"] / jnp.sqrt(params["bn_f_var"] + BN_EPS)
    shift = params["bn_f_beta"] - params["bn_f_mean"] * scale
    return h * scale[None, :] + shift[None, :]


def reference_forward(params, x, candidate_x, candidate_y):
    x_enc = reference_encode(params, x)
    cand_enc = reference_encode(params, candidate_x)
    cand_y_1h = jax.nn.one_hot(candidate_y, D_OUT, dtype=jnp.float32)
    d2 = jnp.sum((x_enc[:, None, :] - cand_enc[None, :, :]) ** 2, axis=-1)
    dist = jnp.sqrt(jnp.maximum(d2, 0.0)) / TEMPERATURE
    probs = jax.nn.softmax(-dist, axis=-1)
    logits = probs @ cand_y_1h
    return jnp.log(logits + EPS)


# ------------------------- main ----------------------------------------------
if __name__ == "__main__":
    key = jax.random.PRNGKey(0)
    kparam, kx, kc, ky = jax.random.split(key, 4)
    params = init_params(kparam)

    x = jax.random.normal(kx, (B, D_IN), jnp.float32)
    candidate_x = jax.random.normal(kc, (N_CAND, D_IN), jnp.float32)
    candidate_y = jax.random.randint(ky, (N_CAND,), 0, D_OUT)

    # Weight folding/composition is hoisted out of the per-call path: run once.
    kp = prepare_fused_params(params)

    fwd = jax.jit(modern_nca_pallas)
    out = jax.block_until_ready(fwd(kp, x, candidate_x, candidate_y))

    ref = jax.block_until_ready(
        reference_forward(params, x, candidate_x, candidate_y))
    np.testing.assert_allclose(np.asarray(out), np.asarray(ref),
                               rtol=2e-3, atol=2e-3)
    assert out.shape == (B, D_OUT)
    print("KERNEL_OK")
</pallas_src>

<mosaic_0001>
module attributes {stable_mosaic.version = 11 : i64} {
  func.func @_modern_nca_kernel(%arg0: i32, %arg1: memref<8x8xf32, #tpu.memory_space<vmem>>, %arg2: memref<128x8xf32, #tpu.memory_space<vmem>>, %arg3: memref<128x1xi32, #tpu.memory_space<vmem>>, %arg4: memref<6x96xf32, #tpu.memory_space<vmem>>, %arg5: memref<96x48xf32, #tpu.memory_space<vmem>>, %arg6: memref<96x48xf32, #tpu.memory_space<vmem>>, %arg7: memref<1x48xf32, #tpu.memory_space<vmem>>, %arg8: memref<48x64xf32, #tpu.memory_space<vmem>>, %arg9: memref<2x64xf32, #tpu.memory_space<vmem>>, %arg10: memref<1x64xf32, #tpu.memory_space<vmem>>, %arg11: memref<1x64x64xf32, #tpu.memory_space<vmem>>, %arg12: memref<1x1x64xf32, #tpu.memory_space<vmem>>, %arg13: memref<64x32xf32, #tpu.memory_space<vmem>>, %arg14: memref<1x32xf32, #tpu.memory_space<vmem>>, %arg15: memref<8x3xf32, #tpu.memory_space<vmem>>, %arg16: memref<136x8xf32, #tpu.memory_space<vmem>>) attributes {dimension_semantics = [#tpu.dimension_semantics<arbitrary>], iteration_bounds = array<i64: 1>, scalar_prefetch = 0 : i64, scratch_operands = 1 : i64, tpu.core_type = #tpu.core_type<tc>, window_params = [{pipeline_mode = #tpu.pipeline_mode<synchronous>, transform_indices = @transform_0, window_bounds = array<i64: 8, 8>}, {pipeline_mode = #tpu.pipeline_mode<synchronous>, transform_indices = @transform_1, window_bounds = array<i64: 128, 8>}, {pipeline_mode = #tpu.pipeline_mode<synchronous>, transform_indices = @transform_2, window_bounds = array<i64: 128, 1>}, {pipeline_mode = #tpu.pipeline_mode<synchronous>, transform_indices = @transform_3, window_bounds = array<i64: 6, 96>}, {pipeline_mode = #tpu.pipeline_mode<synchronous>, transform_indices = @transform_4, window_bounds = array<i64: 96, 48>}, {pipeline_mode = #tpu.pipeline_mode<synchronous>, transform_indices = @transform_5, window_bounds = array<i64: 96, 48>}, {pipeline_mode = #tpu.pipeline_mode<synchronous>, transform_indices = @transform_6, window_bounds = array<i64: 1, 48>}, {pipeline_mode = #tpu.pipeline_mode<synchronous>, transform_indices = @transform_7, window_bounds = array<i64: 48, 64>}, {pipeline_mode = #tpu.pipeline_mode<synchronous>, transform_indices = @transform_8, window_bounds = array<i64: 2, 64>}, {pipeline_mode = #tpu.pipeline_mode<synchronous>, transform_indices = @transform_9, window_bounds = array<i64: 1, 64>}, {pipeline_mode = #tpu.pipeline_mode<synchronous>, transform_indices = @transform_10, window_bounds = array<i64: 1, 64, 64>}, {pipeline_mode = #tpu.pipeline_mode<synchronous>, transform_indices = @transform_11, window_bounds = array<i64: 1, 1, 64>}, {pipeline_mode = #tpu.pipeline_mode<synchronous>, transform_indices = @transform_12, window_bounds = array<i64: 64, 32>}, {pipeline_mode = #tpu.pipeline_mode<synchronous>, transform_indices = @transform_13, window_bounds = array<i64: 1, 32>}, {pipeline_mode = #tpu.pipeline_mode<synchronous>, transform_indices = @transform_14, window_bounds = array<i64: 8, 3>}]} {
    %c0 = arith.constant 0 : index
    %c0_0 = arith.constant 0 : index
    %0 = vector.load %arg1[%c0, %c0_0] : memref<8x8xf32, #tpu.memory_space<vmem>>, vector<8x8xf32>
    %c0_1 = arith.constant 0 : index
    %c0_2 = arith.constant 0 : index
    %1 = vector.load %arg16[%c0_1, %c0_2] : memref<136x8xf32, #tpu.memory_space<vmem>>, vector<8x8xf32>
    tpu.vector_store %arg16[%c0_1, %c0_2], %0 {strides = array<i32>} : memref<136x8xf32, #tpu.memory_space<vmem>>, vector<8x8xf32>,
    %c0_3 = arith.constant 0 : index
    %c0_4 = arith.constant 0 : index
    %2 = vector.load %arg2[%c0_3, %c0_4] : memref<128x8xf32, #tpu.memory_space<vmem>>, vector<128x8xf32>
    %c8 = arith.constant 8 : index
    %c0_5 = arith.constant 0 : index
    %3 = vector.load %arg16[%c8, %c0_5] : memref<136x8xf32, #tpu.memory_space<vmem>>, vector<128x8xf32>
    tpu.vector_store %arg16[%c8, %c0_5], %2 {strides = array<i32>} : memref<136x8xf32, #tpu.memory_space<vmem>>, vector<128x8xf32>,
    %c0_6 = arith.constant 0 : index
    %c0_7 = arith.constant 0 : index
    %4 = vector.load %arg16[%c0_6, %c0_7] : memref<136x8xf32, #tpu.memory_space<vmem>>, vector<136x8xf32>
    %5 = vector.extract_strided_slice %4 {offsets = [0, 0], sizes = [136, 6], strides = [1, 1]} : vector<136x8xf32> to vector<136x6xf32>
    %6 = vector.extract_strided_slice %4 {offsets = [0, 6], sizes = [136, 2], strides = [1, 1]} : vector<136x8xf32> to vector<136x2xf32>
    %c0_8 = arith.constant 0 : index
    %c0_9 = arith.constant 0 : index
    %7 = vector.load %arg4[%c0_8, %c0_9] : memref<6x96xf32, #tpu.memory_space<vmem>>, vector<6x96xf32>
    %cst = arith.constant dense<0.000000e+00> : vector<136x96xf32>
    %8 = tpu.matmul %5, %7, %cst {dimension_numbers = #tpu.dot_dimension_numbers<[1], [0], [0], [1], [0, 0, 1, 1], [], []>} : vector<136x6xf32>, vector<6x96xf32>, vector<136x96xf32> -> vector<136x96xf32>
    %9 = math.cos %8 : vector<136x96xf32>
    %c0_10 = arith.constant 0 : index
    %c0_11 = arith.constant 0 : index
    %10 = vector.load %arg5[%c0_10, %c0_11] : memref<96x48xf32, #tpu.memory_space<vmem>>, vector<96x48xf32>
    %cst_12 = arith.constant dense<0.000000e+00> : vector<136x48xf32>
    %11 = tpu.matmul %9, %10, %cst_12 {dimension_numbers = #tpu.dot_dimension_numbers<[1], [0], [0], [1], [0, 0, 1, 1], [], []>} : vector<136x96xf32>, vector<96x48xf32>, vector<136x48xf32> -> vector<136x48xf32>
    %12 = math.sin %8 : vector<136x96xf32>
    %c0_13 = arith.constant 0 : index
    %c0_14 = arith.constant 0 : index
    %13 = vector.load %arg6[%c0_13, %c0_14] : memref<96x48xf32, #tpu.memory_space<vmem>>, vector<96x48xf32>
    %cst_15 = arith.constant dense<0.000000e+00> : vector<136x48xf32>
    %14 = tpu.matmul %12, %13, %cst_15 {dimension_numbers = #tpu.dot_dimension_numbers<[1], [0], [0], [1], [0, 0, 1, 1], [], []>} : vector<136x96xf32>, vector<96x48xf32>, vector<136x48xf32> -> vector<136x48xf32>
    %15 = arith.addf %11, %14 : vector<136x48xf32>
    %c0_16 = arith.constant 0 : index
    %c0_17 = arith.constant 0 : index
    %16 = vector.load %arg7[%c0_16, %c0_17] : memref<1x48xf32, #tpu.memory_space<vmem>>, vector<1x48xf32>
    %17 = vector.broadcast %16 : vector<1x48xf32> to vector<136x48xf32>
    %18 = arith.addf %15, %17 : vector<136x48xf32>
    %cst_18 = arith.constant 0.000000e+00 : f32
    %19 = vector.broadcast %cst_18 : f32 to vector<136x48xf32>
    %20 = arith.maximumf %18, %19 : vector<136x48xf32>
    %c0_19 = arith.constant 0 : index
    %c0_20 = arith.constant 0 : index
    %21 = vector.load %arg8[%c0_19, %c0_20] : memref<48x64xf32, #tpu.memory_space<vmem>>, vector<48x64xf32>
    %cst_21 = arith.constant dense<0.000000e+00> : vector<136x64xf32>
    %22 = tpu.matmul %20, %21, %cst_21 {dimension_numbers = #tpu.dot_dimension_numbers<[1], [0], [0], [1], [0, 0, 1, 1], [], []>} : vector<136x48xf32>, vector<48x64xf32>, vector<136x64xf32> -> vector<136x64xf32>
    %c0_22 = arith.constant 0 : index
    %c0_23 = arith.constant 0 : index
    %23 = vector.load %arg9[%c0_22, %c0_23] : memref<2x64xf32, #tpu.memory_space<vmem>>, vector<2x64xf32>
    %cst_24 = arith.constant dense<0.000000e+00> : vector<136x64xf32>
    %24 = tpu.matmul %6, %23, %cst_24 {dimension_numbers = #tpu.dot_dimension_numbers<[1], [0], [0], [1], [0, 0, 1, 1], [], []>} : vector<136x2xf32>, vector<2x64xf32>, vector<136x64xf32> -> vector<136x64xf32>
    %25 = arith.addf %22, %24 : vector<136x64xf32>
    %c0_25 = arith.constant 0 : index
    %c0_26 = arith.constant 0 : index
    %26 = vector.load %arg10[%c0_25, %c0_26] : memref<1x64xf32, #tpu.memory_space<vmem>>, vector<1x64xf32>
    %27 = vector.broadcast %26 : vector<1x64xf32> to vector<136x64xf32>
    %28 = arith.addf %25, %27 : vector<136x64xf32>
    %cst_27 = arith.constant 0.000000e+00 : f32
    %29 = vector.broadcast %cst_27 : f32 to vector<136x64xf32>
    %30 = arith.maximumf %28, %29 : vector<136x64xf32>
    %c0_28 = arith.constant 0 : index
    %c0_29 = arith.constant 0 : index
    %c0_30 = arith.constant 0 : index
    %31 = vector.load %arg11[%c0_28, %c0_29, %c0_30] : memref<1x64x64xf32, #tpu.memory_space<vmem>>, vector<1x64x64xf32>
    %32 = vector.shape_cast %31 : vector<1x64x64xf32> to vector<64x64xf32>
    %cst_31 = arith.constant dense<0.000000e+00> : vector<136x64xf32>
    %33 = tpu.matmul %30, %32, %cst_31 {dimension_numbers = #tpu.dot_dimension_numbers<[1], [0], [0], [1], [0, 0, 1, 1], [], []>} : vector<136x64xf32>, vector<64x64xf32>, vector<136x64xf32> -> vector<136x64xf32>
    %c0_32 = arith.constant 0 : index
    %c0_33 = arith.constant 0 : index
    %c0_34 = arith.constant 0 : index
    %34 = vector.load %arg12[%c0_32, %c0_33, %c0_34] : memref<1x1x64xf32, #tpu.memory_space<vmem>>, vector<1x1x64xf32>
    %35 = vector.shape_cast %34 : vector<1x1x64xf32> to vector<1x64xf32>
    %36 = vector.broadcast %35 : vector<1x64xf32> to vector<136x64xf32>
    %37 = arith.addf %33, %36 : vector<136x64xf32>
    %cst_35 = arith.constant 0.000000e+00 : f32
    %38 = vector.broadcast %cst_35 : f32 to vector<136x64xf32>
    %39 = arith.maximumf %37, %38 : vector<136x64xf32>
    %c0_36 = arith.constant 0 : index
    %c0_37 = arith.constant 0 : index
    %40 = vector.load %arg13[%c0_36, %c0_37] : memref<64x32xf32, #tpu.memory_space<vmem>>, vector<64x32xf32>
    %cst_38 = arith.constant dense<0.000000e+00> : vector<136x32xf32>
    %41 = tpu.matmul %39, %40, %cst_38 {dimension_numbers = #tpu.dot_dimension_numbers<[1], [0], [0], [1], [0, 0, 1, 1], [], []>} : vector<136x64xf32>, vector<64x32xf32>, vector<136x32xf32> -> vector<136x32xf32>
    %c0_39 = arith.constant 0 : index
    %c0_40 = arith.constant 0 : index
    %42 = vector.load %arg14[%c0_39, %c0_40] : memref<1x32xf32, #tpu.memory_space<vmem>>, vector<1x32xf32>
    %43 = vector.broadcast %42 : vector<1x32xf32> to vector<136x32xf32>
    %44 = arith.addf %41, %43 : vector<136x32xf32>
    %45 = vector.extract_strided_slice %44 {offsets = [0, 0], sizes = [8, 32], strides = [1, 1]} : vector<136x32xf32> to vector<8x32xf32>
    %46 = vector.extract_strided_slice %44 {offsets = [8, 0], sizes = [128, 32], strides = [1, 1]} : vector<136x32xf32> to vector<128x32xf32>
    %47 = arith.mulf %45, %45 : vector<8x32xf32>
    %cst_41 = arith.constant dense<0.000000e+00> : vector<8xf32>
    %48 = vector.multi_reduction <add>, %47, %cst_41 [1] : vector<8x32xf32> to vector<8xf32>
    %49 = vector.shape_cast %48 : vector<8xf32> to vector<8x1xf32>
    %cst_42 = arith.constant 1.000000e+00 : f32
    %50 = vector.broadcast %cst_42 : f32 to vector<1x32xf32>
    %51 = arith.mulf %46, %46 : vector<128x32xf32>
    %cst_43 = arith.constant dense<0.000000e+00> : vector<1x128xf32>
    %52 = tpu.matmul %50, %51, %cst_43 {dimension_numbers = #tpu.dot_dimension_numbers<[1], [1], [0], [0], [0, 0, 1, 0], [], []>} : vector<1x32xf32>, vector<128x32xf32>, vector<1x128xf32> -> vector<1x128xf32>
    %cst_44 = arith.constant dense<0.000000e+00> : vector<8x128xf32>
    %53 = tpu.matmul %45, %46, %cst_44 {dimension_numbers = #tpu.dot_dimension_numbers<[1], [1], [0], [0], [0, 0, 1, 0], [], []>} : vector<8x32xf32>, vector<128x32xf32>, vector<8x128xf32> -> vector<8x128xf32>
    %54 = vector.broadcast %49 : vector<8x1xf32> to vector<8x128xf32>
    %55 = vector.broadcast %52 : vector<1x128xf32> to vector<8x128xf32>
    %56 = arith.addf %54, %55 : vector<8x128xf32>
    %cst_45 = arith.constant 2.000000e+00 : f32
    %57 = vector.broadcast %cst_45 : f32 to vector<8x128xf32>
    %58 = arith.mulf %57, %53 : vector<8x128xf32>
    %59 = arith.subf %56, %58 : vector<8x128xf32>
    %cst_46 = arith.constant 0.000000e+00 : f32
    %60 = vector.broadcast %cst_46 : f32 to vector<8x128xf32>
    %61 = arith.maximumf %59, %60 : vector<8x128xf32>
    %62 = math.sqrt %61 : vector<8x128xf32>
    %cst_47 = arith.constant 0.000000e+00 : f32
    %63 = vector.broadcast %cst_47 : f32 to vector<8x128xf32>
    %64 = arith.subf %63, %62 : vector<8x128xf32>
    %cst_48 = arith.constant 1.000000e+00 : f32
    %65 = vector.broadcast %cst_48 : f32 to vector<8x128xf32>
    %66 = arith.mulf %64, %65 : vector<8x128xf32>
    %cst_49 = arith.constant dense<0xFF800000> : vector<8xf32>
    %67 = vector.multi_reduction <maximumf>, %66, %cst_49 [1] : vector<8x128xf32> to vector<8xf32>
    %68 = vector.shape_cast %67 : vector<8xf32> to vector<8x1xf32>
    %69 = vector.broadcast %68 : vector<8x1xf32> to vector<8x128xf32>
    %70 = arith.subf %66, %69 : vector<8x128xf32>
    %71 = math.exp %70 : vector<8x128xf32>
    %cst_50 = arith.constant dense<0.000000e+00> : vector<8xf32>
    %72 = vector.multi_reduction <add>, %71, %cst_50 [1] : vector<8x128xf32> to vector<8xf32>
    %73 = vector.shape_cast %72 : vector<8xf32> to vector<8x1xf32>
    %74 = tpu.reciprocal %73 {approx = true} : vector<8x1xf32> -> vector<8x1xf32>
    %c0_51 = arith.constant 0 : index
    %c0_52 = arith.constant 0 : index
    %75 = vector.load %arg3[%c0_51, %c0_52] : memref<128x1xi32, #tpu.memory_space<vmem>>, vector<128x1xi32>
    %76 = tpu.iota {dimensions = array<i32: 1>} : vector<128x3xi32>
    %77 = vector.broadcast %75 : vector<128x1xi32> to vector<128x3xi32>
    %78 = arith.cmpi eq, %77, %76 : vector<128x3xi32>
    %79 = arith.extui %78 : vector<128x3xi1> to vector<128x3xi32>
    %80 = arith.sitofp %79 : vector<128x3xi32> to vector<128x3xf32>
    %cst_53 = arith.constant dense<0.000000e+00> : vector<8x3xf32>
    %81 = tpu.matmul %71, %80, %cst_53 {dimension_numbers = #tpu.dot_dimension_numbers<[1], [0], [0], [1], [0, 0, 1, 1], [], []>} : vector<8x128xf32>, vector<128x3xf32>, vector<8x3xf32> -> vector<8x3xf32>
    %82 = vector.broadcast %74 : vector<8x1xf32> to vector<8x3xf32>
    %83 = arith.mulf %81, %82 : vector<8x3xf32>
    %cst_54 = arith.constant 1.000000e-07 : f32
    %84 = vector.broadcast %cst_54 : f32 to vector<8x3xf32>
    %85 = arith.addf %83, %84 : vector<8x3xf32>
    %86 = math.log %85 : vector<8x3xf32>
    %c0_55 = arith.constant 0 : index
    %c0_56 = arith.constant 0 : index
    %87 = vector.load %arg15[%c0_55, %c0_56] : memref<8x3xf32, #tpu.memory_space<vmem>>, vector<8x3xf32>
    tpu.vector_store %arg15[%c0_55, %c0_56], %86 {strides = array<i32>} : memref<8x3xf32, #tpu.memory_space<vmem>>, vector<8x3xf32>,
    return
  }
  func.func @transform_0(%arg0: i32) -> (i32, i32) {
    %c0_i32 = arith.constant 0 : i32
    %c0_i32_0 = arith.constant 0 : i32
    %c0_i32_1 = arith.constant 0 : i32
    return %c0_i32, %c0_i32_0 : i32, i32
  }
  func.func @transform_1(%arg0: i32) -> (i32, i32) {
    %c0_i32 = arith.constant 0 : i32
    %c0_i32_0 = arith.constant 0 : i32
    %c0_i32_1 = arith.constant 0 : i32
    return %c0_i32, %c0_i32_0 : i32, i32
  }
  func.func @transform_2(%arg0: i32) -> (i32, i32) {
    %c0_i32 = arith.constant 0 : i32
    %c0_i32_0 = arith.constant 0 : i32
    %c0_i32_1 = arith.constant 0 : i32
    return %c0_i32, %c0_i32_0 : i32, i32
  }
  func.func @transform_3(%arg0: i32) -> (i32, i32) {
    %c0_i32 = arith.constant 0 : i32
    %c0_i32_0 = arith.constant 0 : i32
    %c0_i32_1 = arith.constant 0 : i32
    return %c0_i32, %c0_i32_0 : i32, i32
  }
  func.func @transform_4(%arg0: i32) -> (i32, i32) {
    %c0_i32 = arith.constant 0 : i32
    %c0_i32_0 = arith.constant 0 : i32
    %c0_i32_1 = arith.constant 0 : i32
    return %c0_i32, %c0_i32_0 : i32, i32
  }
  func.func @transform_5(%arg0: i32) -> (i32, i32) {
    %c0_i32 = arith.constant 0 : i32
    %c0_i32_0 = arith.constant 0 : i32
    %c0_i32_1 = arith.constant 0 : i32
    return %c0_i32, %c0_i32_0 : i32, i32
  }
  func.func @transform_6(%arg0: i32) -> (i32, i32) {
    %c0_i32 = arith.constant 0 : i32
    %c0_i32_0 = arith.constant 0 : i32
    %c0_i32_1 = arith.constant 0 : i32
    return %c0_i32, %c0_i32_0 : i32, i32
  }
  func.func @transform_7(%arg0: i32) -> (i32, i32) {
    %c0_i32 = arith.constant 0 : i32
    %c0_i32_0 = arith.constant 0 : i32
    %c0_i32_1 = arith.constant 0 : i32
    return %c0_i32, %c0_i32_0 : i32, i32
  }
  func.func @transform_8(%arg0: i32) -> (i32, i32) {
    %c0_i32 = arith.constant 0 : i32
    %c0_i32_0 = arith.constant 0 : i32
    %c0_i32_1 = arith.constant 0 : i32
    return %c0_i32, %c0_i32_0 : i32, i32
  }
  func.func @transform_9(%arg0: i32) -> (i32, i32) {
    %c0_i32 = arith.constant 0 : i32
    %c0_i32_0 = arith.constant 0 : i32
    %c0_i32_1 = arith.constant 0 : i32
    return %c0_i32, %c0_i32_0 : i32, i32
  }
  func.func @transform_10(%arg0: i32) -> (i32, i32, i32) {
    %c0_i32 = arith.constant 0 : i32
    %c0_i32_0 = arith.constant 0 : i32
    %c0_i32_1 = arith.constant 0 : i32
    %c0_i32_2 = arith.constant 0 : i32
    return %c0_i32, %c0_i32_0, %c0_i32_1 : i32, i32, i32
  }
  func.func @transform_11(%arg0: i32) -> (i32, i32, i32) {
    %c0_i32 = arith.constant 0 : i32
    %c0_i32_0 = arith.constant 0 : i32
    %c0_i32_1 = arith.constant 0 : i32
    %c0_i32_2 = arith.constant 0 : i32
    return %c0_i32, %c0_i32_0, %c0_i32_1 : i32, i32, i32
  }
  func.func @transform_12(%arg0: i32) -> (i32, i32) {
    %c0_i32 = arith.constant 0 : i32
    %c0_i32_0 = arith.constant 0 : i32
    %c0_i32_1 = arith.constant 0 : i32
    return %c0_i32, %c0_i32_0 : i32, i32
  }
  func.func @transform_13(%arg0: i32) -> (i32, i32) {
    %c0_i32 = arith.constant 0 : i32
    %c0_i32_0 = arith.constant 0 : i32
    %c0_i32_1 = arith.constant 0 : i32
    return %c0_i32, %c0_i32_0 : i32, i32
  }
  func.func @transform_14(%arg0: i32) -> (i32, i32) {
    %c0_i32 = arith.constant 0 : i32
    %c0_i32_0 = arith.constant 0 : i32
    %c0_i32_1 = arith.constant 0 : i32
    return %c0_i32, %c0_i32_0 : i32, i32
  }
}

</mosaic_0001>

<bundles_post_ra>
// kernel: modern_nca_pallas.1
= control target key start
LH: loop header
LB: loop body
LE: loop exit
PB: predicated region body
PF: predicated region fallthrough
CT: control target
= control target key end

     0   :  { %vm152_vm0 = vcmask 1045504   ;;  %vm48_vm1 = vcmask 64512   ;;  %v9830_v0 = vmov 0.0   ;;  %vm7146_vm2 = vmmov 0   ;;  %s7154_s27 = smov 122   ;;  %s9815_s3 = inlined_call_operand.vmem [shape: f32[6,96], index: 3, kind: input, shape index: {}]   ;;  %s9816_s0 = inlined_call_operand.vmem [shape: f32[8,8], index: 0, kind: input, shape index: {}]   ;;  %s9817_s1 = inlined_call_operand.vmem [shape: f32[128,8], index: 1, kind: input, shape index: {}]   ;;  %s9818_s4 = inlined_call_operand.vmem [shape: f32[96,48], index: 4, kind: input, shape index: {}]   ;;  %s9819_s5 = inlined_call_operand.vmem [shape: f32[96,48], index: 5, kind: input, shape index: {}]   ;;  %s9820_s7 = inlined_call_operand.vmem [shape: f32[48,64], index: 7, kind: input, shape index: {}]   ;;  %s9821_s8 = inlined_call_operand.vmem [shape: f32[2,64], index: 8, kind: input, shape index: {}]   ;;  %s9822_s10 = inlined_call_operand.vmem [shape: f32[1,64,64], index: 10, kind: input, shape index: {}]   ;;  %s9823_s6 = inlined_call_operand.vmem [shape: f32[1,48], index: 6, kind: input, shape index: {}]   ;;  %s9824_s12 = inlined_call_operand.vmem [shape: f32[64,32], index: 12, kind: input, shape index: {}]   ;;  %s9825_s9 = inlined_call_operand.vmem [shape: f32[1,64], index: 9, kind: input, shape index: {}]   ;;  %s9826_s11 = inlined_call_operand.vmem [shape: f32[1,1,64], index: 11, kind: input, shape index: {}]   ;;  %s9827_s13 = inlined_call_operand.vmem [shape: f32[1,32], index: 13, kind: input, shape index: {}]   ;;  %s9828_s2 = inlined_call_operand.vmem [shape: s32[128,1], index: 2, kind: input, shape index: {}]   ;;  %s9829_s14 = inlined_call_operand.vmem [shape: f32[8,3], index: 14, kind: output, shape index: {}]  }
   0x1   :  { %6242 = vmatprep.subr.mxu0 %v9830_v0  ;;  %v99_v1 = vld [vmem:[%s9815_s3] sm:$0x3f]  ;;  %6244 = vmatprep.mubr.msk.f32.mxu0 %vm7146_vm2, %v9830_v0  ;;  %v51_v4 = vld [vmem:[%s9817_s1 + $0x8] sm:$0xff]  ;;  %v52_v5 = vld [vmem:[%s9817_s1 + $0x10] sm:$0xff]  ;;  %vm100_vm3 = vcmask 48128   ;;  %v9834_v39 = vmov 0.0|0.0  }
   0x2   :  { %v47_v2 = vld [vmem:[%s9816_s0] sm:$0xff]  ;;  %6243 = vmatpush3.msk.msra.mxu0 %vm152_vm0, %v99_v1  ;;  %v53_v6 = vld [vmem:[%s9817_s1 + $0x18] sm:$0xff]  ;;  %6319 = vmatprep.mubr.msk.f32.mxu1 %vm7146_vm2, %v9830_v0  ;;  %67 = vst.msk [vmem:[#allocation2 + $0x10] sm:$0xff] %vm48_vm1, %v51_v4  ;;  %68 = vst.msk [vmem:[#allocation2 + $0x18] sm:$0xff] %vm48_vm1, %v52_v5  ;;  %v9839_v4 = vmov 683565275  }
   0x3   :  { %v50_v3 = vld [vmem:[%s9817_s1] sm:$0xff]  ;;  %49 = vst.msk [vmem:[#allocation2] sm:$0xff] %vm48_vm1, %v47_v2  ;;  %69 = vst.msk [vmem:[#allocation2 + $0x20] sm:$0xff] %vm48_vm1, %v53_v6  ;;  %v55_v8 = vld [vmem:[%s9817_s1 + $0x28] sm:$0xff]  ;;  %6818 = vmatprep.subr.bf16.mxu0 %v9834_v39  ;;  %6800 = vmatprep.subr.bf16.mxu1 %v9834_v39  ;;  %v9837_v6 = vmov 2475754826  }
   0x4   :  { %66 = vst.msk [vmem:[#allocation2 + $0x8] sm:$0xff] %vm48_vm1, %v50_v3  ;;  %v54_v7 = vld [vmem:[%s9817_s1 + $0x20] sm:$0xff]  ;;  %v56_v9 = vld [vmem:[%s9817_s1 + $0x30] sm:$0xff]  ;;  %71 = vst.msk [vmem:[#allocation2 + $0x30] sm:$0xff] %vm48_vm1, %v55_v8 }
   0x5   :  { %70 = vst.msk [vmem:[#allocation2 + $0x28] sm:$0xff] %vm48_vm1, %v54_v7  ;;  %72 = vst.msk [vmem:[#allocation2 + $0x38] sm:$0xff] %vm48_vm1, %v56_v9  ;;  %v57_v10 = vld [vmem:[%s9817_s1 + $0x38] sm:$0xff]  ;;  %v58_v11 = vld [vmem:[%s9817_s1 + $0x40] sm:$0xff] }
   0x6   :  { %v59_v12 = vld [vmem:[%s9817_s1 + $0x48] sm:$0xff]  ;;  %73 = vst.msk [vmem:[#allocation2 + $0x40] sm:$0xff] %vm48_vm1, %v57_v10  ;;  %74 = vst.msk [vmem:[#allocation2 + $0x48] sm:$0xff] %vm48_vm1, %v58_v11  ;;  %v60_v13 = vld [vmem:[%s9817_s1 + $0x50] sm:$0xff]  ;;  %v9845_v10 = vmov 2131351028  }
   0x7   :  { %75 = vst.msk [vmem:[#allocation2 + $0x50] sm:$0xff] %vm48_vm1, %v59_v12  ;;  %v61_v14 = vld [vmem:[%s9817_s1 + $0x58] sm:$0xff]  ;;  %v62_v15 = vld [vmem:[%s9817_s1 + $0x60] sm:$0xff]  ;;  %76 = vst.msk [vmem:[#allocation2 + $0x58] sm:$0xff] %vm48_vm1, %v60_v13  ;;  %v9851_v12 = vmov 2102212464  }
   0x8   :  { %77 = vst.msk [vmem:[#allocation2 + $0x60] sm:$0xff] %vm48_vm1, %v61_v14  ;;  %78 = vst.msk [vmem:[#allocation2 + $0x68] sm:$0xff] %vm48_vm1, %v62_v15  ;;  %v63_v16 = vld [vmem:[%s9817_s1 + $0x68] sm:$0xff]  ;;  %v64_v17 = vld [vmem:[%s9817_s1 + $0x70] sm:$0xff]  ;;  %v9859_v14 = vmov 920167782  }
   0x9   :  { %v65_v18 = vld [vmem:[%s9817_s1 + $0x78] sm:$0xff]  ;;  %79 = vst.msk [vmem:[#allocation2 + $0x70] sm:$0xff] %vm48_vm1, %v63_v16  ;;  %80 = vst.msk [vmem:[#allocation2 + $0x78] sm:$0xff] %vm48_vm1, %v64_v17  ;;  %v84_v21 = vld [vmem:[#allocation2 + $0x10] sm:$0xff] }
   0xa   :  { %81 = vst.msk [vmem:[#allocation2 + $0x80] sm:$0xff] %vm48_vm1, %v65_v18  ;;  %v82_v19 = vld [vmem:[#allocation2] sm:$0xff]  ;;  %v85_v22 = vld [vmem:[#allocation2 + $0x18] sm:$0xff]  ;;  %v2058_v37 = vld [vmem:[%s9818_s4 + $0x8] sm:$0xff] }
   0xb   :  { %6245 = vmatmul.mubr.msk.f32.vlgmr.msra.gmra.mrb[0].mxu0 %vm100_vm3, %v82_v19  ;;  %v83_v20 = vld [vmem:[#allocation2 + $0x8] sm:$0xff]  ;;  %v86_v23 = vld [vmem:[#allocation2 + $0x20] sm:$0xff]  ;;  %v88_v25 = vld [vmem:[#allocation2 + $0x30] sm:$0xff] }
   0xc   :  { %6247 = vmatprep.mubr.msk.f32.mxu0 %vm7146_vm2, %v9830_v0  ;;  %v87_v24 = vld [vmem:[#allocation2 + $0x28] sm:$0xff]  ;;  %v89_v26 = vld [vmem:[#allocation2 + $0x38] sm:$0xff]  ;;  %v2057_v36 = vld [vmem:[%s9818_s4] sm:$0xff] }
   0xd   :  { %v90_v27 = vld [vmem:[#allocation2 + $0x40] sm:$0xff]  ;;  %v91_v28 = vld [vmem:[#allocation2 + $0x48] sm:$0xff]  ;;  %v7366_v38 = vpack.c.bf16 %v2058_v37, %v2057_v36 }
   0xe   :  { %v92_v29 = vld [vmem:[#allocation2 + $0x50] sm:$0xff]  ;;  %v93_v30 = vld [vmem:[#allocation2 + $0x58] sm:$0xff] }
   0xf   :  { %6248 = vmatmul.mubr.msk.f32.gmra.mrb[2].mxu0 %vm100_vm3, %v83_v20  ;;  %v94_v31 = vld [vmem:[#allocation2 + $0x60] sm:$0xff]  ;;  %v95_v32 = vld [vmem:[#allocation2 + $0x68] sm:$0xff]  ;;  %9908 = vst [vmem:[#allocation3_spill] sm:$0xff] %v7366_v38 }
  0x10   :  { %6250 = vmatprep.mubr.msk.f32.mxu0 %vm7146_vm2, %v9830_v0  ;;  %v96_v33 = vld [vmem:[#allocation2 + $0x70] sm:$0xff]  ;;  %v97_v34 = vld [vmem:[#allocation2 + $0x78] sm:$0xff]  ;;  %6820 = vmatpush3.bf16.msra.mxu0 %v7366_v38 }
  0x11   :  { %v98_v35 = vld [vmem:[#allocation2 + $0x80] sm:$0xff]  ;;  %6821 = vmatprep.subr.bf16.mxu0 %v9834_v39 }
  0x13   :  { %6251 = vmatmul.mubr.msk.f32.gmra.mrb[4].mxu0 %vm100_vm3, %v84_v21  ;;  %v9856_v21 = vmov 1326507024  }
  0x14   :  { %6253 = vmatprep.mubr.msk.f32.mxu0 %vm7146_vm2, %v9830_v0 }
  0x17   :  { %6254 = vmatmul.mubr.msk.f32.gmra.mrb[6].mxu0 %vm100_vm3, %v85_v22 }
  0x18   :  { %6256 = vmatprep.mubr.msk.f32.mxu0 %vm7146_vm2, %v9830_v0 }
  0x1b   :  { %6257 = vmatmul.mubr.msk.f32.gmra.mrb[8].mxu0 %vm100_vm3, %v86_v23 }
  0x1c   :  { %6259 = vmatprep.mubr.msk.f32.mxu0 %vm7146_vm2, %v9830_v0 }
  0x1f   :  { %6260 = vmatmul.mubr.msk.f32.gmra.mrb[10].mxu0 %vm100_vm3, %v87_v24 }
  0x20   :  { %6262 = vmatprep.mubr.msk.f32.mxu0 %vm7146_vm2, %v9830_v0 }
  0x23   :  { %6263 = vmatmul.mubr.msk.f32.gmra.mrb[12].mxu0 %vm100_vm3, %v88_v25 }
  0x24   :  { %6265 = vmatprep.mubr.msk.f32.mxu0 %vm7146_vm2, %v9830_v0 }
  0x27   :  { %6266 = vmatmul.mubr.msk.f32.gmra.mrb[14].mxu0 %vm100_vm3, %v89_v26 }
  0x28   :  { %6268 = vmatprep.mubr.msk.f32.mxu0 %vm7146_vm2, %v9830_v0 }
  0x2b   :  { %6269 = vmatmul.mubr.msk.f32.gmra.mrb[16].mxu0 %vm100_vm3, %v90_v27 }
  0x2c   :  { %6271 = vmatprep.mubr.msk.f32.mxu0 %vm7146_vm2, %v9830_v0 }
  0x2f   :  { %6272 = vmatmul.mubr.msk.f32.gmra.mrb[18].mxu0 %vm100_vm3, %v91_v28 }
  0x30   :  { %6274 = vmatprep.mubr.msk.f32.mxu0 %vm7146_vm2, %v9830_v0 }
  0x33   :  { %6275 = vmatmul.mubr.msk.f32.gmra.mrb[20].mxu0 %vm100_vm3, %v92_v29 }
  0x34   :  { %6277 = vmatprep.mubr.msk.f32.mxu0 %vm7146_vm2, %v9830_v0 }
  0x37   :  { %6278 = vmatmul.mubr.msk.f32.gmra.mrb[22].mxu0 %vm100_vm3, %v93_v30 }
  0x38   :  { %6280 = vmatprep.mubr.msk.f32.mxu0 %vm7146_vm2, %v9830_v0 }
  0x3b   :  { %6281 = vmatmul.mubr.msk.f32.gmra.mrb[24].mxu0 %vm100_vm3, %v94_v31 }
  0x3c   :  { %6283 = vmatprep.mubr.msk.f32.mxu0 %vm7146_vm2, %v9830_v0 }
  0x3f   :  { %6284 = vmatmul.mubr.msk.f32.gmra.mrb[26].mxu0 %vm100_vm3, %v95_v32 }
  0x40   :  { %6286 = vmatprep.mubr.msk.f32.mxu0 %vm7146_vm2, %v9830_v0 }
  0x43   :  { %6287 = vmatmul.mubr.msk.f32.gmra.mrb[28].mxu0 %vm100_vm3, %v96_v33 }
  0x44   :  { %6289 = vmatprep.mubr.msk.f32.mxu0 %vm7146_vm2, %v9830_v0 }
  0x47   :  { %6290 = vmatmul.mubr.msk.f32.gmra.mrb[30].mxu0 %vm100_vm3, %v97_v34 }
  0x48   :  { %6292 = vmatprep.mubr.msk.f32.mxu0 %vm7146_vm2, %v9830_v0 }
  0x4b   :  { %6293 = vmatmul.mubr.msk.f32.gmra.mrb[32].mxu0 %vm100_vm3, %v98_v35 }
  0x4c   :  { %6394 = vmatprep.mubr.msk.f32.mxu0 %vm7146_vm2, %v9830_v0 }
  0xde   :  { %v7372_v40 = vpop.f32.mrb[0].mxu0 }
  0xdf   :  { %v306_v41 = vand.u32 2147483647, %v7372_v40  ;;  %v309_v42 = vand.u32 2139095040, %v7372_v40  ;;  %v6246_v43 = vpop.f32.mrb[1].mxu0 }
  0xe1   :  { %v310_v44 = vshrl.u32 %v309_v42, 23  ;;  %v313_v45 = vand.u32 8388607, %v306_v41 }
  0xe2   :  { %v7378_v46 = vpop.f32.mrb[2].mxu0 }
  0xe3   :  { %9909 = vst [vmem:[#allocation4_spill] sm:$0xff] %v7378_v46  ;;  %v5715_v47 = vadd.s32 4294967169, %v310_v44  ;;  %v409_v48 = vand.u32 2147483647, %v7378_v46  ;;  %v6249_v49 = vpop.f32.mrb[3].mxu0  ;;  %v412_v50 = vand.u32 2139095040, %v7378_v46 }
  0xe4   :  { %v314_v52 = vor.u32 8388608, %v313_v45 }
  0xe5   :  { %v316_v51 = vadd.s32 1, %v5715_v47  ;;  %v413_v53 = vshrl.u32 %v412_v50, 23  ;;  %v7384_v54 = vand.u32 8388607, %v409_v48 }
  0xe6   :  { %v7386_v55 = vpop.f32.mrb[4].mxu0  ;;  %v7389_v62 = vshll.u32 %v314_v52, 8 }
  0xe7   :  { %9910 = vst [vmem:[#allocation5_spill] sm:$0xff] %v7386_v55  ;;  %vm317_vm4 = vcmp.gt.s32.totalorder %v316_v51, 0  ;;  %v6252_v56 = vpop.f32.mrb[5].mxu0  ;;  %v5719_v58 = vadd.s32 4294967169, %v413_v53  ;;  %v515_v59 = vand.u32 2139095040, %v7386_v55  ;;  %v417_v63 = vor.u32 8388608, %v7384_v54 }
  0xe8   :  { %v318_v57 = vsel %vm317_vm4, %v316_v51, 0 }
  0xe9   :  { %v319_v60 = vshrl.u32 %v318_v57, 5  ;;  %v320_v61 = vand.u32 31, %v318_v57  ;;  %v419_v1 = vadd.s32 1, %v5719_v58  ;;  %v516_v8 = vshrl.u32 %v515_v59, 23 }
  0xea   :  { %v7392_v2 = vpop.f32.mrb[6].mxu0 }
  0xeb   :  { %9911 = vst [vmem:[#allocation6_spill] sm:$0xff] %v7392_v2  ;;  %v321_v3 = vsub.s32 32, %v320_v61  ;;  %v323_v5 = vshll.u32 %v9839_v4, %v320_v61  ;;  %v326_v7 = vshll.u32 %v9837_v6, %v320_v61  ;;  %v6255_v9 = vpop.f32.mrb[7].mxu0  ;;  %v329_v11 = vshll.u32 %v9845_v10, %v320_v61 }
  0xec   :  { %v332_v13 = vshll.u32 %v9851_v12, %v320_v61  ;;  %v335_v15 = vshll.u32 %v9859_v14, %v320_v61  ;;  %vm338_vm5 = vcmp.lt.s32.totalorder %v319_v60, 1  ;;  %vm339_vm6 = vcmp.lt.s32.totalorder %v319_v60, 2 }
  0xed   :  { %v324_v16 = vshrl.u32 %v9837_v6, %v321_v3  ;;  %v327_v17 = vshrl.u32 %v9845_v10, %v321_v3  ;;  %v330_v18 = vshrl.u32 %v9851_v12, %v321_v3  ;;  %v322_v19 = vshrl.u32 %v9839_v4, %v321_v3 }
  0xee   :  { %v333_v20 = vshrl.u32 %v9859_v14, %v321_v3  ;;  %v336_v22 = vshrl.u32 %v9856_v21, %v321_v3  ;;  %vm340_vm7 = vcmp.lt.s32.totalorder %v319_v60, 3  ;;  %v7405_v23 = vpop.f32.mrb[8].mxu0  ;;  %vm420_vm8 = vcmp.gt.s32.totalorder %v419_v1, 0 }
  0xef   :  { %9912 = vst [vmem:[#allocation7_spill] sm:$0xff] %v7405_v23  ;;  %v325_v24 = vor.u32 %v324_v16, %v323_v5  ;;  %v328_v25 = vor.u32 %v327_v17, %v326_v7  ;;  %v331_v26 = vor.u32 %v330_v18, %v329_v11  ;;  %v6258_v27 = vpop.f32.mrb[9].mxu0  ;;  %vm341_vm9 = vcmp.lt.s32.totalorder %v319_v60, 4 }
  0xf0   :  { %v334_v28 = vor.u32 %v333_v20, %v332_v13  ;;  %v337_v29 = vor.u32 %v336_v22, %v335_v15  ;;  %v421_v30 = vsel %vm420_vm8, %v419_v1, 0  ;;  %v7430_v61 = vshll.u32 %v417_v63, 8 }
  0xf1   :  { %v342_v31 = vsel %vm338_vm5, %v322_v19, %v325_v24  ;;  %v343_v32 = vsel %vm341_vm9, %v331_v26, 2102212464  ;;  %v346_v33 = vsel %vm338_vm5, %v325_v24, %v328_v25  ;;  %v350_v34 = vsel %vm338_vm5, %v328_v25, %v331_v26 }
  0xf2   :  { %v344_v35 = vsel %vm340_vm7, %v328_v25, %v343_v32  ;;  %v347_v36 = vsel %vm341_vm9, %v334_v28, 920167782  ;;  %v351_v37 = vsel %vm341_vm9, %v337_v29, 1326507024  ;;  %v7411_v42 = vshrl.u32 %v421_v30, 5  ;;  %v7413_v43 = vpop.f32.mrb[10].mxu0 }
  0xf3   :  { %9913 = vst [vmem:[#allocation8_spill] sm:$0xff] %v7413_v43  ;;  %v345_v44 = vsel %vm339_vm6, %v342_v31, %v344_v35  ;;  %v348_v45 = vsel %vm340_vm7, %v331_v26, %v347_v36  ;;  %v352_v47 = vsel %vm340_vm7, %v334_v28, %v351_v37  ;;  %v423_v49 = vand.u32 31, %v421_v30  ;;  %v6261_v50 = vpop.f32.mrb[11].mxu0 }
  0xf4   :  { %v349_v51 = vsel %vm339_vm6, %v346_v33, %v348_v45  ;;  %v353_v52 = vsel %vm339_vm6, %v350_v34, %v352_v47  ;;  %v361_v58 = vmul.u32 %v7389_v62, %v345_v44  ;;  %v5723_v1 = vadd.s32 4294967169, %v516_v8 }
  0xf5   :  { %v7421_v53 = vmul.u32.u64.low %v7389_v62, %v353_v52  ;;  %v7422_v54 = vmul.u32.u64.high %v7389_v62, %v353_v52, %v7421_v53  ;;  %v7425_v56 = vmul.u32.u64.low %v7389_v62, %v349_v51  ;;  %v7426_v57 = vmul.u32.u64.high %v7389_v62, %v349_v51, %v7425_v56 }
  0xf6   :  { %v424_v59 = vsub.s32 32, %v423_v49  ;;  %v7432_v3 = vpop.f32.mrb[12].mxu0  ;;  %v426_v60 = vshll.u32 %v9839_v4, %v423_v49  ;;  %v429_v5 = vshll.u32 %v9837_v6, %v423_v49  ;;  %v432_v7 = vshll.u32 %v9845_v10, %v423_v49 }
  0xf7   :  { %9914 = vst [vmem:[#allocation9_spill] sm:$0xff] %v7432_v3  ;;  %vm441_vm10 = vcmp.lt.s32.totalorder %v7411_v42, 1  ;;  %v6264_v9 = vpop.f32.mrb[13].mxu0  ;;  %v435_v63 = vshll.u32 %v9851_v12, %v423_v49  ;;  %vm363_vm11 = vc.u32 %v7422_v54, %v7425_v56  ;;  %v364_v8 = vadd.s32 1, %v7426_v57 }
  0xf8   :  { %v427_v11 = vshrl.u32 %v9837_v6, %v424_v59  ;;  %v430_v13 = vshrl.u32 %v9845_v10, %v424_v59  ;;  %v433_v62 = vshrl.u32 %v9851_v12, %v424_v59  ;;  %v436_v15 = vshrl.u32 %v9859_v14, %v424_v59 }
  0xf9   :  { %v438_v16 = vshll.u32 %v9859_v14, %v423_v49  ;;  %v439_v20 = vshrl.u32 %v9856_v21, %v424_v59  ;;  %v365_v24 = vsel %vm363_vm11, %v364_v8, %v7426_v57  ;;  %vm442_vm12 = vcmp.lt.s32.totalorder %v7411_v42, 2 }
  0xfa   :  { %v428_v17 = vor.u32 %v427_v11, %v426_v60  ;;  %v431_v18 = vor.u32 %v430_v13, %v429_v5  ;;  %v434_v19 = vor.u32 %v433_v62, %v432_v7  ;;  %v7448_v22 = vpop.f32.mrb[14].mxu0  ;;  %v437_v25 = vor.u32 %v436_v15, %v435_v63 }
  0xfb   :  { %9915 = vst [vmem:[#allocation10_spill] sm:$0xff] %v7448_v22  ;;  %vm444_vm13 = vcmp.lt.s32.totalorder %v7411_v42, 4  ;;  %v6267_v26 = vpop.f32.mrb[15].mxu0  ;;  %v366_v27 = vadd.s32 %v365_v24, %v361_v58  ;;  %v425_v28 = vshrl.u32 %v9839_v4, %v424_v59  ;;  %v440_v29 = vor.u32 %v439_v20, %v438_v16 }
  0xfc   :  { %v446_v30 = vsel %vm444_vm13, %v434_v19, 2102212464  ;;  %vm443_vm14 = vcmp.lt.s32.totalorder %v7411_v42, 3  ;;  %v449_v31 = vsel %vm441_vm10, %v428_v17, %v431_v18  ;;  %v450_v32 = vsel %vm444_vm13, %v437_v25, 920167782 }
  0xfd   :  { %v453_v33 = vsel %vm441_vm10, %v431_v18, %v434_v19  ;;  %v367_v34 = vadd.s32 536870912, %v366_v27  ;;  %v445_v35 = vsel %vm441_vm10, %v425_v28, %v428_v17  ;;  %v451_v36 = vsel %vm443_vm14, %v434_v19, %v450_v32 }
  0xfe   :  { %v454_v37 = vsel %vm444_vm13, %v440_v29, 1326507024  ;;  %v7461_v44 = vpop.f32.mrb[16].mxu0  ;;  %v447_v45 = vsel %vm443_vm14, %v431_v18, %v446_v30  ;;  %v452_v47 = vsel %vm442_vm12, %v449_v31, %v451_v36  ;;  %v522_v50 = vadd.s32 1, %v5723_v1 }
  0xff   :  { %9916 = vst [vmem:[#allocation11_spill] sm:$0xff] %v7461_v44  ;;  %v455_v49 = vsel %vm443_vm14, %v437_v25, %v454_v37  ;;  %v6270_v51 = vpop.f32.mrb[17].mxu0  ;;  %v7465_v52 = vshrl.u32 %v367_v34, 30  ;;  %v7470_v57 = vmul.u32.u64.low %v7430_v61, %v452_v47  ;;  %v7471_v58 = vmul.u32.u64.high %v7430_v61, %v452_v47, %v7470_v57 }
 0x100   :  { %v456_v53 = vsel %vm442_vm12, %v453_v33, %v455_v49  ;;  %vm523_vm15 = vcmp.gt.s32.totalorder %v522_v50, 0  ;;  %v448_v1 = vsel %vm442_vm12, %v445_v35, %v447_v45  ;;  %v512_v7 = vand.u32 2147483647, %v7386_v55 }
 0x101   :  { %v7475_v59 = vmul.u32.u64.low %v7430_v61, %v456_v53  ;;  %v7476_v60 = vmul.u32.u64.high %v7430_v61, %v456_v53, %v7475_v59  ;;  %v369_v5 = vshll.u32 %v7465_v52, 30  ;;  %v524_v9 = vsel %vm523_vm15, %v522_v50, 0 }
 0x102   :  { %v526_v11 = vand.u32 31, %v524_v9  ;;  %v467_v62 = vadd.s32 1, %v7471_v58  ;;  %v464_v63 = vmul.u32 %v7430_v61, %v448_v1  ;;  %v519_v42 = vand.u32 8388607, %v512_v7  ;;  %v7501_v31 = vpop.f32.mrb[18].mxu0 }
 0x103   :  { %v7482_v13 = vsub.s32 %v366_v27, %v369_v5  ;;  %vm466_vm0 = vc.u32 %v7476_v60, %v7470_v57  ;;  %v525_v18 = vshrl.u32 %v524_v9, 5  ;;  %9917 = vst [vmem:[#allocation12_spill] sm:$0xff] %v7501_v31  ;;  %v6273_v35 = vpop.f32.mrb[19].mxu0  ;;  %vm308_vm10 = vcmp.lt.s32.totalorder %v7372_v40, 0 }
 0x104   :  { %v527_v8 = vsub.s32 32, %v526_v11  ;;  %v468_v16 = vsel %vm466_vm0, %v467_v62, %v7471_v58  ;;  %v529_v19 = vshll.u32 %v9839_v4, %v526_v11  ;;  %v532_v61 = vshll.u32 %v9837_v6, %v526_v11 }
 0x105   :  { %v372_v15 = vsub.s32 0, %v7482_v13  ;;  %v469_v17 = vadd.s32 %v468_v16, %v464_v63  ;;  %v535_v28 = vshll.u32 %v9845_v10, %v526_v11  ;;  %v538_v29 = vshll.u32 %v9851_v12, %v526_v11 }
 0x106   :  { %v530_v20 = vshrl.u32 %v9837_v6, %v527_v8  ;;  %v533_v25 = vshrl.u32 %v9845_v10, %v527_v8  ;;  %v536_v26 = vshrl.u32 %v9851_v12, %v527_v8  ;;  %v539_v30 = vshrl.u32 %v9859_v14, %v527_v8 }
 0x107   :  { %v5716_v24 = vmin.u32 %v372_v15, %v7482_v13  ;;  %v470_v27 = vadd.s32 536870912, %v469_v17  ;;  %v542_v47 = vshrl.u32 %v9856_v21, %v527_v8  ;;  %v520_v50 = vor.u32 8388608, %v519_v42 }
 0x108   :  { %v531_v33 = vor.u32 %v530_v20, %v529_v19  ;;  %v534_v34 = vor.u32 %v533_v25, %v532_v61  ;;  %v537_v37 = vor.u32 %v536_v26, %v535_v28  ;;  %v540_v45 = vor.u32 %v539_v30, %v538_v29 }
 0x109   :  { %v374_v32 = vclz %v5716_v24  ;;  %v7503_v36 = vshrl.u32 %v470_v27, 30  ;;  %v541_v51 = vshll.u32 %v9859_v14, %v526_v11  ;;  %v528_v58 = vshrl.u32 %v9839_v4, %v527_v8 }
 0x10a   :  { %vm547_vm1 = vcmp.lt.s32.totalorder %v525_v18, 4  ;;  %vm544_vm4 = vcmp.lt.s32.totalorder %v525_v18, 1  ;;  %vm545_vm5 = vcmp.lt.s32.totalorder %v525_v18, 2  ;;  %vm546_vm6 = vcmp.lt.s32.totalorder %v525_v18, 3 }
 0x10b   :  { %v5717_v49 = vadd.s32 4294967294, %v374_v32  ;;  %v472_v53 = vshll.u32 %v7503_v36, 30  ;;  %v543_v59 = vor.u32 %v542_v47, %v541_v51  ;;  %v553_v5 = vsel %vm547_vm1, %v540_v45, 920167782 }
 0x10c   :  { %v549_v62 = vsel %vm547_vm1, %v537_v37, 2102212464  ;;  %v552_v63 = vsel %vm544_vm4, %v531_v33, %v534_v34  ;;  %v560_v15 = vshll.u32 %v520_v50, 8  ;;  %v618_v11 = vand.u32 2139095040, %v7392_v2 }
 0x10d   :  { %vm5718_vm3 = vcmp.lt.s32.totalorder %v5717_v49, 0  ;;  %v7510_v9 = vsub.s32 %v469_v17, %v472_v53  ;;  %v548_v8 = vsel %vm544_vm4, %v528_v58, %v531_v33  ;;  %v554_v42 = vsel %vm546_vm6, %v537_v37, %v553_v5 }
 0x10e   :  { %v377_v1 = vsel %vm5718_vm3, 0, %v5717_v49  ;;  %v556_v19 = vsel %vm544_vm4, %v534_v34, %v537_v37  ;;  %v550_v24 = vsel %vm546_vm6, %v534_v34, %v549_v62  ;;  %v555_v61 = vsel %vm545_vm5, %v552_v63, %v554_v42 }
 0x10f   :  { %v475_v16 = vsub.s32 0, %v7510_v9  ;;  %v382_v20 = vsub.s32 4294967266, %v377_v1  ;;  %v557_v17 = vsel %vm547_vm1, %v543_v59, 1326507024  ;;  %v378_v29 = vsub.s32 32, %v377_v1 }
 0x110   :  { %v558_v26 = vsel %vm546_vm6, %v540_v45, %v557_v17  ;;  %v7518_v27 = vmul.u32.u64.low %v560_v15, %v555_v61  ;;  %v7519_v28 = vmul.u32.u64.high %v560_v15, %v555_v61, %v7518_v27  ;;  %v619_v37 = vshrl.u32 %v618_v11, 23 }
 0x111   :  { %v5720_v25 = vmin.u32 %v475_v16, %v7510_v9  ;;  %v559_v30 = vsel %vm545_vm5, %v556_v19, %v558_v26  ;;  %v383_v34 = vadd.s32 127, %v382_v20  ;;  %v551_v47 = vsel %vm545_vm5, %v548_v8, %v550_v24 }
 0x112   :  { %v7523_v33 = vmul.u32.u64.low %v560_v15, %v559_v30  ;;  %v7524_v35 = vmul.u32.u64.high %v560_v15, %v559_v30, %v7523_v33  ;;  %v362_v49 = vadd.s32 %v7425_v56, %v7422_v54  ;;  %v570_v45 = vadd.s32 1, %v7519_v28 }
 0x113   :  { %v477_v32 = vclz %v5720_v25  ;;  %v5727_v51 = vadd.s32 4294967169, %v619_v37  ;;  %v9841_v53 = vand.u32 2147483647, %v7392_v2  ;;  %v567_v59 = vmul.u32 %v560_v15, %v551_v47 }
 0x114   :  { %v380_v58 = vshrl.u32 %v362_v49, %v378_v29  ;;  %vm569_vm7 = vc.u32 %v7524_v35, %v7518_v27  ;;  %v384_v62 = vshll.u32 %v383_v34, 23  ;;  %v379_v63 = vshll.u32 %v7482_v13, %v377_v1 }
 0x115   :  { %v5721_v50 = vadd.s32 4294967294, %v477_v32  ;;  %v625_v5 = vadd.s32 1, %v5727_v51  ;;  %v571_v18 = vsel %vm569_vm7, %v570_v45, %v7519_v28  ;;  %v622_v54 = vand.u32 8388607, %v9841_v53  ;;  %v7550_v32 = vpop.f32.mrb[20].mxu0 }
 0x116   :  { %v572_v11 = vadd.s32 %v571_v18, %v567_v59  ;;  %v7537_v56 = vor.u32 %v380_v58, %v379_v63  ;;  %v7539_v42 = vor.u32 4788187, %v384_v62  ;;  %v721_v20 = vand.u32 2139095040, %v7405_v23  ;;  %9918 = vst [vmem:[#allocation13_spill] sm:$0xff] %v7550_v32  ;;  %v6276_v49 = vpop.f32.mrb[21].mxu0 }
 0x117   :  { %vm5722_vm8 = vcmp.lt.s32.totalorder %v5721_v50, 0  ;;  %vm626_vm9 = vcmp.gt.s32.totalorder %v625_v5, 0  ;;  %v392_v24 = vsub.s32 4, %v7465_v52  ;;  %v623_v17 = vor.u32 8388608, %v622_v54 }
 0x118   :  { %v480_v16 = vsel %vm5722_vm8, 0, %v5721_v50  ;;  %v573_v8 = vadd.s32 536870912, %v572_v11  ;;  %v627_v15 = vsel %vm626_vm9, %v625_v5, 0  ;;  %v388_v26 = vcvt.s32.f32 %v7537_v56 }
 0x119   :  { %v629_v19 = vand.u32 31, %v627_v15  ;;  %v481_v13 = vsub.s32 32, %v480_v16  ;;  %v485_v1 = vsub.s32 4294967266, %v480_v16  ;;  %v465_v28 = vadd.s32 %v7470_v57, %v7476_v60 }
 0x11a   :  { %v7543_v61 = vshrl.u32 %v573_v8, 30  ;;  %v9833_v30 = vand.u32 2147483647, %v7405_v23  ;;  %v386_v33 = vand.u32 2147483647, %v7539_v42  ;;  %v722_v47 = vshrl.u32 %v721_v20, 23 }
 0x11b   :  { %v630_v25 = vsub.s32 32, %v629_v19  ;;  %v632_v45 = vshll.u32 %v9839_v4, %v629_v19  ;;  %v635_v57 = vshll.u32 %v9837_v6, %v629_v19  ;;  %v483_v51 = vshrl.u32 %v465_v28, %v481_v13 }
 0x11c   :  { %v575_v29 = vshll.u32 %v7543_v61, 30  ;;  %v486_v58 = vadd.s32 127, %v485_v1  ;;  %v628_v59 = vshrl.u32 %v627_v15, 5  ;;  %v7560_v5 = vshll.u32 %v623_v17, 8 }
 0x11d   :  { %v633_v37 = vshrl.u32 %v9837_v6, %v630_v25  ;;  %v636_v34 = vshrl.u32 %v9845_v10, %v630_v25  ;;  %v639_v60 = vshrl.u32 %v9851_v12, %v630_v25  ;;  %v638_v54 = vshll.u32 %v9845_v10, %v629_v19 }
 0x11e   :  { %v7555_v50 = vsub.s32 %v572_v11, %v575_v29  ;;  %v641_v11 = vshll.u32 %v9851_v12, %v629_v19  ;;  %v642_v56 = vshrl.u32 %v9859_v14, %v630_v25  ;;  %v644_v8 = vshll.u32 %v9859_v14, %v629_v19 }
 0x11f   :  { %v634_v18 = vor.u32 %v633_v37, %v632_v45  ;;  %v637_v63 = vor.u32 %v636_v34, %v635_v57  ;;  %v645_v42 = vshrl.u32 %v9856_v21, %v630_v25  ;;  %v482_v15 = vshll.u32 %v7510_v9, %v480_v16 }
 0x120   :  { %v578_v62 = vsub.s32 0, %v7555_v50  ;;  %v640_v13 = vor.u32 %v639_v60, %v638_v54  ;;  %v5731_v1 = vadd.s32 4294967169, %v722_v47  ;;  %v487_v17 = vshll.u32 %v486_v58, 23 }
 0x121   :  { %v643_v28 = vor.u32 %v642_v56, %v641_v11  ;;  %v646_v29 = vor.u32 %v645_v42, %v644_v8  ;;  %vm647_vm11 = vcmp.lt.s32.totalorder %v628_v59, 1  ;;  %v484_v37 = vor.u32 %v483_v51, %v482_v15 }
 0x122   :  { %v5724_v20 = vmin.u32 %v578_v62, %v7555_v50  ;;  %vm650_vm12 = vcmp.lt.s32.totalorder %v628_v59, 4  ;;  %v655_v49 = vsel %vm647_vm11, %v634_v18, %v637_v63  ;;  %v631_v45 = vshrl.u32 %v9839_v4, %v630_v25 }
 0x123   :  { %vm648_vm13 = vcmp.lt.s32.totalorder %v628_v59, 2  ;;  %vm649_vm14 = vcmp.lt.s32.totalorder %v628_v59, 3  ;;  %v656_v19 = vsel %vm650_vm12, %v643_v28, 920167782  ;;  %v652_v0 = vsel %vm650_vm12, %v640_v13, 2102212464 }
 0x124   :  { %v580_v34 = vclz %v5724_v20  ;;  %v657_v9 = vsel %vm649_vm14, %v640_v13, %v656_v19  ;;  %v659_v16 = vsel %vm647_vm11, %v637_v63, %v640_v13  ;;  %v488_v62 = vor.u32 4788187, %v487_v17 }
 0x125   :  { %v651_v60 = vsel %vm647_vm11, %v631_v45, %v634_v18  ;;  %v658_v47 = vsel %vm648_vm13, %v655_v49, %v657_v9  ;;  %v660_v58 = vsel %vm650_vm12, %v646_v29, 1326507024  ;;  %v653_v56 = vsel %vm649_vm14, %v637_v63, %v652_v0 }
 0x126   :  { %v5725_v57 = vadd.s32 4294967294, %v580_v34  ;;  %v661_v54 = vsel %vm649_vm14, %v643_v28, %v660_v58  ;;  %v7574_v51 = vmul.u32.u64.low %v7560_v5, %v658_v47  ;;  %v7575_v11 = vmul.u32.u64.high %v7560_v5, %v658_v47, %v7574_v51 }
 0x127   :  { %v662_v8 = vsel %vm648_vm13, %v659_v16, %v661_v54  ;;  %v728_v42 = vadd.s32 1, %v5731_v1  ;;  %v7579_v15 = vmul.f32 %v388_v26, %v386_v33  ;;  %v393_v18 = vsel %vm308_vm10, %v392_v24, %v7465_v52 }
 0x128   :  { %vm5726_vm15 = vcmp.lt.s32.totalorder %v5725_v57, 0  ;;  %v725_v13 = vand.u32 8388607, %v9833_v30  ;;  %v489_v17 = vand.u32 2147483647, %v488_v62  ;;  %v654_v26 = vsel %vm648_vm13, %v651_v60, %v653_v56 }
 0x129   :  { %v583_v25 = vsel %vm5726_vm15, 0, %v5725_v57  ;;  %v7589_v28 = vmul.u32.u64.low %v7560_v5, %v662_v8  ;;  %v7590_v29 = vmul.u32.u64.high %v7560_v5, %v662_v8, %v7589_v28  ;;  %vm729_vm0 = vcmp.gt.s32.totalorder %v728_v42, 0 }
 0x12a   :  { %v588_v20 = vsub.s32 4294967266, %v583_v25  ;;  %v673_v33 = vadd.s32 1, %v7575_v11  ;;  %v730_v63 = vsel %vm729_vm0, %v728_v42, 0  ;;  %vm7596_vm1 = vcmp.le.f32.partialorder %v306_v41, 0.7853982 }
 0x12b   :  { %v491_v24 = vcvt.s32.f32 %v484_v37  ;;  %v584_v1 = vsub.s32 32, %v583_v25  ;;  %v732_v34 = vand.u32 31, %v730_v63  ;;  %v390_v49 = vxor.u32 2147483648, %v7579_v15 }
 0x12c   :  { %v589_v0 = vadd.s32 127, %v588_v20  ;;  %v7603_v45 = vsel %vm7596_vm1, 0, %v393_v18  ;;  %v495_v59 = vsub.s32 4, %v7503_v36  ;;  %v568_v19 = vadd.s32 %v7518_v27, %v7524_v35  ;;  %v7617_v35 = vpop.f32.mrb[22].mxu0 }
 0x12d   :  { %v7608_v57 = vmul.f32 %v491_v24, %v489_v17  ;;  %v670_v41 = vmul.u32 %v7560_v5, %v654_v26  ;;  %vm672_vm3 = vc.u32 %v7590_v29, %v7574_v51  ;;  %v733_v37 = vsub.s32 32, %v732_v34  ;;  %9921 = vst [vmem:[#allocation14_spill] sm:$0xff] %v7617_v35 }
 0x12e   :  { %v585_v9 = vshll.u32 %v7555_v50, %v583_v25  ;;  %v590_v16 = vshll.u32 %v589_v0, 23  ;;  %v674_v62 = vsel %vm672_vm3, %v673_v33, %v7575_v11  ;;  %v726_v60 = vor.u32 8388608, %v725_v13  ;;  %v6279_v50 = vpop.f32.mrb[23].mxu0 }
 0x12f   :  { %v586_v47 = vshrl.u32 %v568_v19, %v584_v1  ;;  %v675_v58 = vadd.s32 %v674_v62, %v670_v41  ;;  %v736_v54 = vshrl.u32 %v9837_v6, %v733_v37  ;;  %v739_v27 = vshrl.u32 %v9845_v10, %v733_v37 }
 0x130   :  { %v731_v56 = vshrl.u32 %v730_v63, 5  ;;  %v735_v5 = vshll.u32 %v9839_v4, %v732_v34  ;;  %v738_v8 = vshll.u32 %v9837_v6, %v732_v34  ;;  %v742_v42 = vshrl.u32 %v9851_v12, %v733_v37 }
 0x131   :  { %v676_v25 = vadd.s32 536870912, %v675_v58  ;;  %v741_v11 = vshll.u32 %v9845_v10, %v732_v34  ;;  %v744_v18 = vshll.u32 %v9851_v12, %v732_v34  ;;  %v745_v20 = vshrl.u32 %v9859_v14, %v733_v37 }
 0x132   :  { %v591_v13 = vor.u32 4788187, %v590_v16  ;;  %v737_v17 = vor.u32 %v736_v54, %v735_v5  ;;  %v740_v28 = vor.u32 %v739_v27, %v738_v8  ;;  %v748_v0 = vshrl.u32 %v9856_v21, %v733_v37 }
 0x133   :  { %vm411_vm4 = vcmp.lt.s32.totalorder %v7378_v46, 0  ;;  %v7627_v26 = vshrl.u32 %v676_v25, 30  ;;  %v743_v33 = vor.u32 %v742_v42, %v741_v11  ;;  %v746_v63 = vor.u32 %v745_v20, %v744_v18 }
 0x134   :  { %v747_v24 = vshll.u32 %v9859_v14, %v732_v34  ;;  %v493_v1 = vxor.u32 2147483648, %v7608_v57  ;;  %v587_v19 = vor.u32 %v586_v47, %v585_v9  ;;  %v766_v41 = vshll.u32 %v726_v60, 8 }
 0x135   :  { %v9832_v62 = vand.u32 2147483647, %v7413_v43  ;;  %v678_v16 = vshll.u32 %v7627_v26, 30  ;;  %vm750_vm5 = vcmp.lt.s32.totalorder %v731_v56, 1  ;;  %vm753_vm6 = vcmp.lt.s32.totalorder %v731_v56, 4 }
 0x136   :  { %v749_v54 = vor.u32 %v748_v0, %v747_v24  ;;  %v734_v27 = vshrl.u32 %v9839_v4, %v733_v37  ;;  %v758_v5 = vsel %vm750_vm5, %v737_v17, %v740_v28  ;;  %v759_v8 = vsel %vm753_vm6, %v746_v63, 920167782 }
 0x137   :  { %v824_v42 = vand.u32 2139095040, %v7413_v43  ;;  %vm7639_vm7 = vcmp.le.f32.partialorder %v409_v48, 0.7853982  ;;  %v592_v9 = vand.u32 2147483647, %v591_v13  ;;  %v7643_v60 = vsub.s32 %v675_v58, %v678_v16 }
 0x138   :  { %vm752_vm8 = vcmp.lt.s32.totalorder %v731_v56, 3  ;;  %v755_v47 = vsel %vm753_vm6, %v743_v33, 2102212464  ;;  %vm514_vm9 = vcmp.lt.s32.totalorder %v7386_v55, 0  ;;  %v594_v37 = vcvt.s32.f32 %v587_v19 }
 0x139   :  { %vm751_vm11 = vcmp.lt.s32.totalorder %v731_v56, 2  ;;  %v760_v50 = vsel %vm752_vm8, %v743_v33, %v759_v8  ;;  %v762_v25 = vsel %vm750_vm5, %v740_v28, %v743_v33  ;;  %v681_v11 = vsub.s32 0, %v7643_v60 }
 0x13a   :  { %v754_v48 = vsel %vm750_vm5, %v734_v27, %v737_v17  ;;  %v761_v18 = vsel %vm751_vm11, %v758_v5, %v760_v50  ;;  %v763_v20 = vsel %vm753_vm6, %v749_v54, 1326507024  ;;  %v756_v58 = vsel %vm752_vm8, %v740_v28, %v755_v47 }
 0x13b   :  { %v764_v13 = vsel %vm752_vm8, %v746_v63, %v763_v20  ;;  %v7652_v0 = vmul.u32.u64.low %v766_v41, %v761_v18  ;;  %v7653_v24 = vmul.u32.u64.high %v766_v41, %v761_v18, %v7652_v0  ;;  %v595_v16 = vmul.f32 %v594_v37, %v592_v9 }
 0x13c   :  { %v5728_v19 = vmin.u32 %v681_v11, %v7643_v60  ;;  %v765_v8 = vsel %vm751_vm11, %v762_v25, %v764_v13  ;;  %v825_v33 = vshrl.u32 %v824_v42, 23  ;;  %v391_v17 = vsel %vm308_vm10, %v390_v49, %v7579_v15 }
 0x13d   :  { %v496_v28 = vsel %vm411_vm4, %v495_v59, %v7503_v36  ;;  %vm7670_vm12 = vcmp.le.f32.partialorder %v512_v7, 0.7853982  ;;  %v7674_v54 = vmul.u32.u64.low %v766_v41, %v765_v8  ;;  %v7675_v27 = vmul.u32.u64.high %v766_v41, %v765_v8, %v7674_v54 }
 0x13e   :  { %v598_v5 = vsub.s32 4, %v7543_v61  ;;  %v683_v42 = vclz %v5728_v19  ;;  %v757_v15 = vsel %vm751_vm11, %v754_v48, %v756_v58  ;;  %v5735_v49 = vadd.s32 4294967169, %v825_v33 }
 0x13f   :  { %v7680_v9 = vand.u32 3, %v7603_v45  ;;  %v494_v36 = vsel %vm411_vm4, %v493_v1, %v7608_v57  ;;  %v776_v7 = vadd.s32 1, %v7653_v24  ;;  %v828_v59 = vand.u32 8388607, %v9832_v62 }
 0x140   :  { %v596_v47 = vxor.u32 2147483648, %v595_v16  ;;  %v5729_v37 = vadd.s32 4294967294, %v683_v42  ;;  %v831_v50 = vadd.s32 1, %v5735_v49  ;;  %v927_v25 = vand.u32 2139095040, %v7432_v3 }
 0x141   :  { %v394_v56 = vsel %vm7596_vm1, %v7372_v40, %v391_v17  ;;  %v7694_v11 = vsel %vm7639_vm7, 0, %v496_v28  ;;  %v773_v48 = vmul.u32 %v766_v41, %v757_v15  ;;  %vm775_vm10 = vc.u32 %v7675_v27, %v7652_v0 }
 0x142   :  { %v599_v57 = vsel %vm514_vm9, %v598_v5, %v7543_v61  ;;  %vm5730_vm13 = vcmp.lt.s32.totalorder %v5729_v37, 0  ;;  %v777_v1 = vsel %vm775_vm10, %v776_v7, %v7653_v24  ;;  %vm832_vm14 = vcmp.gt.s32.totalorder %v831_v50, 0  ;;  %v7711_v61 = vpop.f32.mrb[24].mxu0 }
 0x143   :  { %v7705_v52 = vsel %vm7639_vm7, %v7378_v46, %v494_v36  ;;  %v7707_v18 = vsel %vm5730_vm13, 0, %v5729_v37  ;;  %v778_v20 = vadd.s32 %v777_v1, %v773_v48  ;;  %v833_v41 = vsel %vm832_vm14, %v831_v50, 0  ;;  %9926 = vst [vmem:[#allocation15_spill] sm:$0xff] %v7711_v61  ;;  %v6282_v34 = vpop.f32.mrb[25].mxu0 }
 0x144   :  { %7052 = vcosq.f32 %v394_v56  ;;  %v597_v58 = vsel %vm514_vm9, %v596_v47, %v595_v16  ;;  %v829_v13 = vor.u32 8388608, %v828_v59  ;;  %v928_v19 = vshrl.u32 %v927_v25, 23 }
 0x145   :  { %7054 = vsinq.f32 %v394_v56  ;;  %v691_v24 = vsub.s32 4294967266, %v7707_v18  ;;  %v779_v8 = vadd.s32 536870912, %v778_v20  ;;  %v835_v33 = vand.u32 31, %v833_v41 }
 0x146   :  { %7056 = vcosq.f32 %v7705_v52  ;;  %v7717_v17 = vsel %vm7670_vm12, 0, %v599_v57  ;;  %v671_v28 = vadd.s32 %v7574_v51, %v7590_v29  ;;  %v701_v16 = vsub.s32 4, %v7627_v26 }
 0x147   :  { %9927 = vst [vmem:[#allocation16_spill] sm:$0xff] %v7717_v17  ;;  %v7725_v54 = vsel %vm7670_vm12, %v7386_v55, %v597_v58  ;;  %v7727_v5 = vshrl.u32 %v779_v8, 30  ;;  %v836_v42 = vsub.s32 32, %v835_v33  ;;  %v9836_v15 = vand.u32 2147483647, %v7432_v3 }
 0x148   :  { %v687_v49 = vsub.s32 32, %v7707_v18  ;;  %v7731_v36 = vshrl.u32 %v833_v41, 5  ;;  %v7733_v7 = vshll.u32 %v829_v13, 8  ;;  %v5739_v59 = vadd.s32 4294967169, %v928_v19 }
 0x149   :  { %v692_v51 = vadd.s32 127, %v691_v24  ;;  %v781_v29 = vshll.u32 %v7727_v5, 30  ;;  %v838_v47 = vshll.u32 %v9839_v4, %v835_v33  ;;  %v839_v63 = vshrl.u32 %v9837_v6, %v836_v42 }
 0x14a   :  { %v841_v37 = vshll.u32 %v9837_v6, %v835_v33  ;;  %v842_v50 = vshrl.u32 %v9845_v10, %v836_v42  ;;  %v844_v25 = vshll.u32 %v9845_v10, %v835_v33  ;;  %v845_v56 = vshrl.u32 %v9851_v12, %v836_v42 }
 0x14b   :  { %v7742_v48 = vsub.s32 %v778_v20, %v781_v29  ;;  %v840_v57 = vor.u32 %v839_v63, %v838_v47  ;;  %v847_v1 = vshll.u32 %v9851_v12, %v835_v33  ;;  %v848_v41 = vshrl.u32 %v9859_v14, %v836_v42 }
 0x14c   :  { %v688_v58 = vshll.u32 %v7643_v60, %v7707_v18  ;;  %v843_v13 = vor.u32 %v842_v50, %v841_v37  ;;  %v846_v19 = vor.u32 %v845_v56, %v844_v25  ;;  %v934_v24 = vadd.s32 1, %v5739_v59 }
 0x14d   :  { %vm617_vm15 = vcmp.lt.s32.totalorder %v7392_v2, 0  ;;  %v784_v8 = vsub.s32 0, %v7742_v48  ;;  %v849_v34 = vor.u32 %v848_v41, %v847_v1  ;;  %v850_v62 = vshll.u32 %v9859_v14, %v835_v33 }
 0x14e   :  { %v851_v20 = vshrl.u32 %v9856_v21, %v836_v42  ;;  %v7752_v29 = vpop.eup %7052  ;;  %v689_v47 = vshrl.u32 %v671_v28, %v687_v49  ;;  %v693_v63 = vshll.u32 %v692_v51, 23  ;;  %vm853_vm0 = vcmp.lt.s32.totalorder %v7731_v36, 1 }
 0x14f   :  { %vm854_vm1 = vcmp.lt.s32.totalorder %v7731_v36, 2  ;;  %v7756_v60 = vpop.eup %7054  ;;  %v5732_v18 = vmin.u32 %v784_v8, %v7742_v48  ;;  %vm856_vm3 = vcmp.lt.s32.totalorder %v7731_v36, 4  ;;  %v861_v33 = vsel %vm853_vm0, %v840_v57, %v843_v13 }
 0x150   :  { %v852_v59 = vor.u32 %v851_v20, %v850_v62  ;;  %v7762_v37 = vpop.eup %7056  ;;  %v837_v50 = vshrl.u32 %v9839_v4, %v836_v42  ;;  %vm855_vm4 = vcmp.lt.s32.totalorder %v7731_v36, 3  ;;  %v862_v28 = vsel %vm856_vm3, %v849_v34, 920167782 }
 0x151   :  { %9928 = vst [vmem:[#allocation17_spill] sm:$0xff] %v7762_v37  ;;  %v865_v49 = vsel %vm853_vm0, %v843_v13, %v846_v19  ;;  %v786_v51 = vclz %v5732_v18  ;;  %v858_v25 = vsel %vm856_vm3, %v846_v19, 2102212464  ;;  %v863_v56 = vsel %vm855_vm4, %v846_v19, %v862_v28 }
 0x152   :  { %v866_v1 = vsel %vm856_vm3, %v852_v59, 1326507024  ;;  %v690_v62 = vor.u32 %v689_v47, %v688_v58  ;;  %v864_v41 = vsel %vm854_vm1, %v861_v33, %v863_v56  ;;  %v931_v20 = vand.u32 8388607, %v9836_v15  ;;  %v7811_v56 = vpop.f32.mrb[26].mxu0 }
 0x153   :  { %v867_v8 = vsel %vm855_vm4, %v849_v34, %v866_v1  ;;  %v5733_v30 = vadd.s32 4294967294, %v786_v51  ;;  %v857_v42 = vsel %vm853_vm0, %v837_v50, %v840_v57  ;;  %vm935_vm5 = vcmp.gt.s32.totalorder %v934_v24, 0 }
 0x154   :  { %v868_v39 = vsel %vm854_vm1, %v865_v49, %v867_v8  ;;  %v859_v18 = vsel %vm855_vm4, %v843_v13, %v858_v25  ;;  %v936_v58 = vsel %vm935_vm5, %v934_v24, 0  ;;  %v694_v47 = vor.u32 4788187, %v693_v63 }
 0x155   :  { %v7777_v19 = vmul.u32.u64.low %v7733_v7, %v868_v39  ;;  %v7778_v59 = vmul.u32.u64.high %v7733_v7, %v868_v39, %v7777_v19  ;;  %vm5734_vm6 = vcmp.lt.s32.totalorder %v5733_v30, 0  ;;  %7058 = vsinq.f32 %v7705_v52 }
 0x156   :  { %v7781_v34 = vmul.u32.u64.low %v7733_v7, %v864_v41  ;;  %v7782_v33 = vmul.u32.u64.high %v7733_v7, %v864_v41, %v7781_v34  ;;  %v7791_v57 = vsel %vm617_vm15, %v701_v16, %v7627_v26  ;;  %v7793_v13 = vsel %vm5734_vm6, 0, %v5733_v30 }
 0x157   :  { %v938_v39 = vand.u32 31, %v936_v58  ;;  %7060 = vcosq.f32 %v7725_v54  ;;  %v774_v24 = vadd.s32 %v7652_v0, %v7675_v27  ;;  %v860_v63 = vsel %vm854_vm1, %v857_v42, %v859_v18 }
 0x158   :  { %v794_v50 = vsub.s32 4294967266, %v7793_v13  ;;  %vm878_vm7 = vc.u32 %v7778_v59, %v7781_v34  ;;  %v932_v26 = vor.u32 8388608, %v931_v20  ;;  %v695_v30 = vand.u32 2147483647, %v694_v47  ;;  %v6285_v20 = vpop.f32.mrb[27].mxu0 }
 0x159   :  { %v939_v16 = vsub.s32 32, %v938_v39  ;;  %v697_v28 = vcvt.s32.f32 %v690_v62  ;;  %v879_v49 = vadd.s32 1, %v7782_v33  ;;  %v1030_v51 = vand.u32 2139095040, %v7448_v22 }
 0x15a   :  { %v876_v0 = vmul.u32 %v7733_v7, %v860_v63  ;;  %v7807_v27 = vshrl.u32 %v936_v58, 5  ;;  %v941_v41 = vshll.u32 %v9839_v4, %v938_v39  ;;  %v944_v62 = vshll.u32 %v9837_v6, %v938_v39 }
 0x15b   :  { %v942_v36 = vshrl.u32 %v9837_v6, %v939_v16  ;;  %v945_v25 = vshrl.u32 %v9845_v10, %v939_v16  ;;  %v880_v1 = vsel %vm878_vm7, %v879_v49, %v7782_v33  ;;  %v948_v8 = vshrl.u32 %v9851_v12, %v939_v16 }
 0x15c   :  { %v790_v42 = vsub.s32 32, %v7793_v13  ;;  %v795_v7 = vadd.s32 127, %v794_v50  ;;  %v881_v18 = vadd.s32 %v880_v1, %v876_v0  ;;  %v947_v19 = vshll.u32 %v9845_v10, %v938_v39 }
 0x15d   :  { %v943_v58 = vor.u32 %v942_v36, %v941_v41  ;;  %v946_v47 = vor.u32 %v945_v25, %v944_v62  ;;  %v950_v63 = vshll.u32 %v9851_v12, %v938_v39  ;;  %v951_v15 = vshrl.u32 %v9859_v14, %v939_v16 }
 0x15e   :  { %v882_v33 = vadd.s32 536870912, %v881_v18  ;;  %v949_v49 = vor.u32 %v948_v8, %v947_v19  ;;  %v953_v52 = vshll.u32 %v9859_v14, %v938_v39  ;;  %v954_v6 = vshrl.u32 %v9856_v21, %v939_v16 }
 0x15f   :  { %v698_v4 = vmul.f32 %v697_v28, %v695_v30  ;;  %v804_v20 = vsub.s32 4, %v7727_v5  ;;  %v952_v53 = vor.u32 %v951_v15, %v950_v63  ;;  %v7824_v50 = vshll.u32 %v932_v26, 8  ;;  %v7826_v0 = vpop.eup %7058 }
 0x160   :  { %v7828_v36 = vshrl.u32 %v882_v33, 30  ;;  %v955_v25 = vor.u32 %v954_v6, %v953_v52  ;;  %vm959_vm8 = vcmp.lt.s32.totalorder %v7807_v27, 4  ;;  %v1031_v1 = vshrl.u32 %v1030_v51, 23 }
 0x161   :  { %v7831_v41 = vpop.eup %7060  ;;  %v9930_v39 = vand.u32 2147483647, %v7392_v2  ;;  %v796_v30 = vshll.u32 %v795_v7, 23  ;;  %vm956_vm11 = vcmp.lt.s32.totalorder %v7807_v27, 1  ;;  %vm958_vm12 = vcmp.lt.s32.totalorder %v7807_v27, 3 }
 0x162   :  { %9929 = vst [vmem:[#allocation18_spill] sm:$0xff] %v7831_v41  ;;  %v965_v15 = vsel %vm959_vm8, %v952_v53, 920167782  ;;  %v792_v6 = vshrl.u32 %v774_v24, %v790_v42  ;;  %v884_v52 = vshll.u32 %v7828_v36, 30  ;;  %v964_v26 = vsel %vm956_vm11, %v943_v58, %v946_v47 }
 0x163   :  { %vm7835_vm9 = vcmp.le.f32.partialorder %v9930_v39, 0.7853982  ;;  %v966_v28 = vsel %vm958_vm12, %v949_v49, %v965_v15  ;;  %v699_v51 = vxor.u32 2147483648, %v698_v4  ;;  %vm720_vm10 = vcmp.lt.s32.totalorder %v7405_v23, 0 }
 0x164   :  { %v791_v8 = vshll.u32 %v7742_v48, %v7793_v13  ;;  %v9933_v7 = vmov 683565275   ;;  %v968_v63 = vsel %vm956_vm11, %v946_v47, %v949_v49  ;;  %v7854_v24 = vsub.s32 %v881_v18, %v884_v52 }
 0x165   :  { %v940_v19 = vshrl.u32 %v9933_v7, %v939_v16  ;;  %vm957_vm13 = vcmp.lt.s32.totalorder %v7807_v27, 2  ;;  %v961_v42 = vsel %vm959_vm8, %v949_v49, 2102212464  ;;  %v969_v33 = vsel %vm959_vm8, %v955_v25, 1326507024  ;;  %v2059_v25 = vld [vmem:[%s9818_s4 + $0x10] sm:$0xff] }
 0x166   :  { %v797_v39 = vor.u32 4788187, %v796_v30  ;;  %v967_v15 = vsel %vm957_vm13, %v964_v26, %v966_v28  ;;  %v970_v48 = vsel %vm958_vm12, %v952_v53, %v969_v33  ;;  %v5743_v13 = vadd.s32 4294967169, %v1031_v1  ;;  %v2060_v30 = vld [vmem:[%s9818_s4 + $0x18] sm:$0xff] }
 0x167   :  { %v793_v16 = vor.u32 %v792_v6, %v791_v8  ;;  %v887_v18 = vsub.s32 0, %v7854_v24  ;;  %v960_v52 = vsel %vm956_vm11, %v940_v19, %v943_v58  ;;  %v971_v49 = vsel %vm957_vm13, %v968_v63, %v970_v48 }
 0x168   :  { %v962_v53 = vsel %vm958_vm12, %v946_v47, %v961_v42  ;;  %v7879_v1 = vmul.u32.u64.low %v7824_v50, %v971_v49  ;;  %v7880_v6 = vmul.u32.u64.high %v7824_v50, %v971_v49, %v7879_v1  ;;  %v1037_v26 = vadd.s32 1, %v5743_v13 }
 0x169   :  { %v700_v58 = vsel %vm617_vm15, %v699_v51, %v698_v4  ;;  %v5736_v28 = vmin.u32 %v887_v18, %v7854_v24  ;;  %v7886_v8 = vmul.u32.u64.low %v7824_v50, %v967_v15  ;;  %v7887_v19 = vmul.u32.u64.high %v7824_v50, %v967_v15, %v7886_v8 }
 0x16a   :  { %v798_v63 = vand.u32 2147483647, %v797_v39  ;;  %v9934_v33 = vand.u32 2147483647, %v7448_v22  ;;  %vm1038_vm14 = vcmp.gt.s32.totalorder %v1037_v26, 0  ;;  %v7892_v47 = vpack.c.bf16 %v2060_v30, %v2059_v25 }
 0x16b   :  { %v7897_v42 = vsel %vm7835_vm9, 0, %v7791_v57  ;;  %v889_v4 = vclz %v5736_v28  ;;  %v963_v51 = vsel %vm957_vm13, %v960_v52, %v962_v53  ;;  %v1039_v13 = vsel %vm1038_vm14, %v1037_v26, 0 }
 0x16c   :  { %v1034_v48 = vand.u32 8388607, %v9934_v33  ;;  %9935 = vst [vmem:[#allocation19_spill] sm:$0xff] %v7892_v47  ;;  %9936 = vst [vmem:[#allocation20_spill] sm:$0xff] %v7897_v42  ;;  %7062 = vsinq.f32 %v7725_v54  ;;  %v800_v15 = vcvt.s32.f32 %v793_v16  ;;  %vm981_vm15 = vc.u32 %v7880_v6, %v7886_v8  ;;  %6823 = vmatpush3.bf16.msra.mxu0 %v7892_v47 }
 0x16d   :  { %v1041_v39 = vand.u32 31, %v1039_v13  ;;  %v7908_v18 = vsel %vm7835_vm9, %v7392_v2, %v700_v58  ;;  %v7913_v57 = vsel %vm720_vm10, %v804_v20, %v7727_v5  ;;  %v5737_v27 = vadd.s32 4294967294, %v889_v4 }
 0x16e   :  { %v982_v54 = vadd.s32 1, %v7887_v19  ;;  %v9937_v16 = vmov 0.0|0.0   ;;  %v7917_v52 = vmul.f32 %v800_v15, %v798_v63  ;;  %v979_v49 = vmul.u32 %v7824_v50, %v963_v51 }
 0x16f   :  { %6824 = vmatprep.subr.bf16.mxu0 %v9937_v16  ;;  %v1035_v25 = vor.u32 8388608, %v1034_v48  ;;  %v1042_v30 = vsub.s32 32, %v1041_v39  ;;  %vm5738_vm0 = vcmp.lt.s32.totalorder %v5737_v27, 0  ;;  %v7921_v53 = vshrl.u32 %v1039_v13, 5 }
 0x170   :  { %v983_v62 = vsel %vm981_vm15, %v982_v54, %v7887_v19  ;;  %v1133_v1 = vand.u32 2139095040, %v7461_v44  ;;  %v7924_v5 = vsel %vm5738_vm0, 0, %v5737_v27  ;;  %v1044_v26 = vshll.u32 %v9933_v7, %v1041_v39  ;;  %v7932_v19 = vpop.f32.mrb[28].mxu0 }
 0x171   :  { %v984_v20 = vadd.s32 %v983_v62, %v979_v49  ;;  %v9938_v58 = vmov 2475754826   ;;  %v897_v63 = vsub.s32 4294967266, %v7924_v5  ;;  %v1048_v33 = vshrl.u32 %v9845_v10, %v1042_v30  ;;  %v6288_v27 = vpop.f32.mrb[29].mxu0 }
 0x172   :  { %v1045_v28 = vshrl.u32 %v9938_v58, %v1042_v30  ;;  %v1047_v50 = vshll.u32 %v9938_v58, %v1041_v39  ;;  %v1050_v48 = vshll.u32 %v9845_v10, %v1041_v39  ;;  %v1051_v51 = vshrl.u32 %v9851_v12, %v1042_v30 }
 0x173   :  { %v985_v4 = vadd.s32 536870912, %v984_v20  ;;  %v1053_v13 = vshll.u32 %v9851_v12, %v1041_v39  ;;  %v1054_v15 = vshrl.u32 %v9859_v14, %v1042_v30  ;;  %v893_v54 = vsub.s32 32, %v7924_v5 }
 0x174   :  { %v898_v49 = vadd.s32 127, %v897_v63  ;;  %v1056_v62 = vshll.u32 %v9859_v14, %v1041_v39  ;;  %v1057_v42 = vshrl.u32 %v9856_v21, %v1042_v30  ;;  %v1046_v10 = vor.u32 %v1045_v28, %v1044_v26 }
 0x175   :  { %v7940_v2 = vshrl.u32 %v985_v4, 30  ;;  %v1049_v55 = vor.u32 %v1048_v33, %v1047_v50  ;;  %v1052_v41 = vor.u32 %v1051_v51, %v1050_v48  ;;  %v802_v17 = vxor.u32 2147483648, %v7917_v52 }
 0x176   :  { %v877_v12 = vadd.s32 %v7781_v34, %v7778_v59  ;;  %v899_v47 = vshll.u32 %v898_v49, 23  ;;  %v1055_v46 = vor.u32 %v1054_v15, %v1053_v13  ;;  %v7945_v27 = vpop.eup %7062  ;;  %v9940_v63 = vand.u32 2147483647, %v7405_v23 }
 0x177   :  { %9939 = vst [vmem:[#allocation21_spill] sm:$0xff] %v7945_v27  ;;  %v987_v4 = vshll.u32 %v7940_v2, 30  ;;  %v1058_v26 = vor.u32 %v1057_v42, %v1056_v62  ;;  %v1075_v28 = vshll.u32 %v1035_v25, 8  ;;  %v9858_v50 = vand.u32 2147483647, %v7461_v44 }
 0x178   :  { %vm7949_vm1 = vcmp.le.f32.partialorder %v9940_v63, 0.7853982  ;;  %v1043_v33 = vshrl.u32 %v9933_v7, %v1042_v30  ;;  %vm1059_vm3 = vcmp.lt.s32.totalorder %v7921_v53, 1  ;;  %vm1062_vm4 = vcmp.lt.s32.totalorder %v7921_v53, 4 }
 0x179   :  { %v1134_v59 = vshrl.u32 %v1133_v1, 23  ;;  %v895_v34 = vshrl.u32 %v877_v12, %v893_v54  ;;  %v7958_v48 = vsub.s32 %v984_v20, %v987_v4  ;;  %v1064_v51 = vsel %vm1062_vm4, %v1052_v41, 2102212464 }
 0x17a   :  { %v1067_v13 = vsel %vm1059_vm3, %v1046_v10, %v1049_v55  ;;  %vm823_vm5 = vcmp.lt.s32.totalorder %v7413_v43, 0  ;;  %v900_v42 = vor.u32 4788187, %v899_v47  ;;  %vm1060_vm6 = vcmp.lt.s32.totalorder %v7921_v53, 2 }
 0x17b   :  { %vm1061_vm7 = vcmp.lt.s32.totalorder %v7921_v53, 3  ;;  %v1068_v25 = vsel %vm1062_vm4, %v1055_v46, 920167782  ;;  %v990_v30 = vsub.s32 0, %v7958_v48  ;;  %v1071_v12 = vsel %vm1059_vm3, %v1049_v55, %v1052_v41 }
 0x17c   :  { %v1069_v15 = vsel %vm1061_vm7, %v1052_v41, %v1068_v25  ;;  %v1072_v1 = vsel %vm1062_vm4, %v1058_v26, 1326507024  ;;  %v1063_v20 = vsel %vm1059_vm3, %v1043_v33, %v1046_v10  ;;  %v1065_v54 = vsel %vm1061_vm7, %v1049_v55, %v1064_v51 }
 0x17d   :  { %v1070_v49 = vsel %vm1060_vm6, %v1067_v13, %v1069_v15  ;;  %v1073_v47 = vsel %vm1061_vm7, %v1055_v46, %v1072_v1  ;;  %v5740_v62 = vmin.u32 %v990_v30, %v7958_v48  ;;  %v894_v41 = vshll.u32 %v7854_v24, %v7924_v5 }
 0x17e   :  { %v1074_v63 = vsel %vm1060_vm6, %v1071_v12, %v1073_v47  ;;  %v7975_v4 = vmul.u32.u64.low %v1075_v28, %v1070_v49  ;;  %v7976_v21 = vmul.u32.u64.high %v1075_v28, %v1070_v49, %v7975_v4  ;;  %v5747_v55 = vadd.s32 4294967169, %v1134_v59 }
 0x17f   :  { %v7981_v26 = vmul.u32.u64.low %v1075_v28, %v1074_v63  ;;  %v7982_v25 = vmul.u32.u64.high %v1075_v28, %v1074_v63, %v7981_v26  ;;  %7064 = vcosq.f32 %v7908_v18  ;;  %v907_v46 = vsub.s32 4, %v7828_v36  ;;  %v8017_v63 = vpop.f32.mrb[30].mxu0 }
 0x180   :  { %v992_v10 = vclz %v5740_v62  ;;  %v1066_v33 = vsel %vm1060_vm6, %v1063_v20, %v1065_v54  ;;  %7066 = vsinq.f32 %v7908_v18  ;;  %v7992_v51 = vsel %vm7949_vm1, 0, %v7913_v57 }
 0x181   :  { %9943 = vst [vmem:[#allocation22_spill] sm:$0xff] %v7992_v51  ;;  %v896_v24 = vor.u32 %v895_v34, %v894_v41  ;;  %v1140_v5 = vadd.s32 1, %v5747_v55  ;;  %v803_v59 = vsel %vm720_vm10, %v802_v17, %v7917_v52  ;;  %v901_v13 = vand.u32 2147483647, %v900_v42 }
 0x182   :  { %v5741_v30 = vadd.s32 4294967294, %v992_v10  ;;  %v1085_v15 = vadd.s32 1, %v7976_v21  ;;  %v1082_v12 = vmul.u32 %v1075_v28, %v1066_v33  ;;  %vm1084_vm8 = vc.u32 %v7982_v25, %v7975_v4 }
 0x183   :  { %v1137_v18 = vand.u32 8388607, %v9858_v50  ;;  %vm1141_vm9 = vcmp.gt.s32.totalorder %v1140_v5, 0  ;;  %v8005_v57 = vsel %vm823_vm5, %v907_v46, %v7828_v36  ;;  %v903_v53 = vcvt.s32.f32 %v896_v24  ;;  %v6291_v46 = vpop.f32.mrb[31].mxu0 }
 0x184   :  { %vm5742_vm11 = vcmp.lt.s32.totalorder %v5741_v30, 0  ;;  %v1086_v17 = vsel %vm1084_vm8, %v1085_v15, %v7976_v21  ;;  %v1142_v52 = vsel %vm1141_vm9, %v1140_v5, 0  ;;  %v8011_v1 = vsel %vm7949_vm1, %v7405_v23, %v803_v59 }
 0x185   :  { %v995_v34 = vsel %vm5742_vm11, 0, %v5741_v30  ;;  %v1087_v42 = vadd.s32 %v1086_v17, %v1082_v12  ;;  %v1144_v28 = vand.u32 31, %v1142_v52  ;;  %v980_v20 = vadd.s32 %v7886_v8, %v7880_v6 }
 0x186   :  { %v996_v54 = vsub.s32 32, %v995_v34  ;;  %v1000_v49 = vsub.s32 4294967266, %v995_v34  ;;  %v8015_v36 = vmul.f32 %v903_v53, %v901_v13  ;;  %v1138_v62 = vor.u32 8388608, %v1137_v18 }
 0x187   :  { %v1088_v47 = vadd.s32 536870912, %v1087_v42  ;;  %v1145_v21 = vsub.s32 32, %v1144_v28  ;;  %v997_v41 = vshll.u32 %v7958_v48, %v995_v34  ;;  %v1147_v39 = vshll.u32 %v9933_v7, %v1144_v28 }
 0x188   :  { %v998_v26 = vshrl.u32 %v980_v20, %v996_v54  ;;  %v1001_v55 = vadd.s32 127, %v1000_v49  ;;  %v1150_v8 = vshll.u32 %v9938_v58, %v1144_v28  ;;  %v9944_v33 = vmov 2131351028  }
 0x189   :  { %v8021_v10 = vshrl.u32 %v1088_v47, 30  ;;  %v1148_v6 = vshrl.u32 %v9938_v58, %v1145_v21  ;;  %v1151_v24 = vshrl.u32 %v9944_v33, %v1145_v21  ;;  %v8026_v5 = vpop.eup %7064  ;;  %v1153_v13 = vshll.u32 %v9944_v33, %v1144_v28 }
 0x18a   :  { %9945 = vst [vmem:[#allocation23_spill] sm:$0xff] %v8026_v5  ;;  %v1002_v59 = vshll.u32 %v1001_v55, 23  ;;  %v9946_v30 = vmov 2102212464   ;;  %v1157_v15 = vshrl.u32 %v9859_v14, %v1145_v21  ;;  %v8031_v12 = vpop.eup %7066  ;;  %v999_v18 = vor.u32 %v998_v26, %v997_v41 }
 0x18b   :  { %v1154_v48 = vshrl.u32 %v9946_v30, %v1145_v21  ;;  %9947 = vst [vmem:[#allocation24_spill] sm:$0xff] %v8031_v12  ;;  %v1090_v17 = vshll.u32 %v8021_v10, 30  ;;  %v1143_v53 = vshrl.u32 %v1142_v52, 5  ;;  %v1156_v34 = vshll.u32 %v9946_v30, %v1144_v28 }
 0x18c   :  { %v1003_v20 = vor.u32 4788187, %v1002_v59  ;;  %v1149_v54 = vor.u32 %v1148_v6, %v1147_v39  ;;  %v1152_v49 = vor.u32 %v1151_v24, %v1150_v8  ;;  %v9948_v55 = vand.u32 2147483647, %v7413_v43 }
 0x18d   :  { %v1155_v47 = vor.u32 %v1154_v48, %v1153_v13  ;;  %v8041_v50 = vsub.s32 %v1087_v42, %v1090_v17  ;;  %v1158_v14 = vor.u32 %v1157_v15, %v1156_v34  ;;  %v9951_v23 = vmov 920167782  }
 0x18e   :  { %vm8037_vm12 = vcmp.le.f32.partialorder %v9948_v55, 0.7853982  ;;  %v1159_v41 = vshll.u32 %v9951_v23, %v1144_v28  ;;  %v9952_v26 = vmov 1326507024   ;;  %v905_v52 = vxor.u32 2147483648, %v8015_v36 }
 0x18f   :  { %v1160_v51 = vshrl.u32 %v9952_v26, %v1145_v21  ;;  %v1004_v5 = vand.u32 2147483647, %v1003_v20  ;;  %v1178_v59 = vshll.u32 %v1138_v62, 8  ;;  %v1236_v39 = vand.u32 2139095040, %v7501_v31 }
 0x190   :  { %v1093_v6 = vsub.s32 0, %v8041_v50  ;;  %v1146_v8 = vshrl.u32 %v9933_v7, %v1145_v21  ;;  %vm1162_vm10 = vcmp.lt.s32.totalorder %v1143_v53, 1  ;;  %vm926_vm13 = vcmp.lt.s32.totalorder %v7432_v3, 0 }
 0x191   :  { %v1161_v24 = vor.u32 %v1160_v51, %v1159_v41  ;;  %v1006_v42 = vcvt.s32.f32 %v999_v18  ;;  %vm1164_vm14 = vcmp.lt.s32.totalorder %v1143_v53, 3  ;;  %vm1165_vm15 = vcmp.lt.s32.totalorder %v1143_v53, 4 }
 0x192   :  { %v1170_v28 = vsel %vm1162_vm10, %v1149_v54, %v1152_v49  ;;  %v5744_v13 = vmin.u32 %v1093_v6, %v8041_v50  ;;  %v1167_v48 = vsel %vm1165_vm15, %v1155_v47, 2102212464  ;;  %v1171_v15 = vsel %vm1165_vm15, %v1158_v14, 920167782 }
 0x193   :  { %v1174_v17 = vsel %vm1162_vm10, %v1152_v49, %v1155_v47  ;;  %v1007_v62 = vmul.f32 %v1006_v42, %v1004_v5  ;;  %vm1163_vm0 = vcmp.lt.s32.totalorder %v1143_v53, 2  ;;  %v1172_v34 = vsel %vm1164_vm14, %v1155_v47, %v1171_v15  ;;  %v2062_v53 = vld [vmem:[%s9818_s4 + $0x28] sm:$0xff] }
 0x194   :  { %v1175_v20 = vsel %vm1165_vm15, %v1161_v24, 1326507024  ;;  %v1095_v55 = vclz %v5744_v13  ;;  %v1166_v12 = vsel %vm1162_vm10, %v1146_v8, %v1149_v54  ;;  %v1173_v51 = vsel %vm1163_vm0, %v1170_v28, %v1172_v34 }
 0x195   :  { %v1176_v21 = vsel %vm1164_vm14, %v1158_v14, %v1175_v20  ;;  %v1168_v41 = vsel %vm1164_vm14, %v1152_v49, %v1167_v48  ;;  %v8053_v27 = vmul.u32.u64.low %v1178_v59, %v1173_v51  ;;  %v8054_v37 = vmul.u32.u64.high %v1178_v59, %v1173_v51, %v8053_v27 }
 0x196   :  { %v1177_v18 = vsel %vm1163_vm0, %v1174_v17, %v1176_v21  ;;  %v9953_v6 = vand.u32 2147483647, %v7432_v3  ;;  %v1010_v5 = vsub.s32 4, %v7940_v2  ;;  %v5745_v47 = vadd.s32 4294967294, %v1095_v55 }
 0x197   :  { %v8064_v54 = vmul.u32.u64.low %v1178_v59, %v1177_v18  ;;  %v8065_v8 = vmul.u32.u64.high %v1178_v59, %v1177_v18, %v8064_v54  ;;  %7068 = vcosq.f32 %v8011_v1  ;;  %v906_v14 = vsel %vm823_vm5, %v905_v52, %v8015_v36 }
 0x198   :  { %vm8059_vm1 = vcmp.le.f32.partialorder %v9953_v6, 0.7853982  ;;  %v8074_v49 = vsel %vm8037_vm12, 0, %v8005_v57  ;;  %vm1029_vm3 = vcmp.lt.s32.totalorder %v7448_v22, 0  ;;  %v1237_v24 = vshrl.u32 %v1236_v39, 23 }
 0x199   :  { %9956 = vst [vmem:[#allocation25_spill] sm:$0xff] %v8074_v49  ;;  %7070 = vsinq.f32 %v8011_v1  ;;  %v1008_v42 = vxor.u32 2147483648, %v1007_v62  ;;  %vm5746_vm4 = vcmp.lt.s32.totalorder %v5745_v47, 0  ;;  %v1169_v28 = vsel %vm1163_vm0, %v1166_v12, %v1168_v41  ;;  %v2061_v12 = vld [vmem:[%s9818_s4 + $0x20] sm:$0xff] }
 0x19a   :  { %v1098_v13 = vsel %vm5746_vm4, 0, %v5745_v47  ;;  %v1188_v48 = vadd.s32 1, %v8054_v37  ;;  %v9869_v15 = vand.u32 2147483647, %v7501_v31  ;;  %v5751_v36 = vadd.s32 4294967169, %v1237_v24  ;;  %v8119_v24 = vpop.f32.mrb[32].mxu0 }
 0x19b   :  { %v909_v57 = vsel %vm8037_vm12, %v7413_v43, %v906_v14  ;;  %v1011_v52 = vsel %vm926_vm13, %v1010_v5, %v7940_v2  ;;  %v1099_v39 = vsub.s32 32, %v1098_v13  ;;  %v1103_v1 = vsub.s32 4294967266, %v1098_v13 }
 0x19c   :  { %v1083_v17 = vadd.s32 %v7975_v4, %v7982_v25  ;;  %v1185_v34 = vmul.u32 %v1178_v59, %v1169_v28  ;;  %vm1187_vm5 = vc.u32 %v8065_v8, %v8053_v27  ;;  %v1243_v46 = vadd.s32 1, %v5751_v36  ;;  %v6294_v36 = vpop.f32.mrb[33].mxu0 }
 0x19d   :  { %v1009_v2 = vsel %vm926_vm13, %v1008_v42, %v1007_v62  ;;  %v1104_v20 = vadd.s32 127, %v1103_v1  ;;  %v1113_v55 = vsub.s32 4, %v8021_v10  ;;  %v1189_v51 = vsel %vm1187_vm5, %v1188_v48, %v8054_v37 }
 0x19e   :  { %v1190_v21 = vadd.s32 %v1189_v51, %v1185_v34  ;;  %v1240_v41 = vand.u32 8388607, %v9869_v15  ;;  %vm1244_vm6 = vcmp.gt.s32.totalorder %v1243_v46, 0  ;;  %v8103_v18 = vpack.c.bf16 %v2062_v53, %v2061_v12 }
 0x19f   :  { %v1101_v4 = vshrl.u32 %v1083_v17, %v1099_v39  ;;  %v1105_v25 = vshll.u32 %v1104_v20, 23  ;;  %v1245_v59 = vsel %vm1244_vm6, %v1243_v46, 0  ;;  %v1339_v6 = vand.u32 2139095040, %v7550_v32 }
 0x1a0   :  { %7072 = vcosq.f32 %v909_v57  ;;  %v8108_v62 = vsel %vm8059_vm1, 0, %v1011_v52  ;;  %v1191_v5 = vadd.s32 536870912, %v1190_v21  ;;  %v1247_v47 = vand.u32 31, %v1245_v59  ;;  %6826 = vmatpush3.bf16.msra.mxu0 %v8103_v18 }
 0x1a1   :  { %9957 = vst [vmem:[#allocation26_spill] sm:$0xff] %v8108_v62  ;;  %7074 = vsinq.f32 %v909_v57  ;;  %v1100_v37 = vshll.u32 %v8041_v50, %v1098_v13  ;;  %v8115_v54 = vsel %vm1029_vm3, %v1113_v55, %v8021_v10  ;;  %6827 = vmatprep.subr.bf16.mxu0 %v9937_v16  ;;  %v8121_v42 = vpop.eup %7068  ;;  %v8126_v28 = vsel %vm8059_vm1, %v7432_v3, %v1009_v2 }
 0x1a2   :  { %v1106_v48 = vor.u32 4788187, %v1105_v25  ;;  %v8128_v50 = vshrl.u32 %v1191_v5, 30  ;;  %v1248_v13 = vsub.s32 32, %v1247_v47  ;;  %v1241_v52 = vor.u32 8388608, %v1240_v41 }
 0x1a3   :  { %v8130_v10 = vpop.eup %7070  ;;  %v1102_v57 = vor.u32 %v1101_v4, %v1100_v37  ;;  %v1246_v39 = vshrl.u32 %v1245_v59, 5  ;;  %v1340_v1 = vshrl.u32 %v1339_v6, 23  ;;  %v1250_v53 = vshll.u32 %v9933_v7, %v1247_v47 }
 0x1a4   :  { %v1193_v12 = vshll.u32 %v8128_v50, 30  ;;  %v1251_v17 = vshrl.u32 %v9938_v58, %v1248_v13  ;;  %v1253_v38 = vshll.u32 %v9938_v58, %v1247_v47  ;;  %v1254_v34 = vshrl.u32 %v9944_v33, %v1248_v13 }
 0x1a5   :  { %v1256_v46 = vshll.u32 %v9944_v33, %v1247_v47  ;;  %v1257_v2 = vshrl.u32 %v9946_v30, %v1248_v13  ;;  %v1260_v20 = vshrl.u32 %v9951_v23, %v1248_v13  ;;  %v9958_v55 = vand.u32 2147483647, %v7448_v22 }
 0x1a6   :  { %v1107_v41 = vand.u32 2147483647, %v1106_v48  ;;  %v8146_v4 = vsub.s32 %v1190_v21, %v1193_v12  ;;  %v1259_v25 = vshll.u32 %v9946_v30, %v1247_v47  ;;  %v1263_v59 = vshrl.u32 %v9952_v26, %v1248_v13 }
 0x1a7   :  { %vm8142_vm7 = vcmp.le.f32.partialorder %v9958_v55, 0.7853982  ;;  %v1252_v6 = vor.u32 %v1251_v17, %v1250_v53  ;;  %v1255_v5 = vor.u32 %v1254_v34, %v1253_v38  ;;  %v1258_v37 = vor.u32 %v1257_v2, %v1256_v46 }
 0x1a8   :  { %v1262_v36 = vshll.u32 %v9951_v23, %v1247_v47  ;;  %v1196_v15 = vsub.s32 0, %v8146_v4  ;;  %v1261_v14 = vor.u32 %v1260_v20, %v1259_v25  ;;  %v1281_v62 = vshll.u32 %v1241_v52, 8 }
 0x1a9   :  { %v9961_v55 = vand.u32 2147483647, %v7550_v32  ;;  %v1109_v43 = vcvt.s32.f32 %v1102_v57  ;;  %vm1268_vm8 = vcmp.lt.s32.totalorder %v1246_v39, 4  ;;  %v5755_v21 = vadd.s32 4294967169, %v1340_v1 }
 0x1aa   :  { %v1264_v48 = vor.u32 %v1263_v59, %v1262_v36  ;;  %v8154_v12 = vpop.eup %7072  ;;  %v5748_v49 = vmin.u32 %v1196_v15, %v8146_v4  ;;  %v1249_v53 = vshrl.u32 %v9933_v7, %v1248_v13  ;;  %vm1265_vm9 = vcmp.lt.s32.totalorder %v1246_v39, 1 }
 0x1ab   :  { %v1343_v3 = vand.u32 8388607, %v9961_v55  ;;  %v1270_v47 = vsel %vm1268_vm8, %v1258_v37, 2102212464  ;;  %v8159_v17 = vpop.eup %7074  ;;  %v1110_v38 = vmul.f32 %v1109_v43, %v1107_v41  ;;  %vm1267_vm11 = vcmp.lt.s32.totalorder %v1246_v39, 3 }
 0x1ac   :  { %v1273_v52 = vsel %vm1265_vm9, %v1252_v6, %v1255_v5  ;;  %v1274_v34 = vsel %vm1268_vm8, %v1261_v14, 920167782  ;;  %v1198_v57 = vclz %v5748_v49  ;;  %vm1266_vm12 = vcmp.lt.s32.totalorder %v1246_v39, 2 }
 0x1ad   :  { %v1269_v46 = vsel %vm1265_vm9, %v1249_v53, %v1252_v6  ;;  %v1275_v1 = vsel %vm1267_vm11, %v1258_v37, %v1274_v34  ;;  %vm1132_vm10 = vcmp.lt.s32.totalorder %v7461_v44, 0  ;;  %v1271_v2 = vsel %vm1267_vm11, %v1255_v5, %v1270_v47 }
 0x1ae   :  { %v1276_v15 = vsel %vm1266_vm12, %v1273_v52, %v1275_v1  ;;  %v1277_v13 = vsel %vm1265_vm9, %v1255_v5, %v1258_v37  ;;  %v1278_v20 = vsel %vm1268_vm8, %v1264_v48, 1326507024  ;;  %v5749_v25 = vadd.s32 4294967294, %v1198_v57 }
 0x1af   :  { %v1279_v59 = vsel %vm1267_vm11, %v1261_v14, %v1278_v20  ;;  %v8165_v36 = vmul.u32.u64.low %v1281_v62, %v1276_v15  ;;  %v8166_v43 = vmul.u32.u64.high %v1281_v62, %v1276_v15, %v8165_v36  ;;  %v1111_v41 = vxor.u32 2147483648, %v1110_v38 }
 0x1b0   :  { %v8172_v49 = vsel %vm8142_vm7, 0, %v8115_v54  ;;  %v1280_v6 = vsel %vm1266_vm12, %v1277_v13, %v1279_v59  ;;  %v1346_v55 = vadd.s32 1, %v5755_v21  ;;  %7076 = vcosq.f32 %v8126_v28 }
 0x1b1   :  { %9962 = vst [vmem:[#allocation27_spill] sm:$0xff] %v8172_v49  ;;  %vm5750_vm13 = vcmp.lt.s32.totalorder %v5749_v25, 0  ;;  %v8176_v5 = vmul.u32.u64.low %v1281_v62, %v1280_v6  ;;  %v8177_v37 = vmul.u32.u64.high %v1281_v62, %v1280_v6, %v8176_v5  ;;  %v1272_v48 = vsel %vm1266_vm12, %v1269_v46, %v1271_v2 }
 0x1b2   :  { %v1201_v14 = vsel %vm5750_vm13, 0, %v5749_v25  ;;  %v1344_v53 = vor.u32 8388608, %v1343_v3  ;;  %vm1347_vm14 = vcmp.gt.s32.totalorder %v1346_v55, 0  ;;  %7078 = vsinq.f32 %v8126_v28 }
 0x1b3   :  { %v1206_v47 = vsub.s32 4294967266, %v1201_v14  ;;  %v1216_v54 = vsub.s32 4, %v8128_v50  ;;  %v1291_v52 = vadd.s32 1, %v8166_v43  ;;  %v1112_v21 = vsel %vm1029_vm3, %v1111_v41, %v1110_v38 }
 0x1b4   :  { %v1202_v34 = vsub.s32 32, %v1201_v14  ;;  %v1348_v57 = vsel %vm1347_vm14, %v1346_v55, 0  ;;  %v1442_v1 = vand.u32 2139095040, %v7617_v35  ;;  %v9963_v15 = vand.u32 2147483647, %v7461_v44 }
 0x1b5   :  { %v1186_v3 = vadd.s32 %v8053_v27, %v8065_v8  ;;  %v1207_v28 = vadd.s32 127, %v1206_v47  ;;  %v1288_v46 = vmul.u32 %v1281_v62, %v1272_v48  ;;  %vm1290_vm0 = vc.u32 %v8177_v37, %v8165_v36 }
 0x1b6   :  { %vm8188_vm15 = vcmp.le.f32.partialorder %v9963_v15, 0.7853982  ;;  %v1292_v38 = vsel %vm1290_vm0, %v1291_v52, %v8166_v43  ;;  %v1350_v2 = vand.u32 31, %v1348_v57  ;;  %v8197_v13 = vshll.u32 %v1344_v53, 8 }
 0x1b7   :  { %v1115_v25 = vsel %vm8142_vm7, %v7448_v22, %v1112_v21  ;;  %v1208_v59 = vshll.u32 %v1207_v28, 23  ;;  %v1217_v27 = vsel %vm1132_vm10, %v1216_v54, %v8128_v50  ;;  %v1293_v8 = vadd.s32 %v1292_v38, %v1288_v46 }
 0x1b8   :  { %v1203_v62 = vshll.u32 %v8146_v4, %v1201_v14  ;;  %v1204_v41 = vshrl.u32 %v1186_v3, %v1202_v34  ;;  %v1351_v6 = vsub.s32 32, %v1350_v2  ;;  %v1443_v43 = vshrl.u32 %v1442_v1, 23 }
 0x1b9   :  { %v1294_v55 = vadd.s32 536870912, %v1293_v8  ;;  %v1349_v5 = vshrl.u32 %v1348_v57, 5  ;;  %v1353_v48 = vshll.u32 %v9933_v7, %v1350_v2  ;;  %v1356_v53 = vshll.u32 %v9938_v58, %v1350_v2 }
 0x1ba   :  { %v1209_v47 = vor.u32 4788187, %v1208_v59  ;;  %v1354_v51 = vshrl.u32 %v9938_v58, %v1351_v6  ;;  %v1357_v52 = vshrl.u32 %v9944_v33, %v1351_v6  ;;  %v1360_v21 = vshrl.u32 %v9946_v30, %v1351_v6  ;;  %v8212_v50 = vpop.eup %7076 }
 0x1bb   :  { %v8214_v54 = vshrl.u32 %v1294_v55, 30  ;;  %v1359_v4 = vshll.u32 %v9944_v33, %v1350_v2  ;;  %v1362_v14 = vshll.u32 %v9946_v30, %v1350_v2  ;;  %v1363_v34 = vshrl.u32 %v9951_v23, %v1351_v6 }
 0x1bc   :  { %v1205_v57 = vor.u32 %v1204_v41, %v1203_v62  ;;  %v1355_v1 = vor.u32 %v1354_v51, %v1353_v48  ;;  %v1358_v15 = vor.u32 %v1357_v52, %v1356_v53  ;;  %v1366_v3 = vshrl.u32 %v9952_v26, %v1351_v6  ;;  %v8220_v28 = vpop.eup %7078 }
 0x1bd   :  { %v1296_v46 = vshll.u32 %v8214_v54, 30  ;;  %v1361_v38 = vor.u32 %v1360_v21, %v1359_v4  ;;  %v1364_v59 = vor.u32 %v1363_v34, %v1362_v14  ;;  %v1365_v55 = vshll.u32 %v9951_v23, %v1350_v2 }
 0x1be   :  { %7080 = vcosq.f32 %v1115_v25  ;;  %v1210_v20 = vand.u32 2147483647, %v1209_v47  ;;  %v8226_v22 = vsel %vm8188_vm15, 0, %v1217_v27  ;;  %v9967_v62 = vand.u32 2147483647, %v7617_v35 }
 0x1bf   :  { %9966 = vst [vmem:[#allocation28_spill] sm:$0xff] %v8226_v22  ;;  %v8230_v48 = vsub.s32 %v1293_v8, %v1296_v46  ;;  %v1367_v53 = vor.u32 %v1366_v3, %v1365_v55  ;;  %vm1368_vm1 = vcmp.lt.s32.totalorder %v1349_v5, 1  ;;  %v5759_v51 = vadd.s32 4294967169, %v1443_v43 }
 0x1c0   :  { %v1446_v41 = vand.u32 8388607, %v9967_v62  ;;  %v1212_v52 = vcvt.s32.f32 %v1205_v57  ;;  %v1352_v21 = vshrl.u32 %v9933_v7, %v1351_v6  ;;  %vm1371_vm3 = vcmp.lt.s32.totalorder %v1349_v5, 4 }
 0x1c1   :  { %v1376_v2 = vsel %vm1368_vm1, %v1355_v1, %v1358_v15  ;;  %vm1235_vm4 = vcmp.lt.s32.totalorder %v7501_v31, 0  ;;  %v1299_v47 = vsub.s32 0, %v8230_v48  ;;  %vm1370_vm5 = vcmp.lt.s32.totalorder %v1349_v5, 3 }
 0x1c2   :  { %v1373_v27 = vsel %vm1371_vm3, %v1361_v38, 2102212464  ;;  %v1377_v4 = vsel %vm1371_vm3, %v1364_v59, 920167782  ;;  %v1213_v14 = vmul.f32 %v1212_v52, %v1210_v20  ;;  %vm1369_vm6 = vcmp.lt.s32.totalorder %v1349_v5, 2 }
 0x1c3   :  { %v1378_v8 = vsel %vm1370_vm5, %v1361_v38, %v1377_v4  ;;  %v1380_v34 = vsel %vm1368_vm1, %v1358_v15, %v1361_v38  ;;  %v5752_v43 = vmin.u32 %v1299_v47, %v8230_v48  ;;  %v1372_v57 = vsel %vm1368_vm1, %v1352_v21, %v1355_v1 }
 0x1c4   :  { %v1379_v6 = vsel %vm1369_vm6, %v1376_v2, %v1378_v8  ;;  %v1381_v3 = vsel %vm1371_vm3, %v1367_v53, 1326507024  ;;  %v1374_v46 = vsel %vm1370_vm5, %v1358_v15, %v1373_v27  ;;  %v1447_v52 = vor.u32 8388608, %v1446_v41 }
 0x1c5   :  { %v1382_v55 = vsel %vm1370_vm5, %v1364_v59, %v1381_v3  ;;  %v8241_v62 = vmul.u32.u64.low %v8197_v13, %v1379_v6  ;;  %v8242_v22 = vmul.u32.u64.high %v8197_v13, %v1379_v6, %v8241_v62  ;;  %v1301_v49 = vclz %v5752_v43 }
 0x1c6   :  { %v1383_v20 = vsel %vm1369_vm6, %v1380_v34, %v1382_v55  ;;  %v1449_v4 = vadd.s32 1, %v5759_v51  ;;  %7082 = vsinq.f32 %v1115_v25  ;;  %v1319_v38 = vsub.s32 4, %v8214_v54 }
 0x1c7   :  { %v8248_v1 = vmul.u32.u64.low %v8197_v13, %v1383_v20  ;;  %v8249_v21 = vmul.u32.u64.high %v8197_v13, %v1383_v20, %v8248_v1  ;;  %v1214_v53 = vxor.u32 2147483648, %v1213_v14  ;;  %v5753_v15 = vadd.s32 4294967294, %v1301_v49 }
 0x1c8   :  { %v1375_v59 = vsel %vm1369_vm6, %v1372_v57, %v1374_v46  ;;  %vm1450_vm7 = vcmp.gt.s32.totalorder %v1449_v4, 0  ;;  %v8252_v2 = vpop.eup %7080  ;;  %v1394_v47 = vadd.s32 1, %v8242_v22  ;;  %v1545_v25 = vand.u32 2139095040, %v7711_v61 }
 0x1c9   :  { %9968 = vst [vmem:[#allocation29_spill] sm:$0xff] %v8252_v2  ;;  %v1451_v27 = vsel %vm1450_vm7, %v1449_v4, 0  ;;  %v1289_v51 = vadd.s32 %v8165_v36, %v8177_v37  ;;  %vm5754_vm8 = vcmp.lt.s32.totalorder %v5753_v15, 0  ;;  %v8259_v34 = vshll.u32 %v1447_v52, 8 }
 0x1ca   :  { %v1453_v8 = vand.u32 31, %v1451_v27  ;;  %v1304_v49 = vsel %vm5754_vm8, 0, %v5753_v15  ;;  %v8264_v5 = vsel %vm1235_vm4, %v1319_v38, %v8214_v54  ;;  %v1391_v43 = vmul.u32 %v8197_v13, %v1375_v59 }
 0x1cb   :  { %vm1393_vm9 = vc.u32 %v8249_v21, %v8241_v62  ;;  %v1215_v57 = vsel %vm1132_vm10, %v1214_v53, %v1213_v14  ;;  %v1305_v6 = vsub.s32 32, %v1304_v49  ;;  %v1309_v36 = vsub.s32 4294967266, %v1304_v49 }
 0x1cc   :  { %v1395_v37 = vsel %vm1393_vm9, %v1394_v47, %v8242_v22  ;;  %v1306_v3 = vshll.u32 %v8230_v48, %v1304_v49  ;;  %v1454_v55 = vsub.s32 32, %v1453_v8  ;;  %v1546_v20 = vshrl.u32 %v1545_v25, 23 }
 0x1cd   :  { %v1396_v46 = vadd.s32 %v1395_v37, %v1391_v43  ;;  %v1307_v52 = vshrl.u32 %v1289_v51, %v1305_v6  ;;  %v1310_v54 = vadd.s32 127, %v1309_v36  ;;  %v1456_v4 = vshll.u32 %v9933_v7, %v1453_v8 }
 0x1ce   :  { %v1459_v13 = vshll.u32 %v9938_v58, %v1453_v8  ;;  %v1457_v1 = vshrl.u32 %v9938_v58, %v1454_v55  ;;  %v1460_v14 = vshrl.u32 %v9944_v33, %v1454_v55  ;;  %v1462_v53 = vshll.u32 %v9944_v33, %v1453_v8 }
 0x1cf   :  { %v1397_v38 = vadd.s32 536870912, %v1396_v46  ;;  %v1308_v15 = vor.u32 %v1307_v52, %v1306_v3  ;;  %v1311_v22 = vshll.u32 %v1310_v54, 23  ;;  %v1463_v48 = vshrl.u32 %v9946_v30, %v1454_v55 }
 0x1d0   :  { %v1466_v59 = vshrl.u32 %v9951_v23, %v1454_v55  ;;  %v8280_v47 = vpop.eup %7082  ;;  %v1218_v25 = vsel %vm8188_vm15, %v7461_v44, %v1215_v57  ;;  %v1452_v49 = vshrl.u32 %v1451_v27, 5  ;;  %v1465_v43 = vshll.u32 %v9946_v30, %v1453_v8 }
 0x1d1   :  { %9969 = vst [vmem:[#allocation30_spill] sm:$0xff] %v8280_v47  ;;  %v1398_v51 = vshrl.u32 %v1397_v38, 30  ;;  %v1312_v6 = vor.u32 4788187, %v1311_v22  ;;  %v1458_v36 = vor.u32 %v1457_v1, %v1456_v4  ;;  %v1461_v37 = vor.u32 %v1460_v14, %v1459_v13 }
 0x1d2   :  { %v1464_v41 = vor.u32 %v1463_v48, %v1462_v53  ;;  %v9970_v3 = vand.u32 2147483647, %v7501_v31  ;;  %v1467_v2 = vor.u32 %v1466_v59, %v1465_v43  ;;  %v1468_v47 = vshll.u32 %v9951_v23, %v1453_v8 }
 0x1d3   :  { %v1399_v54 = vshll.u32 %v1398_v51, 30  ;;  %v1469_v39 = vshrl.u32 %v9952_v26, %v1454_v55  ;;  %v1313_v57 = vand.u32 2147483647, %v1312_v6  ;;  %v1315_v27 = vcvt.s32.f32 %v1308_v15 }
 0x1d4   :  { %vm8288_vm11 = vcmp.le.f32.partialorder %v9970_v3, 0.7853982  ;;  %vm1338_vm12 = vcmp.lt.s32.totalorder %v7550_v32, 0  ;;  %v1455_v4 = vshrl.u32 %v9933_v7, %v1454_v55  ;;  %v5763_v13 = vadd.s32 4294967169, %v1546_v20 }
 0x1d5   :  { %v8296_v38 = vsub.s32 %v1396_v46, %v1399_v54  ;;  %v1470_v1 = vor.u32 %v1469_v39, %v1468_v47  ;;  %vm1471_vm10 = vcmp.lt.s32.totalorder %v1452_v49, 1  ;;  %vm1474_vm13 = vcmp.lt.s32.totalorder %v1452_v49, 4 }
 0x1d6   :  { %v1316_v14 = vmul.f32 %v1315_v27, %v1313_v57  ;;  %vm1472_vm14 = vcmp.lt.s32.totalorder %v1452_v49, 2  ;;  %v1476_v53 = vsel %vm1474_vm13, %v1464_v41, 2102212464  ;;  %v1479_v22 = vsel %vm1471_vm10, %v1458_v36, %v1461_v37 }
 0x1d7   :  { %v1402_v8 = vsub.s32 0, %v8296_v38  ;;  %vm1473_vm15 = vcmp.lt.s32.totalorder %v1452_v49, 3  ;;  %v1480_v48 = vsel %vm1474_vm13, %v1467_v2, 920167782  ;;  %v1483_v59 = vsel %vm1471_vm10, %v1461_v37, %v1464_v41 }
 0x1d8   :  { %v1475_v15 = vsel %vm1471_vm10, %v1455_v4, %v1458_v36  ;;  %v1477_v43 = vsel %vm1473_vm15, %v1461_v37, %v1476_v53  ;;  %v1481_v6 = vsel %vm1473_vm15, %v1464_v41, %v1480_v48  ;;  %v1484_v3 = vsel %vm1474_vm13, %v1470_v1, 1326507024 }
 0x1d9   :  { %v9973_v55 = vand.u32 2147483647, %v7550_v32  ;;  %v5756_v20 = vmin.u32 %v1402_v8, %v8296_v38  ;;  %v1422_v47 = vsub.s32 4, %v1398_v51  ;;  %v1482_v54 = vsel %vm1472_vm14, %v1479_v22, %v1481_v6  ;;  %v2063_v22 = vld [vmem:[%s9818_s4 + $0x30] sm:$0xff] }
 0x1da   :  { %v1485_v39 = vsel %vm1473_vm15, %v1467_v2, %v1484_v3  ;;  %v1317_v57 = vxor.u32 2147483648, %v1316_v14  ;;  %v8309_v36 = vmul.u32.u64.low %v8259_v34, %v1482_v54  ;;  %v8310_v37 = vmul.u32.u64.high %v8259_v34, %v1482_v54, %v8309_v36  ;;  %v2064_v2 = vld [vmem:[%s9818_s4 + $0x38] sm:$0xff] }
 0x1db   :  { %vm8301_vm0 = vcmp.le.f32.partialorder %v9973_v55, 0.7853982  ;;  %v1486_v27 = vsel %vm1472_vm14, %v1483_v59, %v1485_v39  ;;  %v1404_v41 = vclz %v5756_v20  ;;  %v1478_v4 = vsel %vm1472_vm14, %v1475_v15, %v1477_v43 }
 0x1dc   :  { %v8315_v1 = vmul.u32.u64.low %v8259_v34, %v1486_v27  ;;  %v8316_v53 = vmul.u32.u64.high %v8259_v34, %v1486_v27, %v8315_v1  ;;  %7084 = vcosq.f32 %v1218_v25  ;;  %v8327_v8 = vsel %vm8288_vm11, 0, %v8264_v5 }
 0x1dd   :  { %9976 = vst [vmem:[#allocation31_spill] sm:$0xff] %v8327_v8  ;;  %v9977_v49 = vand.u32 2147483647, %v7711_v61  ;;  %v1552_v59 = vadd.s32 1, %v5763_v13  ;;  %7086 = vsinq.f32 %v1218_v25  ;;  %v5757_v15 = vadd.s32 4294967294, %v1404_v41 }
 0x1de   :  { %v1423_v43 = vsel %vm1338_vm12, %v1422_v47, %v1398_v51  ;;  %v1494_v3 = vmul.u32 %v8259_v34, %v1478_v4  ;;  %v1497_v55 = vadd.s32 1, %v8310_v37  ;;  %v8336_v20 = vpack.c.bf16 %v2064_v2, %v2063_v22 }
 0x1df   :  { %v1549_v48 = vand.u32 8388607, %v9977_v49  ;;  %vm1553_vm1 = vcmp.gt.s32.totalorder %v1552_v59, 0  ;;  %v1318_v5 = vsel %vm1235_vm4, %v1317_v57, %v1316_v14  ;;  %vm5758_vm3 = vcmp.lt.s32.totalorder %v5757_v15, 0 }
 0x1e0   :  { %vm1496_vm5 = vc.u32 %v8316_v53, %v8309_v36  ;;  %v1554_v25 = vsel %vm1553_vm1, %v1552_v59, 0  ;;  %v1407_v13 = vsel %vm5758_vm3, 0, %v5757_v15  ;;  %6829 = vmatpush3.bf16.msra.mxu0 %v8336_v20  ;;  %v1392_v34 = vadd.s32 %v8241_v62, %v8249_v21 }
 0x1e1   :  { %v1498_v51 = vsel %vm1496_vm5, %v1497_v55, %v8310_v37  ;;  %v1550_v47 = vor.u32 8388608, %v1549_v48  ;;  %v1556_v54 = vand.u32 31, %v1554_v25  ;;  %v1408_v39 = vsub.s32 32, %v1407_v13  ;;  %6830 = vmatprep.subr.bf16.mxu0 %v9937_v16 }
 0x1e2   :  { %v1412_v27 = vsub.s32 4294967266, %v1407_v13  ;;  %v1499_v41 = vadd.s32 %v1498_v51, %v1494_v3  ;;  %v8350_v14 = vsel %vm8288_vm11, %v7501_v31, %v1318_v5  ;;  %v1409_v57 = vshll.u32 %v8296_v38, %v1407_v13 }
 0x1e3   :  { %v8355_v37 = vsel %vm8301_vm0, 0, %v1423_v43  ;;  %v1557_v4 = vsub.s32 32, %v1556_v54  ;;  %v1410_v1 = vshrl.u32 %v1392_v34, %v1408_v39  ;;  %v1559_v21 = vshll.u32 %v9933_v7, %v1556_v54 }
 0x1e4   :  { %9978 = vst [vmem:[#allocation32_spill] sm:$0xff] %v8355_v37  ;;  %v1413_v22 = vadd.s32 127, %v1412_v27  ;;  %v1500_v62 = vadd.s32 536870912, %v1499_v41  ;;  %v1562_v49 = vshll.u32 %v9938_v58, %v1556_v54  ;;  %v1555_v55 = vshrl.u32 %v1554_v25, 5 }
 0x1e5   :  { %v1560_v2 = vshrl.u32 %v9938_v58, %v1557_v4  ;;  %v1563_v52 = vshrl.u32 %v9944_v33, %v1557_v4  ;;  %v1566_v48 = vshrl.u32 %v9946_v30, %v1557_v4  ;;  %v1411_v59 = vor.u32 %v1410_v1, %v1409_v57 }
 0x1e6   :  { %v1414_v38 = vshll.u32 %v1413_v22, 23  ;;  %v1501_v15 = vshrl.u32 %v1500_v62, 30  ;;  %v1569_v43 = vshrl.u32 %v9951_v23, %v1557_v4  ;;  %v8363_v3 = vpop.eup %7084  ;;  %v1565_v5 = vshll.u32 %v9944_v33, %v1556_v54 }
 0x1e7   :  { %9979 = vst [vmem:[#allocation33_spill] sm:$0xff] %v8363_v3  ;;  %v1568_v13 = vshll.u32 %v9946_v30, %v1556_v54  ;;  %v8367_v51 = vshll.u32 %v1550_v47, 8  ;;  %v8369_v34 = vpop.eup %7086  ;;  %v1561_v6 = vor.u32 %v1560_v2, %v1559_v21  ;;  %v1564_v37 = vor.u32 %v1563_v52, %v1562_v49 }
 0x1e8   :  { %v1415_v39 = vor.u32 4788187, %v1414_v38  ;;  %v1502_v27 = vshll.u32 %v1501_v15, 30  ;;  %v1567_v57 = vor.u32 %v1566_v48, %v1565_v5  ;;  %v1571_v22 = vshll.u32 %v9951_v23, %v1556_v54 }
 0x1e9   :  { %v1570_v1 = vor.u32 %v1569_v43, %v1568_v13  ;;  %v1572_v62 = vshrl.u32 %v9952_v26, %v1557_v4  ;;  %v1418_v25 = vcvt.s32.f32 %v1411_v59  ;;  %v1648_v44 = vand.u32 2139095040, %v7811_v56 }
 0x1ea   :  { %v1416_v31 = vand.u32 2147483647, %v1415_v39  ;;  %v8373_v8 = vsub.s32 %v1499_v41, %v1502_v27  ;;  %vm1441_vm4 = vcmp.lt.s32.totalorder %v7617_v35, 0  ;;  %v1558_v47 = vshrl.u32 %v9933_v7, %v1557_v4 }
 0x1eb   :  { %v1573_v38 = vor.u32 %v1572_v62, %v1571_v22  ;;  %vm1574_vm6 = vcmp.lt.s32.totalorder %v1555_v55, 1  ;;  %v9980_v21 = vand.u32 2147483647, %v7811_v56  ;;  %vm1577_vm7 = vcmp.lt.s32.totalorder %v1555_v55, 4 }
 0x1ec   :  { %v1419_v49 = vmul.f32 %v1418_v25, %v1416_v31  ;;  %v1505_v54 = vsub.s32 0, %v8373_v8  ;;  %v1582_v52 = vsel %vm1574_vm6, %v1561_v6, %v1564_v37  ;;  %vm1576_vm8 = vcmp.lt.s32.totalorder %v1555_v55, 3 }
 0x1ed   :  { %v8380_v2 = vand.u32 8388607, %v9980_v21  ;;  %v1583_v41 = vsel %vm1577_vm7, %v1570_v1, 920167782  ;;  %v1586_v48 = vsel %vm1574_vm6, %v1564_v37, %v1567_v57  ;;  %v1587_v59 = vsel %vm1577_vm7, %v1573_v38, 1326507024 }
 0x1ee   :  { %v5760_v43 = vmin.u32 %v1505_v54, %v8373_v8  ;;  %vm1575_vm9 = vcmp.lt.s32.totalorder %v1555_v55, 2  ;;  %v1579_v4 = vsel %vm1577_vm7, %v1567_v57, 2102212464  ;;  %v1584_v5 = vsel %vm1576_vm8, %v1567_v57, %v1583_v41 }
 0x1ef   :  { %v1525_v13 = vsub.s32 4, %v1501_v15  ;;  %v1585_v39 = vsel %vm1575_vm9, %v1582_v52, %v1584_v5  ;;  %v1588_v31 = vsel %vm1576_vm8, %v1570_v1, %v1587_v59  ;;  %v1649_v27 = vshrl.u32 %v1648_v44, 23 }
 0x1f0   :  { %v1420_v22 = vxor.u32 2147483648, %v1419_v49  ;;  %v9981_v62 = vand.u32 2147483647, %v7617_v35  ;;  %v1507_v38 = vclz %v5760_v43  ;;  %v1578_v21 = vsel %vm1574_vm6, %v1558_v47, %v1561_v6 }
 0x1f1   :  { %v1589_v54 = vsel %vm1575_vm9, %v1586_v48, %v1588_v31  ;;  %v1580_v57 = vsel %vm1576_vm8, %v1564_v37, %v1579_v4  ;;  %v5767_v1 = vadd.s32 4294967169, %v1649_v27  ;;  %7088 = vcosq.f32 %v8350_v14 }
 0x1f2   :  { %vm8391_vm11 = vcmp.le.f32.partialorder %v9981_v62, 0.7853982  ;;  %v8399_v41 = vmul.u32.u64.low %v8367_v51, %v1589_v54  ;;  %v8400_v52 = vmul.u32.u64.high %v8367_v51, %v1589_v54, %v8399_v41  ;;  %v5761_v44 = vadd.s32 4294967294, %v1507_v38 }
 0x1f3   :  { %v8404_v59 = vmul.u32.u64.low %v8367_v51, %v1585_v39  ;;  %v8405_v5 = vmul.u32.u64.high %v8367_v51, %v1585_v39, %v8404_v59  ;;  %7090 = vsinq.f32 %v8350_v14  ;;  %v1495_v6 = vadd.s32 %v8309_v36, %v8316_v53  ;;  %v3837_v39 = vld [vmem:[%s9819_s5] sm:$0xff]  ;;  %v3838_v36 = vld [vmem:[%s9819_s5 + $0x8] sm:$0xff] }
 0x1f4   :  { %v1655_v47 = vadd.s32 1, %v5767_v1  ;;  %v9887_v37 = vand.u32 2147483647, %v7932_v19  ;;  %v1421_v48 = vsel %vm1338_vm12, %v1420_v22, %v1419_v49  ;;  %vm5762_vm10 = vcmp.lt.s32.totalorder %v5761_v44, 0 }
 0x1f5   :  { %v1526_v43 = vsel %vm1441_vm4, %v1525_v13, %v1501_v15  ;;  %v1581_v4 = vsel %vm1575_vm9, %v1578_v21, %v1580_v57  ;;  %v1510_v53 = vsel %vm5762_vm10, 0, %v5761_v44  ;;  %vm1599_vm13 = vc.u32 %v8400_v52, %v8404_v59 }
 0x1f6   :  { %v1653_v14 = vor.u32 8388608, %v8380_v2  ;;  %vm1656_vm12 = vcmp.gt.s32.totalorder %v1655_v47, 0  ;;  %v1511_v49 = vsub.s32 32, %v1510_v53  ;;  %v1515_v31 = vsub.s32 4294967266, %v1510_v53 }
 0x1f7   :  { %v1600_v15 = vadd.s32 1, %v8405_v5  ;;  %v1751_v55 = vand.u32 2139095040, %v7932_v19  ;;  %v1597_v13 = vmul.u32 %v8367_v51, %v1581_v4  ;;  %v1657_v27 = vsel %vm1656_vm12, %v1655_v47, 0 }
 0x1f8   :  { %v8431_v22 = vand.u32 8388607, %v9887_v37  ;;  %v6801_v62 = vpack.c.bf16 %v3838_v36, %v3837_v39  ;;  %v1512_v38 = vshll.u32 %v8373_v8, %v1510_v53  ;;  %v1513_v21 = vshrl.u32 %v1495_v6, %v1511_v49 }
 0x1f9   :  { %v1516_v54 = vadd.s32 127, %v1515_v31  ;;  %v1601_v2 = vsel %vm1599_vm13, %v1600_v15, %v8405_v5  ;;  %v8438_v57 = vsel %vm8301_vm0, %v7550_v32, %v1421_v48  ;;  %v8442_v51 = vsel %vm8391_vm11, 0, %v1526_v43 }
 0x1fa   :  { %9984 = vst [vmem:[#allocation34_spill] sm:$0xff] %v8442_v51  ;;  %v1602_v41 = vadd.s32 %v1601_v2, %v1597_v13  ;;  %v1659_v1 = vand.u32 31, %v1657_v27  ;;  %6802 = vmatpush3.bf16.msra.mxu1 %v6801_v62  ;;  %v1514_v44 = vor.u32 %v1513_v21, %v1512_v38  ;;  %v8444_v4 = vshll.u32 %v1653_v14, 8 }
 0x1fb   :  { %v1517_v47 = vshll.u32 %v1516_v54, 23  ;;  %v1752_v8 = vshrl.u32 %v1751_v55, 23  ;;  %6803 = vmatprep.subr.bf16.mxu1 %v9937_v16  ;;  %v8447_v6 = vshrl.u32 %v1657_v27, 5  ;;  %v8450_v39 = vpop.eup %7088  ;;  %vm1544_vm14 = vcmp.lt.s32.totalorder %v7711_v61, 0 }
 0x1fc   :  { %v1603_v5 = vadd.s32 536870912, %v1602_v41  ;;  %v1660_v46 = vsub.s32 32, %v1659_v1  ;;  %9985 = vst [vmem:[#allocation35_spill] sm:$0xff] %v8450_v39  ;;  %v1521_v36 = vcvt.s32.f32 %v1514_v44  ;;  %v1662_v53 = vshll.u32 %v9933_v7, %v1659_v1 }
 0x1fd   :  { %v1518_v43 = vor.u32 4788187, %v1517_v47  ;;  %v1665_v49 = vshll.u32 %v9938_v58, %v1659_v1  ;;  %v8454_v31 = vpop.eup %7090  ;;  %v1668_v13 = vshll.u32 %v9944_v33, %v1659_v1  ;;  %v1671_v38 = vshll.u32 %v9946_v30, %v1659_v1 }
 0x1fe   :  { %9986 = vst [vmem:[#allocation36_spill] sm:$0xff] %v8454_v31  ;;  %v1604_v14 = vshrl.u32 %v1603_v5, 30  ;;  %v1663_v15 = vshrl.u32 %v9938_v58, %v1660_v46  ;;  %v1666_v55 = vshrl.u32 %v9944_v33, %v1660_v46  ;;  %v1669_v62 = vshrl.u32 %v9946_v30, %v1660_v46 }
 0x1ff   :  { %v1519_v27 = vand.u32 2147483647, %v1518_v43  ;;  %v1672_v21 = vshrl.u32 %v9951_v23, %v1660_v46  ;;  %v1674_v47 = vshll.u32 %v9951_v23, %v1659_v1  ;;  %v1675_v51 = vshrl.u32 %v9952_v26, %v1660_v46 }
 0x200   :  { %v1605_v54 = vshll.u32 %v1604_v14, 30  ;;  %v1664_v2 = vor.u32 %v1663_v15, %v1662_v53  ;;  %v1667_v44 = vor.u32 %v1666_v55, %v1665_v49  ;;  %v1670_v37 = vor.u32 %v1669_v62, %v1668_v13 }
 0x201   :  { %v1522_v5 = vmul.f32 %v1521_v36, %v1519_v27  ;;  %v1673_v48 = vor.u32 %v1672_v21, %v1671_v38  ;;  %v9987_v43 = vand.u32 2147483647, %v7711_v61  ;;  %v1628_v31 = vsub.s32 4, %v1604_v14 }
 0x202   :  { %v8471_v39 = vsub.s32 %v1602_v41, %v1605_v54  ;;  %v1661_v3 = vshrl.u32 %v9933_v7, %v1660_v46  ;;  %vm1677_vm0 = vcmp.lt.s32.totalorder %v8447_v6, 1  ;;  %v1676_v1 = vor.u32 %v1675_v51, %v1674_v47 }
 0x203   :  { %vm8467_vm15 = vcmp.le.f32.partialorder %v9987_v43, 0.7853982  ;;  %v1523_v53 = vxor.u32 2147483648, %v1522_v5  ;;  %vm1679_vm1 = vcmp.lt.s32.totalorder %v8447_v6, 3  ;;  %vm1680_vm3 = vcmp.lt.s32.totalorder %v8447_v6, 4 }
 0x204   :  { %v1608_v36 = vsub.s32 0, %v8471_v39  ;;  %v1682_v49 = vsel %vm1680_vm3, %v1670_v37, 2102212464  ;;  %v1685_v15 = vsel %vm1677_vm0, %v1664_v2, %v1667_v44  ;;  %v1686_v55 = vsel %vm1680_vm3, %v1673_v48, 920167782 }
 0x205   :  { %vm1678_vm5 = vcmp.lt.s32.totalorder %v8447_v6, 2  ;;  %v1681_v41 = vsel %vm1677_vm0, %v1661_v3, %v1664_v2  ;;  %v1687_v46 = vsel %vm1679_vm1, %v1670_v37, %v1686_v55  ;;  %v5771_v51 = vadd.s32 4294967169, %v1752_v8 }
 0x206   :  { %v1524_v13 = vsel %vm1441_vm4, %v1523_v53, %v1522_v5  ;;  %v5764_v27 = vmin.u32 %v1608_v36, %v8471_v39  ;;  %v1688_v62 = vsel %vm1678_vm5, %v1685_v15, %v1687_v46  ;;  %v1689_v38 = vsel %vm1677_vm0, %v1667_v44, %v1670_v37  ;;  %v3839_v53 = vld [vmem:[%s9819_s5 + $0x10] sm:$0xff] }
 0x207   :  { %v1683_v21 = vsel %vm1679_vm1, %v1667_v44, %v1682_v49  ;;  %v1690_v54 = vsel %vm1680_vm3, %v1676_v1, 1326507024  ;;  %v8495_v3 = vmul.u32.u64.low %v8444_v4, %v1688_v62  ;;  %v8496_v2 = vmul.u32.u64.high %v8444_v4, %v1688_v62, %v8495_v3 }
 0x208   :  { %7092 = vcosq.f32 %v8438_v57  ;;  %v1610_v8 = vclz %v5764_v27  ;;  %v1629_v47 = vsel %vm1544_vm14, %v1628_v31, %v1604_v14  ;;  %v1691_v5 = vsel %vm1679_vm1, %v1673_v48, %v1690_v54  ;;  %v3840_v31 = vld [vmem:[%s9819_s5 + $0x18] sm:$0xff] }
 0x209   :  { %7094 = vsinq.f32 %v8438_v57  ;;  %v8508_v37 = vsel %vm8391_vm11, %v7617_v35, %v1524_v13  ;;  %v1692_v44 = vsel %vm1678_vm5, %v1689_v38, %v1691_v5  ;;  %v1758_v43 = vadd.s32 1, %v5771_v51 }
 0x20a   :  { %v5765_v48 = vadd.s32 4294967294, %v1610_v8  ;;  %v1684_v57 = vsel %vm1678_vm5, %v1681_v41, %v1683_v21  ;;  %v8521_v25 = vmul.u32.u64.low %v8444_v4, %v1692_v44  ;;  %v8522_v14 = vmul.u32.u64.high %v8444_v4, %v1692_v44, %v8521_v25 }
 0x20b   :  { %v1598_v1 = vadd.s32 %v8404_v59, %v8400_v52  ;;  %v8528_v36 = vsel %vm8467_vm15, 0, %v1629_v47  ;;  %vm1759_vm4 = vcmp.gt.s32.totalorder %v1758_v43, 0  ;;  %v9991_v49 = vor.u32 8388608, %v8431_v22 }
 0x20c   :  { %9990 = vst [vmem:[#allocation37_spill] sm:$0xff] %v8528_v36  ;;  %vm5766_vm6 = vcmp.lt.s32.totalorder %v5765_v48, 0  ;;  %v1703_v6 = vadd.s32 1, %v8496_v2  ;;  %v1760_v55 = vsel %vm1759_vm4, %v1758_v43, 0  ;;  %v6804_v41 = vpack.c.bf16 %v3840_v31, %v3839_v53 }
 0x20d   :  { %v8532_v15 = vshll.u32 %v9991_v49, 8  ;;  %7096 = vcosq.f32 %v8508_v37  ;;  %v1613_v46 = vsel %vm5766_vm6, 0, %v5765_v48  ;;  %v1700_v51 = vmul.u32 %v8444_v4, %v1684_v57 }
 0x20e   :  { %v1762_v52 = vand.u32 31, %v1760_v55  ;;  %v1614_v59 = vsub.s32 32, %v1613_v46  ;;  %v1618_v13 = vsub.s32 4294967266, %v1613_v46  ;;  %v9897_v27 = vand.u32 2147483647, %v8017_v63  ;;  %6805 = vmatpush3.bf16.msra.mxu1 %v6804_v41 }
 0x20f   :  { %v1854_v62 = vand.u32 2139095040, %v8017_v63  ;;  %v1615_v22 = vshll.u32 %v8471_v39, %v1613_v46  ;;  %vm1702_vm7 = vc.u32 %v8522_v14, %v8495_v3  ;;  %v8542_v38 = vshrl.u32 %v1760_v55, 5  ;;  %6806 = vmatprep.subr.bf16.mxu1 %v9937_v16 }
 0x210   :  { %v1763_v21 = vsub.s32 32, %v1762_v52  ;;  %v1616_v54 = vshrl.u32 %v1598_v1, %v1614_v59  ;;  %v1619_v4 = vadd.s32 127, %v1618_v13  ;;  %v1704_v8 = vsel %vm1702_vm7, %v1703_v6, %v8496_v2 }
 0x211   :  { %v1765_v47 = vshll.u32 %v9933_v7, %v1762_v52  ;;  %v1705_v5 = vadd.s32 %v1704_v8, %v1700_v51  ;;  %v1768_v43 = vshll.u32 %v9938_v58, %v1762_v52  ;;  %v1771_v57 = vshll.u32 %v9944_v33, %v1762_v52 }
 0x212   :  { %v1766_v44 = vshrl.u32 %v9938_v58, %v1763_v21  ;;  %v1769_v39 = vshrl.u32 %v9944_v33, %v1763_v21  ;;  %v8550_v53 = vpop.eup %7092  ;;  %v1617_v31 = vor.u32 %v1616_v54, %v1615_v22  ;;  %v1620_v48 = vshll.u32 %v1619_v4, 23 }
 0x213   :  { %9992 = vst [vmem:[#allocation38_spill] sm:$0xff] %v8550_v53  ;;  %v1772_v25 = vshrl.u32 %v9946_v30, %v1763_v21  ;;  %v8554_v1 = vpop.eup %7094  ;;  %v1706_v2 = vadd.s32 536870912, %v1705_v5  ;;  %v1774_v49 = vshll.u32 %v9946_v30, %v1762_v52  ;;  %v1775_v6 = vshrl.u32 %v9951_v23, %v1763_v21 }
 0x214   :  { %9993 = vst [vmem:[#allocation39_spill] sm:$0xff] %v8554_v1  ;;  %v8560_v55 = vand.u32 8388607, %v9897_v27  ;;  %v1621_v41 = vor.u32 4788187, %v1620_v48  ;;  %v1767_v46 = vor.u32 %v1766_v44, %v1765_v47  ;;  %v1770_v51 = vor.u32 %v1769_v39, %v1768_v43 }
 0x215   :  { %v1773_v59 = vor.u32 %v1772_v25, %v1771_v57  ;;  %vm1647_vm8 = vcmp.lt.s32.totalorder %v7811_v56, 0  ;;  %v1707_v13 = vshrl.u32 %v1706_v2, 30  ;;  %v1776_v22 = vor.u32 %v1775_v6, %v1774_v49 }
 0x216   :  { %v1777_v54 = vshll.u32 %v9951_v23, %v1762_v52  ;;  %v1778_v4 = vshrl.u32 %v9952_v26, %v1763_v21  ;;  %v1622_v8 = vand.u32 2147483647, %v1621_v41  ;;  %v1624_v36 = vcvt.s32.f32 %v1617_v31 }
 0x217   :  { %v1764_v35 = vshrl.u32 %v9933_v7, %v1763_v21  ;;  %vm1780_vm9 = vcmp.lt.s32.totalorder %v8542_v38, 1  ;;  %v8567_v27 = vpop.eup %7096  ;;  %v1708_v48 = vshll.u32 %v1707_v13, 30  ;;  %vm1782_vm11 = vcmp.lt.s32.totalorder %v8542_v38, 3 }
 0x218   :  { %9994 = vst [vmem:[#allocation40_spill] sm:$0xff] %v8567_v27  ;;  %v1779_v47 = vor.u32 %v1778_v4, %v1777_v54  ;;  %vm1783_vm10 = vcmp.lt.s32.totalorder %v8542_v38, 4  ;;  %v1625_v44 = vmul.f32 %v1624_v36, %v1622_v8  ;;  %v9995_v43 = vand.u32 2147483647, %v7811_v56 }
 0x219   :  { %v1785_v21 = vsel %vm1783_vm10, %v1773_v59, 2102212464  ;;  %v1788_v39 = vsel %vm1780_vm9, %v1767_v46, %v1770_v51  ;;  %v1789_v31 = vsel %vm1783_vm10, %v1776_v22, 920167782  ;;  %v8583_v57 = vsub.s32 %v1705_v5, %v1708_v48 }
 0x21a   :  { %vm8573_vm13 = vcmp.le.f32.partialorder %v9995_v43, 0.7853982  ;;  %vm1781_vm12 = vcmp.lt.s32.totalorder %v8542_v38, 2  ;;  %v1790_v36 = vsel %vm1782_vm11, %v1773_v59, %v1789_v31  ;;  %v1855_v25 = vshrl.u32 %v1854_v62, 23 }
 0x21b   :  { %v1626_v2 = vxor.u32 2147483648, %v1625_v44  ;;  %v1731_v49 = vsub.s32 4, %v1707_v13  ;;  %v1784_v6 = vsel %vm1780_vm9, %v1764_v35, %v1767_v46  ;;  %v1791_v41 = vsel %vm1781_vm12, %v1788_v39, %v1790_v36 }
 0x21c   :  { %v1711_v54 = vsub.s32 0, %v8583_v57  ;;  %v1786_v5 = vsel %vm1782_vm11, %v1770_v51, %v1785_v21  ;;  %v1792_v4 = vsel %vm1780_vm9, %v1770_v51, %v1773_v59  ;;  %v1793_v8 = vsel %vm1783_vm10, %v1779_v47, 1326507024  ;;  %v2065_v47 = vld [vmem:[%s9818_s4 + $0x40] sm:$0xff] }
 0x21d   :  { %v1627_v62 = vsel %vm1544_vm14, %v1626_v2, %v1625_v44  ;;  %v1794_v35 = vsel %vm1782_vm11, %v1776_v22, %v1793_v8  ;;  %v8604_v46 = vmul.u32.u64.low %v8532_v15, %v1791_v41  ;;  %v8605_v48 = vmul.u32.u64.high %v8532_v15, %v1791_v41, %v8604_v46  ;;  %v2066_v22 = vld [vmem:[%s9818_s4 + $0x48] sm:$0xff] }
 0x21e   :  { %7098 = vsinq.f32 %v8508_v37  ;;  %v5768_v43 = vmin.u32 %v1711_v54, %v8583_v57  ;;  %v1795_v51 = vsel %vm1781_vm12, %v1792_v4, %v1794_v35  ;;  %v5775_v59 = vadd.s32 4294967169, %v1855_v25 }
 0x21f   :  { %v1732_v44 = vsel %vm1647_vm8, %v1731_v49, %v1707_v13  ;;  %v8621_v21 = vmul.u32.u64.low %v8532_v15, %v1795_v51  ;;  %v8622_v37 = vmul.u32.u64.high %v8532_v15, %v1795_v51, %v8621_v21  ;;  %v1859_v39 = vor.u32 8388608, %v8560_v55 }
 0x220   :  { %v1630_v31 = vsel %vm8467_vm15, %v7711_v61, %v1627_v62  ;;  %v1713_v36 = vclz %v5768_v43  ;;  %v1787_v25 = vsel %vm1781_vm12, %v1784_v6, %v1786_v5  ;;  %v1861_v2 = vadd.s32 1, %v5775_v59 }
 0x221   :  { %v1701_v41 = vadd.s32 %v8495_v3, %v8522_v14  ;;  %v1806_v13 = vadd.s32 1, %v8605_v48  ;;  %v9898_v49 = vand.u32 2147483647, %v8119_v24  ;;  %v8634_v54 = vpack.c.bf16 %v2066_v22, %v2065_v47 }
 0x222   :  { %v5769_v4 = vadd.s32 4294967294, %v1713_v36  ;;  %v8638_v55 = vsel %vm8573_vm13, 0, %v1732_v44  ;;  %vm1862_vm14 = vcmp.gt.s32.totalorder %v1861_v2, 0  ;;  %v1957_v32 = vand.u32 2139095040, %v8119_v24 }
 0x223   :  { %9998 = vst [vmem:[#allocation41_spill] sm:$0xff] %v8638_v55  ;;  %7100 = vcosq.f32 %v1630_v31  ;;  %v1803_v38 = vmul.u32 %v8532_v15, %v1787_v25  ;;  %vm1805_vm15 = vc.u32 %v8622_v37, %v8604_v46  ;;  %v1863_v3 = vsel %vm1862_vm14, %v1861_v2, 0  ;;  %6832 = vmatpush3.bf16.msra.mxu0 %v8634_v54 }
 0x224   :  { %vm5770_vm0 = vcmp.lt.s32.totalorder %v5769_v4, 0  ;;  %v1807_v14 = vsel %vm1805_vm15, %v1806_v13, %v8605_v48  ;;  %v1865_v6 = vand.u32 31, %v1863_v3  ;;  %v8646_v5 = vshll.u32 %v1859_v39, 8  ;;  %6833 = vmatprep.subr.bf16.mxu0 %v9937_v16 }
 0x225   :  { %7102 = vsinq.f32 %v1630_v31  ;;  %v1716_v8 = vsel %vm5770_vm0, 0, %v5769_v4  ;;  %v1808_v62 = vadd.s32 %v1807_v14, %v1803_v38  ;;  %v8651_v15 = vand.u32 8388607, %v9898_v49 }
 0x226   :  { %v1717_v35 = vsub.s32 32, %v1716_v8  ;;  %v1721_v43 = vsub.s32 4294967266, %v1716_v8  ;;  %v1866_v51 = vsub.s32 32, %v1865_v6  ;;  %v1958_v59 = vshrl.u32 %v1957_v32, 23 }
 0x227   :  { %v1718_v47 = vshll.u32 %v8583_v57, %v1716_v8  ;;  %v1809_v22 = vadd.s32 536870912, %v1808_v62  ;;  %v8654_v48 = vshrl.u32 %v1863_v3, 5  ;;  %v1868_v44 = vshll.u32 %v9933_v7, %v1865_v6 }
 0x228   :  { %v8657_v21 = vpop.eup %7098  ;;  %v1719_v39 = vshrl.u32 %v1701_v41, %v1717_v35  ;;  %v1722_v31 = vadd.s32 127, %v1721_v43  ;;  %v1869_v36 = vshrl.u32 %v9938_v58, %v1866_v51  ;;  %v1871_v25 = vshll.u32 %v9938_v58, %v1865_v6 }
 0x229   :  { %9999 = vst [vmem:[#allocation42_spill] sm:$0xff] %v8657_v21  ;;  %v1810_v2 = vshrl.u32 %v1809_v22, 30  ;;  %v1872_v13 = vshrl.u32 %v9944_v33, %v1866_v51  ;;  %v1874_v4 = vshll.u32 %v9944_v33, %v1865_v6  ;;  %v1875_v57 = vshrl.u32 %v9946_v30, %v1866_v51 }
 0x22a   :  { %v1720_v32 = vor.u32 %v1719_v39, %v1718_v47  ;;  %v1723_v38 = vshll.u32 %v1722_v31, 23  ;;  %v1877_v3 = vshll.u32 %v9946_v30, %v1865_v6  ;;  %v1878_v14 = vshrl.u32 %v9951_v23, %v1866_v51 }
 0x22b   :  { %v1811_v8 = vshll.u32 %v1810_v2, 30  ;;  %v1867_v41 = vshrl.u32 %v9933_v7, %v1866_v51  ;;  %v1870_v35 = vor.u32 %v1869_v36, %v1868_v44  ;;  %v5779_v43 = vadd.s32 4294967169, %v1958_v59 }
 0x22c   :  { %v1724_v49 = vor.u32 4788187, %v1723_v38  ;;  %vm1750_vm1 = vcmp.lt.s32.totalorder %v7932_v19, 0  ;;  %v1873_v22 = vor.u32 %v1872_v13, %v1871_v25  ;;  %v1876_v55 = vor.u32 %v1875_v57, %v1874_v4 }
 0x22d   :  { %v1879_v61 = vor.u32 %v1878_v14, %v1877_v3  ;;  %v8668_v27 = vpop.eup %7100  ;;  %v8670_v21 = vsub.s32 %v1808_v62, %v1811_v8  ;;  %v1834_v47 = vsub.s32 4, %v1810_v2  ;;  %v1880_v39 = vshll.u32 %v9951_v23, %v1865_v6 }
 0x22e   :  { %10000 = vst [vmem:[#allocation43_spill] sm:$0xff] %v8668_v27  ;;  %v1881_v31 = vshrl.u32 %v9952_v26, %v1866_v51  ;;  %v1725_v53 = vand.u32 2147483647, %v1724_v49  ;;  %v1727_v1 = vcvt.s32.f32 %v1720_v32  ;;  %vm1883_vm3 = vcmp.lt.s32.totalorder %v8654_v48, 1 }
 0x22f   :  { %vm1884_vm5 = vcmp.lt.s32.totalorder %v8654_v48, 2  ;;  %v8676_v59 = vpop.eup %7102  ;;  %v10002_v44 = vand.u32 2147483647, %v7932_v19  ;;  %v1814_v62 = vsub.s32 0, %v8670_v21  ;;  %vm1885_vm6 = vcmp.lt.s32.totalorder %v8654_v48, 3 }
 0x230   :  { %10001 = vst [vmem:[#allocation44_spill] sm:$0xff] %v8676_v59  ;;  %v1882_v25 = vor.u32 %v1881_v31, %v1880_v39  ;;  %vm1886_vm7 = vcmp.lt.s32.totalorder %v8654_v48, 4  ;;  %v1728_v49 = vmul.f32 %v1727_v1, %v1725_v53  ;;  %v1891_v51 = vsel %vm1883_vm3, %v1870_v35, %v1873_v22  ;;  %v3841_v53 = vld [vmem:[%s9819_s5 + $0x20] sm:$0xff]  ;;  %v3842_v1 = vld [vmem:[%s9819_s5 + $0x28] sm:$0xff] }
 0x231   :  { %vm8680_vm4 = vcmp.le.f32.partialorder %v10002_v44, 0.7853982  ;;  %v1888_v6 = vsel %vm1886_vm7, %v1876_v55, 2102212464  ;;  %v1892_v13 = vsel %vm1886_vm7, %v1879_v61, 920167782  ;;  %v5772_v4 = vmin.u32 %v1814_v62, %v8670_v21 }
 0x232   :  { %v1887_v57 = vsel %vm1883_vm3, %v1867_v41, %v1870_v35  ;;  %v1893_v32 = vsel %vm1885_vm6, %v1876_v55, %v1892_v13  ;;  %v1895_v38 = vsel %vm1883_vm3, %v1873_v22, %v1876_v55  ;;  %v1729_v3 = vxor.u32 2147483648, %v1728_v49 }
 0x233   :  { %v1889_v14 = vsel %vm1885_vm6, %v1873_v22, %v1888_v6  ;;  %v1894_v8 = vsel %vm1884_vm5, %v1891_v51, %v1893_v32  ;;  %v1896_v44 = vsel %vm1886_vm7, %v1882_v25, 1326507024  ;;  %v1816_v39 = vclz %v5772_v4  ;;  %v3843_v51 = vld [vmem:[%s9819_s5 + $0x30] sm:$0xff] }
 0x234   :  { %v1897_v31 = vsel %vm1885_vm6, %v1879_v61, %v1896_v44  ;;  %v8691_v27 = vmul.u32.u64.low %v8646_v5, %v1894_v8  ;;  %v8692_v59 = vmul.u32.u64.high %v8646_v5, %v1894_v8, %v8691_v27  ;;  %v1730_v55 = vsel %vm1647_vm8, %v1729_v3, %v1728_v49  ;;  %v7129_v49 = vld [vmem:[#allocation2 + $0x10] sm:$0xff] }
 0x235   :  { %v1804_v41 = vadd.s32 %v8604_v46, %v8622_v37  ;;  %v1898_v61 = vsel %vm1884_vm5, %v1895_v38, %v1897_v31  ;;  %v1964_v35 = vadd.s32 1, %v5779_v43  ;;  %v5773_v22 = vadd.s32 4294967294, %v1816_v39  ;;  %v3844_v46 = vld [vmem:[%s9819_s5 + $0x38] sm:$0xff]  ;;  %4304 = vrot.lane.b32.xlu1 %v7129_v49, %s7154_s27 }
 0x236   :  { %v1835_v62 = vsel %vm1750_vm1, %v1834_v47, %v1810_v2  ;;  %v8710_v25 = vmul.u32.u64.low %v8646_v5, %v1898_v61  ;;  %v8711_v6 = vmul.u32.u64.high %v8646_v5, %v1898_v61, %v8710_v25  ;;  %v8722_v37 = vsel %vm8573_vm13, %v7811_v56, %v1730_v55  ;;  %v7128_v47 = vld [vmem:[#allocation2] sm:$0xff] }
 0x237   :  { %v1890_v2 = vsel %vm1884_vm5, %v1887_v57, %v1889_v14  ;;  %vm1965_vm8 = vcmp.gt.s32.totalorder %v1964_v35, 0  ;;  %v6807_v43 = vpack.c.bf16 %v3842_v1, %v3841_v53  ;;  %4300 = vrot.lane.b32.xlu0 %v7128_v47, %s7154_s27  ;;  %vm5774_vm9 = vcmp.lt.s32.totalorder %v5773_v22, 0  ;;  %v7130_v53 = vld [vmem:[#allocation2 + $0x8] sm:$0xff]  ;;  %v7131_v1 = vld [vmem:[#allocation2 + $0x18] sm:$0xff] }
 0x238   :  { %v1909_v13 = vadd.s32 1, %v8692_v59  ;;  %v1962_v4 = vor.u32 8388608, %v8651_v15  ;;  %v1966_v52 = vsel %vm1965_vm8, %v1964_v35, 0  ;;  %v1819_v32 = vsel %vm5774_vm9, 0, %v5773_v22  ;;  %v2067_v15 = vld [vmem:[%s9818_s4 + $0x50] sm:$0xff] }
 0x239   :  { %v8732_v48 = vsel %vm8680_vm4, 0, %v1835_v62  ;;  %v1968_v57 = vand.u32 31, %v1966_v52  ;;  %6808 = vmatpush3.bf16.msra.mxu1 %v6807_v43  ;;  %v6810_v38 = vpack.c.bf16 %v3844_v46, %v3843_v51  ;;  %7104 = vcosq.f32 %v8722_v37  ;;  %4306 = vrot.lane.b32.xlu1 %v7131_v1, %s7154_s27 }
 0x23a   :  { %v1820_v3 = vsub.s32 32, %v1819_v32  ;;  %v1824_v14 = vsub.s32 4294967266, %v1819_v32  ;;  %v1906_v8 = vmul.u32 %v8646_v5, %v1890_v2  ;;  %6809 = vmatprep.subr.bf16.mxu1 %v9937_v16  ;;  %v1821_v44 = vshll.u32 %v8670_v21, %v1819_v32 }
 0x23b   :  { %vm1908_vm11 = vc.u32 %v8711_v6, %v8691_v27  ;;  %v8740_v39 = vshrl.u32 %v1966_v52, 5  ;;  %v1969_v31 = vsub.s32 32, %v1968_v57  ;;  %4302 = vrot.lane.b32.xlu0 %v7130_v53, %s7154_s27  ;;  %v1971_v35 = vshll.u32 %v9933_v7, %v1968_v57 }
 0x23c   :  { %v1822_v55 = vshrl.u32 %v1804_v41, %v1820_v3  ;;  %v1825_v61 = vadd.s32 127, %v1824_v14  ;;  %v1910_v5 = vsel %vm1908_vm11, %v1909_v13, %v8692_v59  ;;  %v1974_v62 = vshll.u32 %v9938_v58, %v1968_v57  ;;  %v7132_v13 = vld [vmem:[#allocation2 + $0x20] sm:$0xff] }
 0x23d   :  { %v1911_v22 = vadd.s32 %v1910_v5, %v1906_v8  ;;  %v1972_v21 = vshrl.u32 %v9938_v58, %v1969_v31  ;;  %v1975_v25 = vshrl.u32 %v9944_v33, %v1969_v31  ;;  %6811 = vmatpush3.bf16.msra.mxu1 %v6810_v38  ;;  %v1977_v2 = vshll.u32 %v9944_v33, %v1968_v57  ;;  %v7133_v58 = vld [vmem:[#allocation2 + $0x28] sm:$0xff] }
 0x23e   :  { %v1823_v51 = vor.u32 %v1822_v55, %v1821_v44  ;;  %v1826_v46 = vshll.u32 %v1825_v61, 23  ;;  %v1978_v43 = vshrl.u32 %v9946_v30, %v1969_v31  ;;  %6812 = vmatprep.subr.bf16.mxu1 %v9937_v16  ;;  %v1970_v59 = vshrl.u32 %v9933_v7, %v1969_v31  ;;  %4310 = vrot.lane.b32.xlu1 %v7133_v58, %s7154_s27  ;;  %v7134_v55 = vld [vmem:[#allocation2 + $0x30] sm:$0xff] }
 0x23f   :  { %v1912_v41 = vadd.s32 536870912, %v1911_v22  ;;  %v1980_v47 = vshll.u32 %v9946_v30, %v1968_v57  ;;  %v1981_v49 = vshrl.u32 %v9951_v23, %v1969_v31  ;;  %4308 = vrot.lane.b32.xlu0 %v7132_v13, %s7154_s27  ;;  %v1973_v32 = vor.u32 %v1972_v21, %v1971_v35  ;;  %v7137_v13 = vld [vmem:[#allocation2 + $0x48] sm:$0xff] }
 0x240   :  { %v1827_v52 = vor.u32 4788187, %v1826_v46  ;;  %v1976_v33 = vor.u32 %v1975_v25, %v1974_v62  ;;  %v1979_v38 = vor.u32 %v1978_v43, %v1977_v2  ;;  %v1983_v8 = vshll.u32 %v9951_v23, %v1968_v57  ;;  %v7135_v23 = vld [vmem:[#allocation2 + $0x38] sm:$0xff]  ;;  %v3846_v43 = vld [vmem:[%s9819_s5 + $0x48] sm:$0xff] }
 0x241   :  { %v1913_v3 = vshrl.u32 %v1912_v41, 30  ;;  %v1982_v14 = vor.u32 %v1981_v49, %v1980_v47  ;;  %v1984_v7 = vshrl.u32 %v9952_v26, %v1969_v31  ;;  %v1830_v30 = vcvt.s32.f32 %v1823_v51  ;;  %v7136_v49 = vld [vmem:[#allocation2 + $0x40] sm:$0xff] }
 0x242   :  { %v1828_v44 = vand.u32 2147483647, %v1827_v52  ;;  %vm1853_vm10 = vcmp.lt.s32.totalorder %v8017_v63, 0  ;;  %vm1986_vm13 = vcmp.lt.s32.totalorder %v8740_v39, 1  ;;  %vm1987_vm12 = vcmp.lt.s32.totalorder %v8740_v39, 2  ;;  %4314 = vrot.lane.b32.xlu1 %v7135_v23, %s7154_s27 }
 0x243   :  { %v1914_v53 = vshll.u32 %v1913_v3, 30  ;;  %v1985_v1 = vor.u32 %v1984_v7, %v1983_v8  ;;  %vm1988_vm14 = vcmp.lt.s32.totalorder %v8740_v39, 3  ;;  %vm1989_vm15 = vcmp.lt.s32.totalorder %v8740_v39, 4  ;;  %4312 = vrot.lane.b32.xlu0 %v7134_v55, %s7154_s27  ;;  %v8766_v26 = vpop.eup %7104  ;;  %v3848_v8 = vld [vmem:[%s9819_s5 + $0x58] sm:$0xff] }
 0x244   :  { %v1831_v57 = vmul.f32 %v1830_v30, %v1828_v44  ;;  %v1991_v31 = vsel %vm1989_vm15, %v1979_v38, 2102212464  ;;  %v1994_v61 = vsel %vm1986_vm13, %v1973_v32, %v1976_v33  ;;  %v1995_v5 = vsel %vm1989_vm15, %v1982_v14, 920167782 }
 0x245   :  { %v8774_v35 = vsub.s32 %v1911_v22, %v1914_v53  ;;  %v1990_v21 = vsel %vm1986_vm13, %v1970_v59, %v1973_v32  ;;  %v1992_v62 = vsel %vm1988_vm14, %v1976_v33, %v1991_v31  ;;  %v1996_v25 = vsel %vm1988_vm14, %v1979_v38, %v1995_v5  ;;  %v3845_v22 = vld [vmem:[%s9819_s5 + $0x40] sm:$0xff] }
 0x246   :  { %7106 = vsinq.f32 %v8722_v37  ;;  %v1832_v51 = vxor.u32 2147483648, %v1831_v57  ;;  %v1997_v46 = vsel %vm1987_vm12, %v1994_v61, %v1996_v25  ;;  %v2002_v2 = vshll.u32 %v1962_v4, 8  ;;  %v2068_v4 = vld [vmem:[%s9818_s4 + $0x58] sm:$0xff]  ;;  %4318 = vrot.lane.b32.xlu1 %v7137_v13, %s7154_s27 }
 0x247   :  { %v1917_v41 = vsub.s32 0, %v8774_v35  ;;  %v1937_v59 = vsub.s32 4, %v1913_v3  ;;  %v1998_v37 = vsel %vm1986_vm13, %v1976_v33, %v1979_v38  ;;  %v1999_v47 = vsel %vm1989_vm15, %v1985_v1, 1326507024  ;;  %4316 = vrot.lane.b32.xlu0 %v7136_v49, %s7154_s27  ;;  %v3847_v38 = vld [vmem:[%s9819_s5 + $0x50] sm:$0xff] }
 0x248   :  { %v1993_v58 = vsel %vm1987_vm12, %v1990_v21, %v1992_v62  ;;  %v2000_v52 = vsel %vm1988_vm14, %v1982_v14, %v1999_v47  ;;  %v8810_v32 = vmul.u32.u64.low %v2002_v2, %v1997_v46  ;;  %v8811_v33 = vmul.u32.u64.high %v2002_v2, %v1997_v46, %v8810_v32  ;;  %v7138_v62 = vld [vmem:[#allocation2 + $0x50] sm:$0xff] }
 0x249   :  { %v1833_v7 = vsel %vm1750_vm1, %v1832_v51, %v1831_v57  ;;  %v5776_v44 = vmin.u32 %v1917_v41, %v8774_v35  ;;  %v2001_v14 = vsel %vm1987_vm12, %v1998_v37, %v2000_v52  ;;  %v6813_v30 = vpack.c.bf16 %v3846_v43, %v3845_v22  ;;  %v7140_v41 = vld [vmem:[#allocation2 + $0x60] sm:$0xff]  ;;  %v7141_v52 = vld [vmem:[#allocation2 + $0x68] sm:$0xff] }
 0x24a   :  { %v1907_v53 = vadd.s32 %v8691_v27, %v8711_v6  ;;  %v8827_v1 = vmul.u32.u64.low %v2002_v2, %v2001_v14  ;;  %v8828_v55 = vmul.u32.u64.high %v2002_v2, %v2001_v14, %v8827_v1  ;;  %v8830_v23 = vpack.c.bf16 %v2068_v4, %v2067_v15 }
 0x24b   :  { %v10005_v31 = vand.u32 2147483647, %v8017_v63  ;;  %v1919_v57 = vclz %v5776_v44  ;;  %v1938_v39 = vsel %vm1853_vm10, %v1937_v59, %v1913_v3  ;;  %v2009_v5 = vmul.u32 %v2002_v2, %v1993_v58  ;;  %6814 = vmatpush3.bf16.msra.mxu1 %v6813_v30  ;;  %4320 = vrot.lane.b32.xlu0 %v7138_v62, %s7154_s27  ;;  %v7139_v2 = vld [vmem:[#allocation2 + $0x58] sm:$0xff]  ;;  %v7142_v44 = vld [vmem:[#allocation2 + $0x70] sm:$0xff] }
 0x24c   :  { %v6816_v21 = vpack.c.bf16 %v3848_v8, %v3847_v38  ;;  %v1836_v27 = vsel %vm8680_vm4, %v7932_v19, %v1833_v7  ;;  %v2012_v6 = vadd.s32 1, %v8811_v33  ;;  %6835 = vmatpush3.bf16.msra.mxu0 %v8830_v23  ;;  %6815 = vmatprep.subr.bf16.mxu1 %v9937_v16  ;;  %vm400_vm1 = vcmp.lt.s32.totalorder %v7680_v9, 2 }
 0x24d   :  { %vm8834_vm0 = vcmp.le.f32.partialorder %v10005_v31, 0.7853982  ;;  %v402_v3 = vxor.u32 2147483648, %v7756_v60  ;;  %v5777_v25 = vadd.s32 4294967294, %v1919_v57  ;;  %vm401_vm3 = vcmp.eq.s32.totalorder %v7680_v9, 0  ;;  %4322 = vrot.lane.b32.xlu1 %v7139_v2, %s7154_s27  ;;  %6836 = vmatprep.subr.bf16.mxu0 %v9937_v16  ;;  %v7143_v57 = vld [vmem:[#allocation2 + $0x78] sm:$0xff] }
 0x24e   :  { %v405_v51 = vxor.u32 2147483648, %v7752_v29  ;;  %v2162_v46 = vadd.s32 3, %v7603_v45  ;;  %vm2011_vm5 = vc.u32 %v8828_v55, %v8810_v32  ;;  %vm404_vm4 = vcmp.eq.s32.totalorder %v7680_v9, 2 }
 0x24f   :  { %v403_v36 = vsel %vm401_vm3, %v7752_v29, %v402_v3  ;;  %vm3849_vm6 = vcmask 785408   ;;  %vm5778_vm7 = vcmp.lt.s32.totalorder %v5777_v25, 0  ;;  %v2013_v22 = vsel %vm2011_vm5, %v2012_v6, %v8811_v33  ;;  %6817 = vmatpush3.bf16.msra.mxu1 %v6816_v21  ;;  %4324 = vrot.lane.b32.xlu0 %v7140_v41, %s7154_s27  ;;  %v10009_v6 = vld [vmem:[#allocation3_spill] sm:$0xff] }
 0x250   :  { %v406_v43 = vsel %vm404_vm4, %v405_v51, %v7756_v60  ;;  %v2163_v45 = vand.u32 3, %v2162_v46  ;;  %v8861_v59 = vpop.eup %7106  ;;  %v1922_v37 = vsel %vm5778_vm7, 0, %v5777_v25  ;;  %v2014_v47 = vadd.s32 %v2013_v22, %v2009_v5  ;;  %6957 = vmatprep.subr.bf16.mxu1 %v9937_v16 }
 0x251   :  { %vm398_vm8 = vweird.f32 %v7372_v40  ;;  %v407_v15 = vsel %vm400_vm1, %v403_v36, %v406_v43  ;;  %v1923_v4 = vsub.s32 32, %v1922_v37  ;;  %v1924_v49 = vshll.u32 %v8774_v35, %v1922_v37  ;;  %4326 = vrot.lane.b32.xlu1 %v7141_v52, %s7154_s27  ;;  %v10011_v36 = vld [vmem:[#allocation4_spill] sm:$0xff] }
 0x252   :  { %v1927_v13 = vsub.s32 4294967266, %v1922_v37  ;;  %v408_v58 = vsel %vm398_vm8, nan, %v407_v15  ;;  %v2015_v33 = vadd.s32 536870912, %v2014_v47  ;;  %vm2164_vm9 = vcmp.lt.s32.totalorder %v2163_v45, 2  ;;  %v10013_v15 = vld [vmem:[#allocation19_spill] sm:$0xff] }
 0x253   :  { %vm2165_vm11 = vcmp.eq.s32.totalorder %v2163_v45, 0  ;;  %vm2168_vm13 = vcmp.eq.s32.totalorder %v2163_v45, 2  ;;  %6395 = vmatmul.mubr.msk.f32.vlgmr.msra.gmra.mrb[34].mxu0 %vm3849_vm6, %v408_v58  ;;  %v1925_v9 = vshrl.u32 %v1907_v53, %v1923_v4  ;;  %v10008_v35 = vmov 0.0   ;;  %4328 = vrot.lane.b32.xlu0 %v7142_v44, %s7154_s27 }
 0x254   :  { %v1928_v38 = vadd.s32 127, %v1927_v13  ;;  %v2167_v8 = vsel %vm2165_vm11, %v7752_v29, %v402_v3  ;;  %v2170_v7 = vsel %vm2168_vm13, %v405_v51, %v7756_v60  ;;  %6397 = vmatprep.mubr.msk.f32.mxu0 %vm7146_vm2, %v10008_v35  ;;  %7108 = vcosq.f32 %v1836_v27 }
 0x255   :  { %v8879_v14 = vsel %vm8834_vm0, 0, %v1938_v39  ;;  %v2016_v30 = vshrl.u32 %v2015_v33, 30  ;;  %v2171_v1 = vsel %vm2164_vm9, %v2167_v8, %v2170_v7  ;;  %v1926_v31 = vor.u32 %v1925_v9, %v1924_v49  ;;  %4330 = vrot.lane.b32.xlu1 %v7143_v57, %s7154_s27  ;;  %v10014_v9 = vld [vmem:[#allocation16_spill] sm:$0xff] }
 0x256   :  { %v1929_v53 = vshll.u32 %v1928_v38, 23  ;;  %v2172_v29 = vsel %vm398_vm8, nan, %v2171_v1  ;;  %v2266_v60 = vadd.s32 3, %v7694_v11  ;;  %7110 = vsinq.f32 %v1836_v27  ;;  %v10010_v27 = vld [vmem:[#allocation17_spill] sm:$0xff]  ;;  %v10015_v1 = vld [vmem:[#allocation18_spill] sm:$0xff] }
 0x257   :  { %vm1956_vm12 = vcmp.lt.s32.totalorder %v8119_v24, 0  ;;  %v2017_v5 = vshll.u32 %v2016_v30, 30  ;;  %6320 = vmatmul.mubr.msk.f32.vlgmr.msra.gmra.mrb[0].mxu1 %vm3849_vm6, %v2172_v29  ;;  %v505_v39 = vxor.u32 2147483648, %v7826_v0  ;;  %v502_v21 = vand.u32 3, %v7694_v11  ;;  %v7144_v11 = vld [vmem:[#allocation2 + $0x80] sm:$0xff] }
 0x258   :  { %v1930_v62 = vor.u32 4788187, %v1929_v53  ;;  %v8891_v40 = vadd.s32 %v8810_v32, %v8828_v55  ;;  %6963 = vmatpush3.bf16.msra.mxu1 %v10009_v6  ;;  %6322 = vmatprep.mubr.msk.f32.mxu1 %vm7146_vm2, %v10008_v35  ;;  %v508_v3 = vxor.u32 2147483648, %v10010_v27  ;;  %v2267_v25 = vand.u32 3, %v2266_v60  ;;  %v10012_v55 = vld [vmem:[#allocation21_spill] sm:$0xff]  ;;  %v10018_v6 = vld [vmem:[#allocation23_spill] sm:$0xff] }
 0x259   :  { %v1933_v51 = vcvt.s32.f32 %v1926_v31  ;;  %v8897_v46 = vsub.s32 %v2014_v47, %v2017_v5  ;;  %v2040_v2 = vsub.s32 4, %v2016_v30  ;;  %vm501_vm14 = vweird.f32 %v10011_v36  ;;  %6958 = vmatprep.subr.bf16.mxu1 %v9937_v16  ;;  %4332 = vrot.lane.b32.xlu0 %v7144_v11, %s7154_s27  ;;  %v10016_v60 = vld [vmem:[#allocation5_spill] sm:$0xff]  ;;  %v10019_v36 = vld [vmem:[#allocation6_spill] sm:$0xff] }
 0x25a   :  { %v1931_v32 = vand.u32 2147483647, %v1930_v62  ;;  %vm2269_vm15 = vcmp.eq.s32.totalorder %v2267_v25, 0  ;;  %vm504_vm1 = vcmp.eq.s32.totalorder %v502_v21, 0  ;;  %v608_v22 = vxor.u32 2147483648, %v10012_v55 }
 0x25b   :  { %v2020_v43 = vsub.s32 0, %v8897_v46  ;;  %vm2268_vm3 = vcmp.lt.s32.totalorder %v2267_v25, 2  ;;  %v2271_v45 = vsel %vm2269_vm15, %v10010_v27, %v505_v39  ;;  %vm2272_vm5 = vcmp.eq.s32.totalorder %v2267_v25, 2 }
 0x25c   :  { %v1934_v41 = vmul.f32 %v1933_v51, %v1931_v32  ;;  %v2274_v37 = vsel %vm2272_vm5, %v508_v3, %v7826_v0  ;;  %v506_v47 = vsel %vm504_vm1, %v10010_v27, %v505_v39  ;;  %vm507_vm4 = vcmp.eq.s32.totalorder %v502_v21, 2  ;;  %6964 = vmatpush3.bf16.msra.mxu1 %v10013_v15 }
 0x25d   :  { %v5780_v4 = vmin.u32 %v2020_v43, %v8897_v46  ;;  %v2275_v49 = vsel %vm2268_vm3, %v2271_v45, %v2274_v37  ;;  %vm503_vm7 = vcmp.lt.s32.totalorder %v502_v21, 2  ;;  %v509_v13 = vsel %vm507_vm4, %v508_v3, %v7826_v0  ;;  %6959 = vmatprep.subr.bf16.mxu1 %v9937_v16 }
 0x25e   :  { %v1935_v58 = vxor.u32 2147483648, %v1934_v41  ;;  %v2276_v52 = vsel %vm501_vm14, nan, %v2275_v49  ;;  %v510_v33 = vsel %vm503_vm7, %v506_v47, %v509_v13  ;;  %v2370_v38 = vadd.s32 3, %v10014_v9  ;;  %v8914_v8 = vpop.eup %7108 }
 0x25f   :  { %v2022_v7 = vclz %v5780_v4  ;;  %6323 = vmatmul.mubr.msk.f32.gmra.mrb[2].mxu1 %vm3849_vm6, %v2276_v52  ;;  %v511_v44 = vsel %vm501_vm14, nan, %v510_v33  ;;  %v611_v31 = vxor.u32 2147483648, %v10015_v1  ;;  %v605_v0 = vand.u32 3, %v10014_v9 }
 0x260   :  { %v1936_v53 = vsel %vm1853_vm10, %v1935_v58, %v1934_v41  ;;  %v8925_v29 = vsel %vm1956_vm12, %v2040_v2, %v2016_v30  ;;  %6398 = vmatmul.mubr.msk.f32.gmra.mrb[36].mxu0 %vm3849_vm6, %v511_v44  ;;  %6325 = vmatprep.mubr.msk.f32.mxu1 %vm7146_vm2, %v10008_v35  ;;  %vm604_vm8 = vweird.f32 %v10016_v60  ;;  %v2371_v57 = vand.u32 3, %v2370_v38  ;;  %v8931_v5 = vpop.eup %7110  ;;  %v10017_v30 = vld [vmem:[#allocation24_spill] sm:$0xff] }
 0x261   :  { %v8936_v39 = vsel %vm8834_vm0, %v8017_v63, %v1936_v53  ;;  %v5781_v21 = vadd.s32 4294967294, %v2022_v7  ;;  %6400 = vmatprep.mubr.msk.f32.mxu0 %vm7146_vm2, %v10008_v35  ;;  %v711_v62 = vxor.u32 2147483648, %v10017_v30  ;;  %v714_v27 = vxor.u32 2147483648, %v10018_v6  ;;  %6965 = vmatpush3.bf16.msra.mxu1 %v8103_v18  ;;  %v10020_v41 = vld [vmem:[#allocation20_spill] sm:$0xff] }
 0x262   :  { %vm2373_vm10 = vcmp.eq.s32.totalorder %v2371_v57, 0  ;;  %vm2376_vm9 = vcmp.eq.s32.totalorder %v2371_v57, 2  ;;  %vm606_vm11 = vcmp.lt.s32.totalorder %v605_v0, 2  ;;  %vm607_vm13 = vcmp.eq.s32.totalorder %v605_v0, 0  ;;  %6960 = vmatprep.subr.bf16.mxu1 %v9937_v16 }
 0x263   :  { %vm5782_vm14 = vcmp.lt.s32.totalorder %v5781_v21, 0  ;;  %vm2372_vm15 = vcmp.lt.s32.totalorder %v2371_v57, 2  ;;  %v2375_v61 = vsel %vm2373_vm10, %v10015_v1, %v608_v22  ;;  %v2378_v3 = vsel %vm2376_vm9, %v611_v31, %v10012_v55 }
 0x264   :  { %7112 = vcosq.f32 %v8936_v39  ;;  %v2025_v25 = vsel %vm5782_vm14, 0, %v5781_v21  ;;  %v2379_v51 = vsel %vm2372_vm15, %v2375_v61, %v2378_v3  ;;  %v609_v2 = vsel %vm607_vm13, %v10015_v1, %v608_v22 }
 0x265   :  { %vm707_vm0 = vweird.f32 %v10019_v36  ;;  %v2026_v18 = vsub.s32 32, %v2025_v25  ;;  %v2030_v11 = vsub.s32 4294967266, %v2025_v25  ;;  %v2380_v32 = vsel %vm604_vm8, nan, %v2379_v51  ;;  %6966 = vmatpush3.bf16.msra.mxu1 %v8336_v20 }
 0x266   :  { %vm610_vm1 = vcmp.eq.s32.totalorder %v605_v0, 2  ;;  %v2027_v43 = vshll.u32 %v8897_v46, %v2025_v25  ;;  %6326 = vmatmul.mubr.msk.f32.gmra.mrb[4].mxu1 %vm3849_vm6, %v2380_v32  ;;  %v2474_v37 = vadd.s32 3, %v10020_v41  ;;  %v708_v22 = vand.u32 3, %v10020_v41  ;;  %6961 = vmatprep.subr.bf16.mxu1 %v9937_v16  ;;  %v10024_v0 = vld [vmem:[#allocation22_spill] sm:$0xff] }
 0x267   :  { %v612_v45 = vsel %vm610_vm1, %v611_v31, %v10012_v55  ;;  %v2028_v47 = vshrl.u32 %v8891_v40, %v2026_v18  ;;  %v2031_v15 = vadd.s32 127, %v2030_v11  ;;  %6328 = vmatprep.mubr.msk.f32.mxu1 %vm7146_vm2, %v10008_v35  ;;  %v814_v20 = vxor.u32 2147483648, %v8130_v10  ;;  %v10026_v11 = vld [vmem:[#allocation25_spill] sm:$0xff] }
 0x268   :  { %v613_v4 = vsel %vm606_vm11, %v609_v2, %v612_v45  ;;  %v2475_v55 = vand.u32 3, %v2474_v37  ;;  %vm709_vm3 = vcmp.lt.s32.totalorder %v708_v22, 2  ;;  %vm710_vm5 = vcmp.eq.s32.totalorder %v708_v22, 0 }
 0x269   :  { %v614_v46 = vsel %vm604_vm8, nan, %v613_v4  ;;  %v2029_v49 = vor.u32 %v2028_v47, %v2027_v43  ;;  %v2032_v13 = vshll.u32 %v2031_v15, 23  ;;  %v712_v40 = vsel %vm710_vm5, %v10018_v6, %v711_v62  ;;  %6967 = vmatpush3.bf16.msra.mxu1 %v8634_v54  ;;  %v10028_v47 = vld [vmem:[#allocation9_spill] sm:$0xff] }
 0x26a   :  { %6401 = vmatmul.mubr.msk.f32.gmra.mrb[38].mxu0 %vm3849_vm6, %v614_v46  ;;  %vm713_vm4 = vcmp.eq.s32.totalorder %v708_v22, 2  ;;  %vm2476_vm7 = vcmp.lt.s32.totalorder %v2475_v55, 2  ;;  %vm2477_vm10 = vcmp.eq.s32.totalorder %v2475_v55, 0  ;;  %vm2480_vm9 = vcmp.eq.s32.totalorder %v2475_v55, 2  ;;  %6962 = vmatprep.subr.bf16.mxu1 %v9937_v16 }
 0x26b   :  { %6403 = vmatprep.mubr.msk.f32.mxu0 %vm7146_vm2, %v10008_v35  ;;  %v715_v58 = vsel %vm713_vm4, %v714_v27, %v10017_v30  ;;  %v2033_v52 = vor.u32 4788187, %v2032_v13  ;;  %v2036_v33 = vcvt.s32.f32 %v2029_v49  ;;  %v2479_v9 = vsel %vm2477_vm10, %v10018_v6, %v711_v62  ;;  %v10025_v6 = vld [vmem:[#allocation7_spill] sm:$0xff] }
 0x26c   :  { %v2482_v38 = vsel %vm2480_vm9, %v714_v27, %v10017_v30  ;;  %v10021_v7 = vand.u32 2147483647, %v8119_v24  ;;  %v716_v1 = vsel %vm709_vm3, %v712_v40, %v715_v58  ;;  %v817_v31 = vxor.u32 2147483648, %v8121_v42 }
 0x26d   :  { %v2483_v44 = vsel %vm2476_vm7, %v2479_v9, %v2482_v38  ;;  %v2578_v53 = vadd.s32 3, %v10024_v0  ;;  %v2034_v60 = vand.u32 2147483647, %v2033_v52  ;;  %v717_v21 = vsel %vm707_vm0, nan, %v716_v1  ;;  %6968 = vmatpush3.bf16.msra.mxu1 %v8830_v23 }
 0x26e   :  { %vm8976_vm8 = vcmp.le.f32.partialorder %v10021_v7, 0.7853982  ;;  %v2484_v57 = vsel %vm707_vm0, nan, %v2483_v44  ;;  %v811_v30 = vand.u32 3, %v10024_v0  ;;  %v8989_v62 = vpop.eup %7112  ;;  %7114 = vsinq.f32 %v8936_v39  ;;  %6404 = vmatmul.mubr.msk.f32.gmra.mrb[40].mxu0 %vm3849_vm6, %v717_v21  ;;  %6445 = vmatprep.subr.mxu1 %v10008_v35  ;;  %v10030_v44 = vld [vmem:[#allocation30_spill] sm:$0xff] }
 0x26f   :  { %6329 = vmatmul.mubr.msk.f32.gmra.mrb[6].mxu1 %vm3849_vm6, %v2484_v57  ;;  %vm810_vm11 = vweird.f32 %v10025_v6  ;;  %v2579_v27 = vand.u32 3, %v2578_v53  ;;  %v917_v61 = vxor.u32 2147483648, %v8159_v17  ;;  %v2037_v3 = vmul.f32 %v2036_v33, %v2034_v60  ;;  %6406 = vmatprep.mubr.msk.f32.mxu0 %vm7146_vm2, %v10008_v35  ;;  %v10029_v33 = vld [vmem:[#allocation26_spill] sm:$0xff]  ;;  %v10031_v53 = vld [vmem:[#allocation29_spill] sm:$0xff]  ;;  %v10032_v57 = vld [vmem:[#allocation27_spill] sm:$0xff] }
 0x270   :  { %6331 = vmatprep.mubr.msk.f32.mxu1 %vm7146_vm2, %v10008_v35  ;;  %vm812_vm13 = vcmp.lt.s32.totalorder %v811_v30, 2  ;;  %vm813_vm14 = vcmp.eq.s32.totalorder %v811_v30, 0  ;;  %vm816_vm15 = vcmp.eq.s32.totalorder %v811_v30, 2  ;;  %v2682_v32 = vadd.s32 3, %v10026_v11 }
 0x271   :  { %vm2580_vm0 = vcmp.lt.s32.totalorder %v2579_v27, 2  ;;  %vm2581_vm1 = vcmp.eq.s32.totalorder %v2579_v27, 0  ;;  %vm2584_vm3 = vcmp.eq.s32.totalorder %v2579_v27, 2  ;;  %v815_v23 = vsel %vm813_vm14, %v8121_v42, %v814_v20 }
 0x272   :  { %v2038_v39 = vxor.u32 2147483648, %v2037_v3  ;;  %v2583_v25 = vsel %vm2581_vm1, %v8121_v42, %v814_v20  ;;  %v2586_v51 = vsel %vm2584_vm3, %v817_v31, %v8130_v10  ;;  %v818_v2 = vsel %vm816_vm15, %v817_v31, %v8130_v10  ;;  %v10027_v10 = vld [vmem:[#allocation8_spill] sm:$0xff] }
 0x273   :  { %v2587_v36 = vsel %vm2580_vm0, %v2583_v25, %v2586_v51  ;;  %v819_v18 = vsel %vm812_vm13, %v815_v23, %v818_v2  ;;  %v914_v43 = vand.u32 3, %v10026_v11  ;;  %v920_v42 = vxor.u32 2147483648, %v8154_v12  ;;  %v10034_v11 = vld [vmem:[#allocation33_spill] sm:$0xff] }
 0x274   :  { %v2039_v45 = vsel %vm1956_vm12, %v2038_v39, %v2037_v3  ;;  %v2588_v41 = vsel %vm810_vm11, nan, %v2587_v36  ;;  %v820_v37 = vsel %vm810_vm11, nan, %v819_v18  ;;  %vm913_vm5 = vweird.f32 %v10027_v10  ;;  %v10033_v39 = vld [vmem:[#allocation10_spill] sm:$0xff] }
 0x275   :  { %6332 = vmatmul.mubr.msk.f32.gmra.mrb[8].mxu1 %vm3849_vm6, %v2588_v41  ;;  %6407 = vmatmul.mubr.msk.f32.gmra.mrb[42].mxu0 %vm3849_vm6, %v820_v37  ;;  %v2683_v22 = vand.u32 3, %v2682_v32  ;;  %vm916_vm4 = vcmp.eq.s32.totalorder %v914_v43, 0  ;;  %vm1016_vm7 = vweird.f32 %v10028_v47  ;;  %v9021_v15 = vsel %vm8976_vm8, %v8119_v24, %v2039_v45  ;;  %v10035_v41 = vld [vmem:[#allocation28_spill] sm:$0xff]  ;;  %v10036_v47 = vld [vmem:[#allocation11_spill] sm:$0xff] }
 0x276   :  { %6334 = vmatprep.mubr.msk.f32.mxu1 %vm7146_vm2, %v10008_v35  ;;  %6409 = vmatprep.mubr.msk.f32.mxu0 %vm7146_vm2, %v10008_v35  ;;  %vm915_vm12 = vcmp.lt.s32.totalorder %v914_v43, 2  ;;  %v918_v4 = vsel %vm916_vm4, %v8154_v12, %v917_v61  ;;  %vm919_vm10 = vcmp.eq.s32.totalorder %v914_v43, 2  ;;  %v1020_v20 = vxor.u32 2147483648, %v8220_v28 }
 0x277   :  { %vm2684_vm9 = vcmp.lt.s32.totalorder %v2683_v22, 2  ;;  %vm2685_vm11 = vcmp.eq.s32.totalorder %v2683_v22, 0  ;;  %vm2688_vm13 = vcmp.eq.s32.totalorder %v2683_v22, 2  ;;  %v921_v49 = vsel %vm919_vm10, %v920_v42, %v8159_v17 }
 0x278   :  { %v2687_v46 = vsel %vm2685_vm11, %v8154_v12, %v917_v61  ;;  %v2690_v55 = vsel %vm2688_vm13, %v920_v42, %v8159_v17  ;;  %v1023_v13 = vxor.u32 2147483648, %v8212_v50  ;;  %v9033_v40 = vpop.eup %7114  ;;  %v922_v52 = vsel %vm915_vm12, %v918_v4, %v921_v49  ;;  %v10037_v4 = vld [vmem:[#allocation36_spill] sm:$0xff] }
 0x279   :  { %v2691_v58 = vsel %vm2684_vm9, %v2687_v46, %v2690_v55  ;;  %v2786_v9 = vadd.s32 3, %v10029_v33  ;;  %v1017_v38 = vand.u32 3, %v10029_v33  ;;  %7116 = vcosq.f32 %v9021_v15  ;;  %v10038_v46 = vld [vmem:[#allocation35_spill] sm:$0xff] }
 0x27a   :  { %v2692_v7 = vsel %vm913_vm5, nan, %v2691_v58  ;;  %v923_v12 = vsel %vm913_vm5, nan, %v922_v52  ;;  %v1123_v17 = vxor.u32 2147483648, %v10030_v44  ;;  %v1126_v60 = vxor.u32 2147483648, %v10031_v53  ;;  %v10039_v52 = vld [vmem:[#allocation31_spill] sm:$0xff] }
 0x27b   :  { %6335 = vmatmul.mubr.msk.f32.gmra.mrb[10].mxu1 %vm3849_vm6, %v2692_v7  ;;  %6410 = vmatmul.mubr.msk.f32.gmra.mrb[44].mxu0 %vm3849_vm6, %v923_v12  ;;  %v2787_v1 = vand.u32 3, %v2786_v9  ;;  %vm1018_vm14 = vcmp.lt.s32.totalorder %v1017_v38, 2  ;;  %vm1019_vm15 = vcmp.eq.s32.totalorder %v1017_v38, 0  ;;  %vm1022_vm0 = vcmp.eq.s32.totalorder %v1017_v38, 2 }
 0x27c   :  { %6337 = vmatprep.mubr.msk.f32.mxu1 %vm7146_vm2, %v10008_v35  ;;  %6412 = vmatprep.mubr.msk.f32.mxu0 %vm7146_vm2, %v10008_v35  ;;  %v1021_v31 = vsel %vm1019_vm15, %v8212_v50, %v1020_v20  ;;  %v1024_v0 = vsel %vm1022_vm0, %v1023_v13, %v8220_v28  ;;  %v2890_v21 = vadd.s32 3, %v10032_v57  ;;  %vm1119_vm4 = vweird.f32 %v10033_v39 }
 0x27d   :  { %vm2788_vm1 = vcmp.lt.s32.totalorder %v2787_v1, 2  ;;  %vm2789_vm3 = vcmp.eq.s32.totalorder %v2787_v1, 0  ;;  %vm2792_vm5 = vcmp.eq.s32.totalorder %v2787_v1, 2  ;;  %v1025_v30 = vsel %vm1018_vm14, %v1021_v31, %v1024_v0 }
 0x27e   :  { %v2791_v6 = vsel %vm2789_vm3, %v8212_v50, %v1020_v20  ;;  %v2794_v27 = vsel %vm2792_vm5, %v1023_v13, %v8220_v28  ;;  %v1026_v61 = vsel %vm1016_vm7, nan, %v1025_v30  ;;  %v2891_v3 = vand.u32 3, %v2890_v21 }
 0x27f   :  { %v2795_v23 = vsel %vm2788_vm1, %v2791_v6, %v2794_v27  ;;  %6413 = vmatmul.mubr.msk.f32.gmra.mrb[46].mxu0 %vm3849_vm6, %v1026_v61  ;;  %v1120_v25 = vand.u32 3, %v10032_v57  ;;  %v1226_v51 = vxor.u32 2147483648, %v8369_v34  ;;  %v1229_v32 = vxor.u32 2147483648, %v10034_v11  ;;  %v10041_v27 = vld [vmem:[#allocation39_spill] sm:$0xff] }
 0x280   :  { %v2796_v2 = vsel %vm1016_vm7, nan, %v2795_v23  ;;  %6415 = vmatprep.mubr.msk.f32.mxu0 %vm7146_vm2, %v10008_v35  ;;  %vm2892_vm12 = vcmp.lt.s32.totalorder %v2891_v3, 2  ;;  %vm2893_vm10 = vcmp.eq.s32.totalorder %v2891_v3, 0  ;;  %vm2896_vm9 = vcmp.eq.s32.totalorder %v2891_v3, 2  ;;  %v10042_v3 = vld [vmem:[#allocation32_spill] sm:$0xff] }
 0x281   :  { %6338 = vmatmul.mubr.msk.f32.gmra.mrb[12].mxu1 %vm3849_vm6, %v2796_v2  ;;  %v2895_v50 = vsel %vm2893_vm10, %v10031_v53, %v1123_v17  ;;  %v2898_v28 = vsel %vm2896_vm9, %v1126_v60, %v10030_v44  ;;  %vm1121_vm11 = vcmp.lt.s32.totalorder %v1120_v25, 2  ;;  %vm1122_vm13 = vcmp.eq.s32.totalorder %v1120_v25, 0 }
 0x282   :  { %6340 = vmatprep.mubr.msk.f32.mxu1 %vm7146_vm2, %v10008_v35  ;;  %v2899_v36 = vsel %vm2892_vm12, %v2895_v50, %v2898_v28  ;;  %v1124_v18 = vsel %vm1122_vm13, %v10031_v53, %v1123_v17  ;;  %vm1125_vm7 = vcmp.eq.s32.totalorder %v1120_v25, 2  ;;  %v2994_v37 = vadd.s32 3, %v10035_v41  ;;  %v10043_v25 = vld [vmem:[#allocation13_spill] sm:$0xff] }
 0x283   :  { %v2900_v43 = vsel %vm1119_vm4, nan, %v2899_v36  ;;  %v1127_v45 = vsel %vm1125_vm7, %v1126_v60, %v10030_v44  ;;  %v1223_v42 = vand.u32 3, %v10035_v41  ;;  %v9077_v10 = vpop.eup %7116  ;;  %vm1222_vm14 = vweird.f32 %v10036_v47  ;;  %v10040_v60 = vld [vmem:[#allocation12_spill] sm:$0xff]  ;;  %v10045_v36 = vld [vmem:[#allocation14_spill] sm:$0xff] }
 0x284   :  { %v1128_v22 = vsel %vm1121_vm11, %v1124_v18, %v1127_v45  ;;  %v1329_v20 = vxor.u32 2147483648, %v10037_v4  ;;  %v1332_v55 = vxor.u32 2147483648, %v10038_v46  ;;  %v2995_v13 = vand.u32 3, %v2994_v37  ;;  %v10046_v18 = vld [vmem:[#allocation42_spill] sm:$0xff]  ;;  %v10048_v41 = vld [vmem:[#allocation40_spill] sm:$0xff] }
 0x285   :  { %6341 = vmatmul.mubr.msk.f32.gmra.mrb[14].mxu1 %vm3849_vm6, %v2900_v43  ;;  %v1129_v49 = vsel %vm1119_vm4, nan, %v1128_v22  ;;  %vm1224_vm15 = vcmp.lt.s32.totalorder %v1223_v42, 2  ;;  %vm1225_vm0 = vcmp.eq.s32.totalorder %v1223_v42, 0  ;;  %vm1228_vm1 = vcmp.eq.s32.totalorder %v1223_v42, 2 }
 0x286   :  { %6416 = vmatmul.mubr.msk.f32.gmra.mrb[48].mxu0 %vm3849_vm6, %v1129_v49  ;;  %6343 = vmatprep.mubr.msk.f32.mxu1 %vm7146_vm2, %v10008_v35  ;;  %v1227_v58 = vsel %vm1225_vm0, %v10034_v11, %v1226_v51  ;;  %v3098_v33 = vadd.s32 3, %v10039_v52  ;;  %v1326_v9 = vand.u32 3, %v10039_v52  ;;  %vm2996_vm3 = vcmp.lt.s32.totalorder %v2995_v13, 2 }
 0x287   :  { %6418 = vmatprep.mubr.msk.f32.mxu0 %vm7146_vm2, %v10008_v35  ;;  %vm2997_vm5 = vcmp.eq.s32.totalorder %v2995_v13, 0  ;;  %vm3000_vm4 = vcmp.eq.s32.totalorder %v2995_v13, 2  ;;  %v1230_v38 = vsel %vm1228_vm1, %v1229_v32, %v8369_v34  ;;  %7118 = vsinq.f32 %v9021_v15 }
 0x288   :  { %v2999_v7 = vsel %vm2997_vm5, %v10034_v11, %v1226_v51  ;;  %v3002_v12 = vsel %vm3000_vm4, %v1229_v32, %v8369_v34  ;;  %v1231_v44 = vsel %vm1224_vm15, %v1227_v58, %v1230_v38  ;;  %v3099_v17 = vand.u32 3, %v3098_v33  ;;  %v10044_v51 = vld [vmem:[#allocation38_spill] sm:$0xff] }
 0x289   :  { %v3003_v1 = vsel %vm2996_vm3, %v2999_v7, %v3002_v12  ;;  %v1232_v31 = vsel %vm1222_vm14, nan, %v1231_v44  ;;  %vm1328_vm12 = vcmp.eq.s32.totalorder %v1326_v9, 0  ;;  %vm1331_vm13 = vcmp.eq.s32.totalorder %v1326_v9, 2  ;;  %v10047_v32 = vld [vmem:[#allocation34_spill] sm:$0xff]  ;;  %v10049_v7 = vld [vmem:[#allocation44_spill] sm:$0xff]  ;;  %v10050_v44 = vld [vmem:[#allocation43_spill] sm:$0xff] }
 0x28a   :  { %v3004_v0 = vsel %vm1222_vm14, nan, %v3003_v1  ;;  %6419 = vmatmul.mubr.msk.f32.gmra.mrb[50].mxu0 %vm3849_vm6, %v1232_v31  ;;  %vm3100_vm10 = vcmp.lt.s32.totalorder %v3099_v17, 2  ;;  %vm3101_vm9 = vcmp.eq.s32.totalorder %v3099_v17, 0  ;;  %vm3104_vm11 = vcmp.eq.s32.totalorder %v3099_v17, 2 }
 0x28b   :  { %6344 = vmatmul.mubr.msk.f32.gmra.mrb[16].mxu1 %vm3849_vm6, %v3004_v0  ;;  %6421 = vmatprep.mubr.msk.f32.mxu0 %vm7146_vm2, %v10008_v35  ;;  %v3103_v34 = vsel %vm3101_vm9, %v10038_v46, %v1329_v20  ;;  %v3106_v15 = vsel %vm3104_vm11, %v1332_v55, %v10037_v4  ;;  %v1330_v53 = vsel %vm1328_vm12, %v10038_v46, %v1329_v20  ;;  %vm1325_vm7 = vweird.f32 %v10040_v60  ;;  %v10051_v0 = vld [vmem:[#allocation37_spill] sm:$0xff] }
 0x28c   :  { %6346 = vmatprep.mubr.msk.f32.mxu1 %vm7146_vm2, %v10008_v35  ;;  %v3107_v57 = vsel %vm3100_vm10, %v3103_v34, %v3106_v15  ;;  %vm1327_vm14 = vcmp.lt.s32.totalorder %v1326_v9, 2  ;;  %v1333_v21 = vsel %vm1331_vm13, %v1332_v55, %v10037_v4  ;;  %v1432_v61 = vxor.u32 2147483648, %v10041_v27 }
 0x28d   :  { %v3108_v30 = vsel %vm1325_vm7, nan, %v3107_v57  ;;  %v1334_v6 = vsel %vm1327_vm14, %v1330_v53, %v1333_v21  ;;  %v3202_v23 = vadd.s32 3, %v10042_v3  ;;  %vm1428_vm15 = vweird.f32 %v10043_v25  ;;  %v10052_v57 = vld [vmem:[#allocation15_spill] sm:$0xff] }
 0x28e   :  { %v1335_v39 = vsel %vm1325_vm7, nan, %v1334_v6  ;;  %v1435_v2 = vxor.u32 2147483648, %v10044_v51  ;;  %v1429_v50 = vand.u32 3, %v10042_v3  ;;  %vm1531_vm0 = vweird.f32 %v10045_v36  ;;  %v10053_v3 = vld [vmem:[#allocation41_spill] sm:$0xff] }
 0x28f   :  { %6347 = vmatmul.mubr.msk.f32.gmra.mrb[18].mxu1 %vm3849_vm6, %v3108_v30  ;;  %6422 = vmatmul.mubr.msk.f32.gmra.mrb[52].mxu0 %vm3849_vm6, %v1335_v39  ;;  %v3203_v28 = vand.u32 3, %v3202_v23  ;;  %v1535_v11 = vxor.u32 2147483648, %v10046_v18  ;;  %v3306_v43 = vadd.s32 3, %v10047_v32  ;;  %v1532_v45 = vand.u32 3, %v10047_v32 }
 0x290   :  { %6349 = vmatprep.mubr.msk.f32.mxu1 %vm7146_vm2, %v10008_v35  ;;  %6424 = vmatprep.mubr.msk.f32.mxu0 %vm7146_vm2, %v10008_v35  ;;  %vm1430_vm1 = vcmp.lt.s32.totalorder %v1429_v50, 2  ;;  %vm1431_vm3 = vcmp.eq.s32.totalorder %v1429_v50, 0  ;;  %vm1434_vm5 = vcmp.eq.s32.totalorder %v1429_v50, 2  ;;  %v1538_v37 = vxor.u32 2147483648, %v10048_v41 }
 0x291   :  { %vm3204_vm4 = vcmp.lt.s32.totalorder %v3203_v28, 2  ;;  %vm3205_vm12 = vcmp.eq.s32.totalorder %v3203_v28, 0  ;;  %vm3208_vm10 = vcmp.eq.s32.totalorder %v3203_v28, 2  ;;  %v1433_v42 = vsel %vm1431_vm3, %v10044_v51, %v1432_v61  ;;  %v9132_v46 = vpop.eup %7118 }
 0x292   :  { %v3207_v22 = vsel %vm3205_vm12, %v10044_v51, %v1432_v61  ;;  %v3210_v47 = vsel %vm3208_vm10, %v1435_v2, %v10041_v27  ;;  %v1436_v4 = vsel %vm1434_vm5, %v1435_v2, %v10041_v27  ;;  %v3307_v20 = vand.u32 3, %v3306_v43 }
 0x293   :  { %v3211_v55 = vsel %vm3204_vm4, %v3207_v22, %v3210_v47  ;;  %v1437_v49 = vsel %vm1430_vm1, %v1433_v42, %v1436_v4  ;;  %vm1533_vm9 = vcmp.lt.s32.totalorder %v1532_v45, 2  ;;  %vm1534_vm11 = vcmp.eq.s32.totalorder %v1532_v45, 0 }
 0x294   :  { %v3212_v13 = vsel %vm1428_vm15, nan, %v3211_v55  ;;  %v1438_v58 = vsel %vm1428_vm15, nan, %v1437_v49  ;;  %vm3308_vm13 = vcmp.lt.s32.totalorder %v3307_v20, 2  ;;  %vm3309_vm7 = vcmp.eq.s32.totalorder %v3307_v20, 0 }
 0x295   :  { %6350 = vmatmul.mubr.msk.f32.gmra.mrb[20].mxu1 %vm3849_vm6, %v3212_v13  ;;  %6425 = vmatmul.mubr.msk.f32.gmra.mrb[54].mxu0 %vm3849_vm6, %v1438_v58  ;;  %v3311_v52 = vsel %vm3309_vm7, %v10048_v41, %v1535_v11  ;;  %vm3312_vm14 = vcmp.eq.s32.totalorder %v3307_v20, 2  ;;  %v1536_v33 = vsel %vm1534_vm11, %v10048_v41, %v1535_v11  ;;  %vm1537_vm1 = vcmp.eq.s32.totalorder %v1532_v45, 2 }
 0x296   :  { %6352 = vmatprep.mubr.msk.f32.mxu1 %vm7146_vm2, %v10008_v35  ;;  %6427 = vmatprep.mubr.msk.f32.mxu0 %vm7146_vm2, %v10008_v35  ;;  %v3314_v9 = vsel %vm3312_vm14, %v1538_v37, %v10046_v18  ;;  %v1539_v38 = vsel %vm1537_vm1, %v1538_v37, %v10046_v18  ;;  %v1638_v12 = vxor.u32 2147483648, %v10049_v7  ;;  %v1641_v17 = vxor.u32 2147483648, %v10050_v44 }
 0x297   :  { %v3315_v1 = vsel %vm3308_vm13, %v3311_v52, %v3314_v9  ;;  %v1540_v31 = vsel %vm1533_vm9, %v1536_v33, %v1539_v38  ;;  %v3410_v34 = vadd.s32 3, %v10051_v0  ;;  %v1635_v15 = vand.u32 3, %v10051_v0 }
 0x298   :  { %v3316_v53 = vsel %vm1531_vm0, nan, %v3315_v1  ;;  %v1541_v60 = vsel %vm1531_vm0, nan, %v1540_v31  ;;  %vm1634_vm15 = vweird.f32 %v10052_v57  ;;  %v1741_v21 = vxor.u32 2147483648, %v8861_v59  ;;  %v4294_v1 = vld [vmem:[%s9820_s7 + $0x8] sm:$0xff] }
 0x299   :  { %6353 = vmatmul.mubr.msk.f32.gmra.mrb[22].mxu1 %vm3849_vm6, %v3316_v53  ;;  %6428 = vmatmul.mubr.msk.f32.gmra.mrb[56].mxu0 %vm3849_vm6, %v1541_v60  ;;  %v3411_v30 = vand.u32 3, %v3410_v34  ;;  %vm1636_vm3 = vcmp.lt.s32.totalorder %v1635_v15, 2  ;;  %vm1637_vm5 = vcmp.eq.s32.totalorder %v1635_v15, 0  ;;  %vm1640_vm4 = vcmp.eq.s32.totalorder %v1635_v15, 2 }
 0x29a   :  { %6355 = vmatprep.mubr.msk.f32.mxu1 %vm7146_vm2, %v10008_v35  ;;  %6430 = vmatprep.mubr.msk.f32.mxu0 %vm7146_vm2, %v10008_v35  ;;  %v1639_v6 = vsel %vm1637_vm5, %v10050_v44, %v1638_v12  ;;  %v1642_v27 = vsel %vm1640_vm4, %v1641_v17, %v10049_v7  ;;  %v1744_v61 = vxor.u32 2147483648, %v8766_v26  ;;  %v3514_v23 = vadd.s32 3, %v10053_v3 }
 0x29b   :  { %vm3412_vm0 = vcmp.lt.s32.totalorder %v3411_v30, 2  ;;  %vm3413_vm12 = vcmp.eq.s32.totalorder %v3411_v30, 0  ;;  %vm3416_vm10 = vcmp.eq.s32.totalorder %v3411_v30, 2  ;;  %v1643_v39 = vsel %vm1636_vm3, %v1639_v6, %v1642_v27  ;;  %v4297_v27 = vld [vmem:[%s9820_s7 + $0x20] sm:$0xff] }
 0x29c   :  { %v3415_v25 = vsel %vm3413_vm12, %v10050_v44, %v1638_v12  ;;  %v3418_v51 = vsel %vm3416_vm10, %v1641_v17, %v10049_v7  ;;  %v1644_v2 = vsel %vm1634_vm15, nan, %v1643_v39  ;;  %v3515_v50 = vand.u32 3, %v3514_v23  ;;  %v4293_v17 = vld [vmem:[%s9820_s7] sm:$0xff] }
 0x29d   :  { %v3419_v28 = vsel %vm3412_vm0, %v3415_v25, %v3418_v51  ;;  %6431 = vmatmul.mubr.msk.f32.gmra.mrb[58].mxu0 %vm3849_vm6, %v1644_v2  ;;  %vm1737_vm9 = vweird.f32 %v7811_v56  ;;  %v1738_v36 = vand.u32 3, %v10053_v3  ;;  %v1844_v18 = vxor.u32 2147483648, %v8931_v5 }
 0x29e   :  { %v3420_v11 = vsel %vm1634_vm15, nan, %v3419_v28  ;;  %6433 = vmatprep.mubr.msk.f32.mxu0 %vm7146_vm2, %v10008_v35  ;;  %vm3516_vm11 = vcmp.lt.s32.totalorder %v3515_v50, 2  ;;  %vm3517_vm13 = vcmp.eq.s32.totalorder %v3515_v50, 0  ;;  %vm3520_vm7 = vcmp.eq.s32.totalorder %v3515_v50, 2 }
 0x29f   :  { %6356 = vmatmul.mubr.msk.f32.gmra.mrb[24].mxu1 %vm3849_vm6, %v3420_v11  ;;  %v3519_v32 = vsel %vm3517_vm13, %v8766_v26, %v1741_v21  ;;  %v3522_v43 = vsel %vm3520_vm7, %v1744_v61, %v8861_v59  ;;  %vm1739_vm14 = vcmp.lt.s32.totalorder %v1738_v36, 2  ;;  %vm1740_vm1 = vcmp.eq.s32.totalorder %v1738_v36, 0 }
 0x2a0   :  { %6358 = vmatprep.mubr.msk.f32.mxu1 %vm7146_vm2, %v10008_v35  ;;  %v3523_v45 = vsel %vm3516_vm11, %v3519_v32, %v3522_v43  ;;  %v1742_v41 = vsel %vm1740_vm1, %v8766_v26, %v1741_v21  ;;  %vm1743_vm15 = vcmp.eq.s32.totalorder %v1738_v36, 2  ;;  %v1847_v37 = vxor.u32 2147483648, %v8914_v8 }
 0x2a1   :  { %v3524_v42 = vsel %vm1737_vm9, nan, %v3523_v45  ;;  %v1745_v22 = vsel %vm1743_vm15, %v1744_v61, %v8861_v59  ;;  %v3618_v47 = vadd.s32 3, %v8732_v48  ;;  %v1841_v4 = vand.u32 3, %v8732_v48  ;;  %v4298_v61 = vld [vmem:[%s9820_s7 + $0x28] sm:$0xff] }
 0x2a2   :  { %v1746_v20 = vsel %vm1739_vm14, %v1742_v41, %v1745_v22  ;;  %vm1840_vm3 = vweird.f32 %v7932_v19  ;;  %v1947_v55 = vxor.u32 2147483648, %v9033_v40  ;;  %v1950_v49 = vxor.u32 2147483648, %v8989_v62 }
 0x2a3   :  { %6359 = vmatmul.mubr.msk.f32.gmra.mrb[26].mxu1 %vm3849_vm6, %v3524_v42  ;;  %v1747_v26 = vsel %vm1737_vm9, nan, %v1746_v20  ;;  %v3619_v13 = vand.u32 3, %v3618_v47  ;;  %vm1842_vm5 = vcmp.lt.s32.totalorder %v1841_v4, 2  ;;  %vm1843_vm4 = vcmp.eq.s32.totalorder %v1841_v4, 0 }
 0x2a4   :  { %6434 = vmatmul.mubr.msk.f32.gmra.mrb[60].mxu0 %vm3849_vm6, %v1747_v26  ;;  %6361 = vmatprep.mubr.msk.f32.mxu1 %vm7146_vm2, %v10008_v35  ;;  %v1845_v48 = vsel %vm1843_vm4, %v8914_v8, %v1844_v18  ;;  %vm1846_vm0 = vcmp.eq.s32.totalorder %v1841_v4, 2  ;;  %v3722_v59 = vadd.s32 3, %v8879_v14  ;;  %v1944_v58 = vand.u32 3, %v8879_v14  ;;  %v4766_v26 = vld [vmem:[%s9822_s10] sm:$0xff] }
 0x2a5   :  { %6436 = vmatprep.mubr.msk.f32.mxu0 %vm7146_vm2, %v10008_v35  ;;  %vm3620_vm12 = vcmp.lt.s32.totalorder %v3619_v13, 2  ;;  %vm3621_vm10 = vcmp.eq.s32.totalorder %v3619_v13, 0  ;;  %vm3624_vm9 = vcmp.eq.s32.totalorder %v3619_v13, 2  ;;  %v1848_v56 = vsel %vm1846_vm0, %v1847_v37, %v8931_v5  ;;  %v4767_v13 = vld [vmem:[%s9822_s10 + $0x8] sm:$0xff] }
 0x2a6   :  { %v3623_v52 = vsel %vm3621_vm10, %v8914_v8, %v1844_v18  ;;  %v3626_v33 = vsel %vm3624_vm9, %v1847_v37, %v8931_v5  ;;  %v1849_v9 = vsel %vm1842_vm5, %v1845_v48, %v1848_v56  ;;  %v3723_v38 = vand.u32 3, %v3722_v59  ;;  %v4768_v48 = vld [vmem:[%s9822_s10 + $0x10] sm:$0xff] }
 0x2a7   :  { %v2043_v7 = vsel %vm8976_vm8, 0, %v8925_v29  ;;  %v3627_v12 = vsel %vm3620_vm12, %v3623_v52, %v3626_v33  ;;  %v1850_v14 = vsel %vm1840_vm3, nan, %v1849_v9  ;;  %vm1946_vm11 = vcmp.eq.s32.totalorder %v1944_v58, 0  ;;  %v4305_v36 = vpop.permute.xlu1 %4304  ;;  %v4770_v52 = vld [vmem:[%s9822_s10 + $0x20] sm:$0xff]  ;;  %v4771_v33 = vld [vmem:[%s9822_s10 + $0x28] sm:$0xff] }
 0x2a8   :  { %v3628_v44 = vsel %vm1840_vm3, nan, %v3627_v12  ;;  %6437 = vmatmul.mubr.msk.f32.gmra.mrb[62].mxu0 %vm3849_vm6, %v1850_v14  ;;  %vm3724_vm13 = vcmp.lt.s32.totalorder %v3723_v38, 2  ;;  %vm3725_vm7 = vcmp.eq.s32.totalorder %v3723_v38, 0  ;;  %vm3728_vm14 = vcmp.eq.s32.totalorder %v3723_v38, 2  ;;  %v4772_v38 = vld [vmem:[%s9822_s10 + $0x30] sm:$0xff] }
 0x2a9   :  { %6362 = vmatmul.mubr.msk.f32.gmra.mrb[28].mxu1 %vm3849_vm6, %v3628_v44  ;;  %6439 = vmatprep.mubr.msk.f32.mxu0 %vm7146_vm2, %v10008_v35  ;;  %v3727_v8 = vsel %vm3725_vm7, %v8989_v62, %v1947_v55  ;;  %v3730_v29 = vsel %vm3728_vm14, %v1950_v49, %v9033_v40  ;;  %v1948_v5 = vsel %vm1946_vm11, %v8989_v62, %v1947_v55  ;;  %vm1949_vm8 = vcmp.eq.s32.totalorder %v1944_v58, 2 }
 0x2aa   :  { %6364 = vmatprep.mubr.msk.f32.mxu1 %vm7146_vm2, %v10008_v35  ;;  %vm1943_vm1 = vweird.f32 %v8017_v63  ;;  %v3731_v19 = vsel %vm3724_vm13, %v3727_v8, %v3730_v29  ;;  %vm1945_vm15 = vcmp.lt.s32.totalorder %v1944_v58, 2  ;;  %v1951_v54 = vsel %vm1949_vm8, %v1950_v49, %v9033_v40  ;;  %v4295_v63 = vld [vmem:[%s9820_s7 + $0x10] sm:$0xff]  ;;  %v4296_v40 = vld [vmem:[%s9820_s7 + $0x18] sm:$0xff]  ;;  %v9354_v29 = vld [vmem:[%s9823_s6] ss:$0 sm:$0xff] }
 0x2ab   :  { %v2047_v31 = vand.u32 3, %v2043_v7  ;;  %v3732_v62 = vsel %vm1943_vm1, nan, %v3731_v19  ;;  %v1952_v0 = vsel %vm1945_vm15, %v1948_v5, %v1951_v54  ;;  %v2050_v15 = vxor.u32 2147483648, %v9132_v46  ;;  %v4307_v18 = vpop.permute.xlu1 %4306  ;;  %v4769_v58 = vld [vmem:[%s9822_s10 + $0x18] sm:$0xff] }
 0x2ac   :  { %v1953_v34 = vsel %vm1943_vm1, nan, %v1952_v0  ;;  %v3826_v53 = vadd.s32 3, %v2043_v7  ;;  %v2053_v60 = vxor.u32 2147483648, %v9077_v10  ;;  %v6837_v57 = vpack.c.bf16 %v4294_v1, %v4293_v17  ;;  %v4773_v7 = vld [vmem:[%s9822_s10 + $0x38] sm:$0xff] }
 0x2ad   :  { %6365 = vmatmul.mubr.msk.f32.gmra.mrb[30].mxu1 %vm3849_vm6, %v3732_v62  ;;  %6440 = vmatmul.mubr.msk.f32.gmra.mrb[64].mxu0 %vm3849_vm6, %v1953_v34  ;;  %vm2049_vm3 = vcmp.eq.s32.totalorder %v2047_v31, 0  ;;  %v6840_v30 = vpack.c.bf16 %v4296_v40, %v4295_v63  ;;  %vm2052_vm5 = vcmp.eq.s32.totalorder %v2047_v31, 2  ;;  %vm2046_vm10 = vweird.f32 %v8119_v24  ;;  %v4301_v24 = vpop.permute.xlu0 %4300 }
 0x2ae   :  { %6367 = vmatprep.mubr.msk.f32.mxu1 %vm7146_vm2, %v10008_v35  ;;  %v3827_v21 = vand.u32 3, %v3826_v53  ;;  %6510 = vmatprep.mubr.msk.f32.mxu0 %vm7146_vm2, %v10008_v35  ;;  %v2051_v6 = vsel %vm2049_vm3, %v9077_v10, %v2050_v15  ;;  %v2054_v3 = vsel %vm2052_vm5, %v2053_v60, %v9132_v46  ;;  %vm2048_vm9 = vcmp.lt.s32.totalorder %v2047_v31, 2 }
 0x2af   :  { %6838 = vmatpush3.bf16.msra.mxu0 %v6837_v57  ;;  %v6843_v2 = vpack.c.bf16 %v4298_v61, %v4297_v27  ;;  %v2055_v50 = vsel %vm2048_vm9, %v2051_v6, %v2054_v3  ;;  %vm4369_vm11 = vcmask 1041408   ;;  %vm4334_vm13 = vcmask 15360  }
 0x2b0   :  { %vm3829_vm4 = vcmp.eq.s32.totalorder %v3827_v21, 0  ;;  %vm3832_vm0 = vcmp.eq.s32.totalorder %v3827_v21, 2  ;;  %6839 = vmatprep.subr.bf16.mxu0 %v9937_v16  ;;  %vm3828_vm12 = vcmp.lt.s32.totalorder %v3827_v21, 2  ;;  %v2056_v28 = vsel %vm2046_vm10, nan, %v2055_v50  ;;  %v4311_v32 = vpop.permute.xlu1 %4310 }
 0x2b1   :  { %v3831_v23 = vsel %vm3829_vm4, %v9077_v10, %v2050_v15  ;;  %v3834_v39 = vsel %vm3832_vm0, %v2053_v60, %v9132_v46  ;;  %v4299_v10 = vld [vmem:[%s9821_s8] sm:$0x3]  ;;  %v4303_v46 = vpop.permute.xlu0 %4302  ;;  %v6846_v59 = vpack.c.bf16 %v4767_v13, %v4766_v26  ;;  %v6849_v56 = vpack.c.bf16 %v4769_v58, %v4768_v48 }
 0x2b2   :  { %v3835_v25 = vsel %vm3828_vm12, %v3831_v23, %v3834_v39  ;;  %v6852_v9 = vpack.c.bf16 %v4771_v33, %v4770_v52  ;;  %v6855_v12 = vpack.c.bf16 %v4773_v7, %v4772_v38  ;;  %vm4781_vm7 = vcmask 523264  }
 0x2b3   :  { %v3836_v51 = vsel %vm2046_vm10, nan, %v3835_v25  ;;  %6841 = vmatpush3.bf16.msra.mxu0 %v6840_v30  ;;  %vm5217_vm14 = vcmask 261120  }
 0x2b4   :  { %6368 = vmatmul.mubr.msk.f32.gmra.mrb[32].mxu1 %vm3849_vm6, %v3836_v51  ;;  %6842 = vmatprep.subr.bf16.mxu0 %v9937_v16  ;;  %v4315_v45 = vpop.permute.xlu1 %4314  ;;  %vm9661_vm8 = vmpackc.low %vm5217_vm14, %vm5217_vm14 }
 0x2b5   :  { %6442 = vmatprep.mubr.msk.f32.mxu1 %vm7146_vm2, %v10008_v35  ;;  %v4309_v11 = vpop.permute.xlu0 %4308 }
 0x2b7   :  { %6844 = vmatpush3.bf16.msra.mxu0 %v6843_v2 }
 0x2b8   :  { %6443 = vmatmul.mubr.msk.f32.vlgmr.msra.gmra.mrb[34].mxu1 %vm3849_vm6, %v2056_v28  ;;  %6857 = vmatprep.subr.bf16.mxu0 %v9937_v16  ;;  %v4319_v37 = vpop.permute.xlu1 %4318  ;;  %vm4523_vm6 = vcmask 392192  }
 0x2b9   :  { %6447 = vmatprep.mubr.msk.f32.mxu1 %vm7146_vm2, %v10008_v35  ;;  %6446 = vmatpush3.msk.msra.mxu1 %vm4369_vm11, %v4299_v10  ;;  %v4313_v43 = vpop.permute.xlu0 %4312 }
 0x2ba   :  { %6845 = vmatprep.subr.bf16.mxu1 %v9937_v16 }
 0x2bc   :  { %6448 = vmatmul.mubr.msk.f32.vlgmr.msra.gmra.mrb[36].mxu1 %vm4334_vm13, %v4301_v24 }
 0x2bd   :  { %6450 = vmatprep.mubr.msk.f32.mxu1 %vm7146_vm2, %v10008_v35  ;;  %v4317_v41 = vpop.permute.xlu0 %4316  ;;  %6847 = vmatpush3.bf16.msra.mxu1 %v6846_v59 }
 0x2be   :  { %6848 = vmatprep.subr.bf16.mxu1 %v9937_v16 }
 0x2bf   :  { %v4323_v22 = vpop.permute.xlu1 %4322 }
 0x2c0   :  { %6451 = vmatmul.mubr.msk.f32.gmra.mrb[38].mxu1 %vm4334_vm13, %v4303_v46 }
 0x2c1   :  { %6453 = vmatprep.mubr.msk.f32.mxu1 %vm7146_vm2, %v10008_v35  ;;  %v4321_v42 = vpop.permute.xlu0 %4320  ;;  %6850 = vmatpush3.bf16.msra.mxu1 %v6849_v56 }
 0x2c2   :  { %6851 = vmatprep.subr.bf16.mxu1 %v9937_v16 }
 0x2c3   :  { %v4327_v4 = vpop.permute.xlu1 %4326 }
 0x2c4   :  { %6454 = vmatmul.mubr.msk.f32.gmra.mrb[40].mxu1 %vm4334_vm13, %v4305_v36 }
 0x2c5   :  { %6456 = vmatprep.mubr.msk.f32.mxu1 %vm7146_vm2, %v10008_v35  ;;  %v4325_v47 = vpop.permute.xlu0 %4324  ;;  %6853 = vmatpush3.bf16.msra.mxu1 %v6852_v9 }
 0x2c6   :  { %6854 = vmatprep.subr.bf16.mxu1 %v9937_v16 }
 0x2c7   :  { %v4331_v55 = vpop.permute.xlu1 %4330 }
 0x2c8   :  { %6457 = vmatmul.mubr.msk.f32.gmra.mrb[42].mxu1 %vm4334_vm13, %v4307_v18 }
 0x2c9   :  { %6459 = vmatprep.mubr.msk.f32.mxu1 %vm7146_vm2, %v10008_v35  ;;  %v4329_v20 = vpop.permute.xlu0 %4328  ;;  %6856 = vmatpush3.bf16.msra.mxu1 %v6855_v12 }
 0x2ca   :  { %6869 = vmatprep.subr.bf16.mxu1 %v9937_v16 }
 0x2cc   :  { %6460 = vmatmul.mubr.msk.f32.gmra.mrb[44].mxu1 %vm4334_vm13, %v4309_v11 }
 0x2cd   :  { %6462 = vmatprep.mubr.msk.f32.mxu1 %vm7146_vm2, %v10008_v35  ;;  %v4333_v49 = vpop.permute.xlu0 %4332 }
 0x2d0   :  { %6463 = vmatmul.mubr.msk.f32.gmra.mrb[46].mxu1 %vm4334_vm13, %v4311_v32 }
 0x2d1   :  { %6465 = vmatprep.mubr.msk.f32.mxu1 %vm7146_vm2, %v10008_v35 }
 0x2d4   :  { %6466 = vmatmul.mubr.msk.f32.gmra.mrb[48].mxu1 %vm4334_vm13, %v4313_v43 }
 0x2d5   :  { %6468 = vmatprep.mubr.msk.f32.mxu1 %vm7146_vm2, %v10008_v35 }
 0x2d8   :  { %6469 = vmatmul.mubr.msk.f32.gmra.mrb[50].mxu1 %vm4334_vm13, %v4315_v45 }
 0x2d9   :  { %6471 = vmatprep.mubr.msk.f32.mxu1 %vm7146_vm2, %v10008_v35 }
 0x2dc   :  { %6472 = vmatmul.mubr.msk.f32.gmra.mrb[52].mxu1 %vm4334_vm13, %v4317_v41 }
 0x2dd   :  { %6474 = vmatprep.mubr.msk.f32.mxu1 %vm7146_vm2, %v10008_v35 }
 0x2e0   :  { %6475 = vmatmul.mubr.msk.f32.gmra.mrb[54].mxu1 %vm4334_vm13, %v4319_v37 }
 0x2e1   :  { %6477 = vmatprep.mubr.msk.f32.mxu1 %vm7146_vm2, %v10008_v35 }
 0x2e4   :  { %6478 = vmatmul.mubr.msk.f32.gmra.mrb[56].mxu1 %vm4334_vm13, %v4321_v42 }
 0x2e5   :  { %6480 = vmatprep.mubr.msk.f32.mxu1 %vm7146_vm2, %v10008_v35 }
 0x2e8   :  { %6481 = vmatmul.mubr.msk.f32.gmra.mrb[58].mxu1 %vm4334_vm13, %v4323_v22 }
 0x2e9   :  { %6483 = vmatprep.mubr.msk.f32.mxu1 %vm7146_vm2, %v10008_v35 }
 0x2ec   :  { %6484 = vmatmul.mubr.msk.f32.gmra.mrb[60].mxu1 %vm4334_vm13, %v4325_v47 }
 0x2ed   :  { %6486 = vmatprep.mubr.msk.f32.mxu1 %vm7146_vm2, %v10008_v35 }
 0x2f0   :  { %6487 = vmatmul.mubr.msk.f32.gmra.mrb[62].mxu1 %vm4334_vm13, %v4327_v4 }
 0x2f1   :  { %6489 = vmatprep.mubr.msk.f32.mxu1 %vm7146_vm2, %v10008_v35 }
 0x2f4   :  { %6490 = vmatmul.mubr.msk.f32.gmra.mrb[64].mxu1 %vm4334_vm13, %v4329_v20 }
 0x2f5   :  { %6492 = vmatprep.mubr.msk.f32.mxu1 %vm7146_vm2, %v10008_v35 }
 0x2f8   :  { %6493 = vmatmul.mubr.msk.f32.gmra.mrb[66].mxu1 %vm4334_vm13, %v4331_v55 }
 0x2f9   :  { %6495 = vmatprep.mubr.msk.f32.mxu1 %vm7146_vm2, %v10008_v35 }
 0x2fc   :  { %6496 = vmatmul.mubr.msk.f32.gmra.mrb[68].mxu1 %vm4334_vm13, %v4333_v49 }
 0x2fd   :  { %6577 = vmatprep.mubr.msk.f32.mxu1 %vm7146_vm2, %v10008_v35 }
 0x326   :  { %v4168_v14 = vpop.f32.mrb[34].mxu0 }
 0x327   :  { %v6396_v44 = vpop.f32.mrb[35].mxu0 }
 0x32a   :  { %v3967_v8 = vpop.f32.mrb[0].mxu1 }
 0x32b   :  { %v4169_v5 = vadd.f32 %v4168_v14, %v3967_v8  ;;  %v6321_v19 = vpop.f32.mrb[1].mxu1 }
 0x32d   :  { %v4259_v54 = vadd.f32 %v9354_v29, %v4169_v5 }
 0x32f   :  { %v4276_v17 = vmax.f32 %v4259_v54, 0.0 }
 0x331   :  { %6511 = vmatmul.mubr.msk.f32.vlgmr.msra.gmra.mrb[66].mxu0 %vm4523_vm6, %v4276_v17 }
 0x332   :  { %v3972_v1 = vpop.f32.mrb[2].mxu1  ;;  %6513 = vmatprep.mubr.msk.f32.mxu0 %vm7146_vm2, %v10008_v35 }
 0x333   :  { %v4173_v31 = vpop.f32.mrb[36].mxu0  ;;  %v6324_v62 = vpop.f32.mrb[3].mxu1 }
 0x334   :  { %v4174_v0 = vadd.f32 %v4173_v31, %v3972_v1  ;;  %v6399_v34 = vpop.f32.mrb[37].mxu0 }
 0x336   :  { %v4260_v15 = vadd.f32 %v9354_v29, %v4174_v0 }
 0x338   :  { %v4277_v53 = vmax.f32 %v4260_v15, 0.0 }
 0x339   :  { %v3977_v63 = vpop.f32.mrb[4].mxu1 }
 0x33a   :  { %v6327_v40 = vpop.f32.mrb[5].mxu1  ;;  %6514 = vmatmul.mubr.msk.f32.gmra.mrb[68].mxu0 %vm4523_vm6, %v4277_v53 }
 0x33b   :  { %6516 = vmatprep.mubr.msk.f32.mxu0 %vm7146_vm2, %v10008_v35 }
 0x33d   :  { %v4178_v60 = vpop.f32.mrb[38].mxu0 }
 0x33e   :  { %v4179_v57 = vadd.f32 %v4178_v60, %v3977_v63  ;;  %v6402_v21 = vpop.f32.mrb[39].mxu0 }
 0x340   :  { %v4261_v30 = vadd.f32 %v9354_v29, %v4179_v57 }
 0x341   :  { %v4183_v61 = vpop.f32.mrb[40].mxu0 }
 0x342   :  { %v4278_v6 = vmax.f32 %v4261_v30, 0.0  ;;  %v3982_v27 = vpop.f32.mrb[6].mxu1  ;;  %v6405_v39 = vpop.f32.mrb[41].mxu0 }
 0x343   :  { %v4184_v3 = vadd.f32 %v4183_v61, %v3982_v27  ;;  %v6330_v23 = vpop.f32.mrb[7].mxu1 }
 0x344   :  { %6517 = vmatmul.mubr.msk.f32.gmra.mrb[70].mxu0 %vm4523_vm6, %v4278_v6 }
 0x345   :  { %v4262_v25 = vadd.f32 %v9354_v29, %v4184_v3  ;;  %6519 = vmatprep.mubr.msk.f32.mxu0 %vm7146_vm2, %v10008_v35 }
 0x347   :  { %v4279_v51 = vmax.f32 %v4262_v25, 0.0 }
 0x348   :  { %v3987_v2 = vpop.f32.mrb[8].mxu1  ;;  %v4188_v50 = vpop.f32.mrb[42].mxu0 }
 0x349   :  { %v4189_v28 = vadd.f32 %v4188_v50, %v3987_v2  ;;  %v6333_v24 = vpop.f32.mrb[9].mxu1  ;;  %v6408_v10 = vpop.f32.mrb[43].mxu0  ;;  %6520 = vmatmul.mubr.msk.f32.gmra.mrb[72].mxu0 %vm4523_vm6, %v4279_v51 }
 0x34a   :  { %6522 = vmatprep.mubr.msk.f32.mxu0 %vm7146_vm2, %v10008_v35 }
 0x34b   :  { %v4263_v46 = vadd.f32 %v9354_v29, %v4189_v28 }
 0x34d   :  { %v4280_v36 = vmax.f32 %v4263_v46, 0.0 }
 0x34e   :  { %v3992_v18 = vpop.f32.mrb[10].mxu1  ;;  %v4193_v11 = vpop.f32.mrb[44].mxu0 }
 0x34f   :  { %v4194_v32 = vadd.f32 %v4193_v11, %v3992_v18  ;;  %v6336_v43 = vpop.f32.mrb[11].mxu1  ;;  %v6411_v45 = vpop.f32.mrb[45].mxu0  ;;  %6523 = vmatmul.mubr.msk.f32.gmra.mrb[74].mxu0 %vm4523_vm6, %v4280_v36 }
 0x350   :  { %6525 = vmatprep.mubr.msk.f32.mxu0 %vm7146_vm2, %v10008_v35 }
 0x351   :  { %v4264_v41 = vadd.f32 %v9354_v29, %v4194_v32 }
 0x352   :  { %v4198_v37 = vpop.f32.mrb[46].mxu0 }
 0x353   :  { %v4281_v42 = vmax.f32 %v4264_v41, 0.0  ;;  %v6414_v22 = vpop.f32.mrb[47].mxu0 }
 0x354   :  { %v3997_v47 = vpop.f32.mrb[12].mxu1 }
 0x355   :  { %v4199_v4 = vadd.f32 %v4198_v37, %v3997_v47  ;;  %v6339_v20 = vpop.f32.mrb[13].mxu1  ;;  %6526 = vmatmul.mubr.msk.f32.gmra.mrb[76].mxu0 %vm4523_vm6, %v4281_v42 }
 0x356   :  { %6528 = vmatprep.mubr.msk.f32.mxu0 %vm7146_vm2, %v10008_v35 }
 0x357   :  { %v4265_v55 = vadd.f32 %v9354_v29, %v4199_v4 }
 0x358   :  { %v4002_v49 = vpop.f32.mrb[14].mxu1 }
 0x359   :  { %v4282_v26 = vmax.f32 %v4265_v55, 0.0  ;;  %v4203_v13 = vpop.f32.mrb[48].mxu0  ;;  %v6342_v48 = vpop.f32.mrb[15].mxu1 }
 0x35a   :  { %v4204_v59 = vadd.f32 %v4203_v13, %v4002_v49  ;;  %v6417_v58 = vpop.f32.mrb[49].mxu0 }
 0x35b   :  { %6529 = vmatmul.mubr.msk.f32.gmra.mrb[78].mxu0 %vm4523_vm6, %v4282_v26 }
 0x35c   :  { %v4266_v56 = vadd.f32 %v9354_v29, %v4204_v59  ;;  %6531 = vmatprep.mubr.msk.f32.mxu0 %vm7146_vm2, %v10008_v35 }
 0x35d   :  { %v4208_v52 = vpop.f32.mrb[50].mxu0 }
 0x35e   :  { %v4283_v33 = vmax.f32 %v4266_v56, 0.0  ;;  %v4007_v9 = vpop.f32.mrb[16].mxu1  ;;  %v6420_v38 = vpop.f32.mrb[51].mxu0 }
 0x35f   :  { %v4209_v7 = vadd.f32 %v4208_v52, %v4007_v9  ;;  %v6345_v12 = vpop.f32.mrb[17].mxu1 }
 0x360   :  { %6532 = vmatmul.mubr.msk.f32.gmra.mrb[80].mxu0 %vm4523_vm6, %v4283_v33 }
 0x361   :  { %v4267_v14 = vadd.f32 %v9354_v29, %v4209_v7  ;;  %6534 = vmatprep.mubr.msk.f32.mxu0 %vm7146_vm2, %v10008_v35 }
 0x362   :  { %v4012_v44 = vpop.f32.mrb[18].mxu1  ;;  %v4213_v8 = vpop.f32.mrb[52].mxu0 }
 0x363   :  { %v4284_v5 = vmax.f32 %v4267_v14, 0.0  ;;  %v4214_v19 = vadd.f32 %v4213_v8, %v4012_v44  ;;  %v6348_v54 = vpop.f32.mrb[19].mxu1  ;;  %v6423_v17 = vpop.f32.mrb[53].mxu0 }
 0x365   :  { %v4268_v1 = vadd.f32 %v9354_v29, %v4214_v19  ;;  %6535 = vmatmul.mubr.msk.f32.gmra.mrb[82].mxu0 %vm4523_vm6, %v4284_v5 }
 0x366   :  { %6537 = vmatprep.mubr.msk.f32.mxu0 %vm7146_vm2, %v10008_v35 }
 0x367   :  { %v4285_v31 = vmax.f32 %v4268_v1, 0.0 }
 0x368   :  { %v4017_v62 = vpop.f32.mrb[20].mxu1  ;;  %v4218_v0 = vpop.f32.mrb[54].mxu0 }
 0x369   :  { %v4219_v34 = vadd.f32 %v4218_v0, %v4017_v62  ;;  %v6351_v15 = vpop.f32.mrb[21].mxu1  ;;  %v6426_v53 = vpop.f32.mrb[55].mxu0  ;;  %6538 = vmatmul.mubr.msk.f32.gmra.mrb[84].mxu0 %vm4523_vm6, %v4285_v31 }
 0x36a   :  { %6540 = vmatprep.mubr.msk.f32.mxu0 %vm7146_vm2, %v10008_v35 }
 0x36b   :  { %v4269_v63 = vadd.f32 %v9354_v29, %v4219_v34 }
 0x36c   :  { %v4022_v40 = vpop.f32.mrb[22].mxu1  ;;  %v4223_v60 = vpop.f32.mrb[56].mxu0 }
 0x36d   :  { %v4286_v57 = vmax.f32 %v4269_v63, 0.0  ;;  %v4224_v21 = vadd.f32 %v4223_v60, %v4022_v40  ;;  %v6354_v30 = vpop.f32.mrb[23].mxu1  ;;  %v6429_v6 = vpop.f32.mrb[57].mxu0 }
 0x36f   :  { %v4270_v27 = vadd.f32 %v9354_v29, %v4224_v21  ;;  %6541 = vmatmul.mubr.msk.f32.gmra.mrb[86].mxu0 %vm4523_vm6, %v4286_v57 }
 0x370   :  { %v4228_v61 = vpop.f32.mrb[58].mxu0  ;;  %6543 = vmatprep.mubr.msk.f32.mxu0 %vm7146_vm2, %v10008_v35 }
 0x371   :  { %v4287_v3 = vmax.f32 %v4270_v27, 0.0  ;;  %v6432_v23 = vpop.f32.mrb[59].mxu0 }
 0x372   :  { %v4027_v39 = vpop.f32.mrb[24].mxu1 }
 0x373   :  { %v4229_v25 = vadd.f32 %v4228_v61, %v4027_v39  ;;  %v6357_v51 = vpop.f32.mrb[25].mxu1  ;;  %6544 = vmatmul.mubr.msk.f32.gmra.mrb[88].mxu0 %vm4523_vm6, %v4287_v3 }
 0x374   :  { %6546 = vmatprep.mubr.msk.f32.mxu0 %vm7146_vm2, %v10008_v35 }
 0x375   :  { %v4271_v2 = vadd.f32 %v9354_v29, %v4229_v25 }
 0x376   :  { %v4032_v50 = vpop.f32.mrb[26].mxu1 }
 0x377   :  { %v4288_v28 = vmax.f32 %v4271_v2, 0.0  ;;  %v4233_v24 = vpop.f32.mrb[60].mxu0  ;;  %v6360_v10 = vpop.f32.mrb[27].mxu1 }
 0x378   :  { %v4234_v46 = vadd.f32 %v4233_v24, %v4032_v50  ;;  %v6435_v36 = vpop.f32.mrb[61].mxu0  ;;  %v5001_v24 = vld [vmem:[%s9824_s12 + $0x8] sm:$0xff]  ;;  %v5002_v10 = vld [vmem:[%s9824_s12 + $0x10] sm:$0xff] }
 0x379   :  { %6547 = vmatmul.mubr.msk.f32.gmra.mrb[90].mxu0 %vm4523_vm6, %v4288_v28  ;;  %v5000_v28 = vld [vmem:[%s9824_s12] sm:$0xff]  ;;  %v5003_v36 = vld [vmem:[%s9824_s12 + $0x18] sm:$0xff] }
 0x37a   :  { %v4272_v18 = vadd.f32 %v9354_v29, %v4234_v46  ;;  %6549 = vmatprep.mubr.msk.f32.mxu0 %vm7146_vm2, %v10008_v35  ;;  %v6858_v46 = vpack.c.bf16 %v5001_v24, %v5000_v28 }
 0x37b   :  { %v4238_v11 = vpop.f32.mrb[62].mxu0 }
 0x37c   :  { %v4289_v32 = vmax.f32 %v4272_v18, 0.0  ;;  %v4037_v43 = vpop.f32.mrb[28].mxu1  ;;  %v6438_v45 = vpop.f32.mrb[63].mxu0  ;;  %6859 = vmatpush3.bf16.msra.mxu0 %v6858_v46  ;;  %v6861_v18 = vpack.c.bf16 %v5003_v36, %v5002_v10 }
 0x37d   :  { %v4239_v41 = vadd.f32 %v4238_v11, %v4037_v43  ;;  %v6363_v37 = vpop.f32.mrb[29].mxu1  ;;  %6860 = vmatprep.subr.bf16.mxu0 %v9937_v16  ;;  %v5004_v11 = vld [vmem:[%s9824_s12 + $0x20] sm:$0xff]  ;;  %v5006_v45 = vld [vmem:[%s9824_s12 + $0x30] sm:$0xff] }
 0x37e   :  { %6550 = vmatmul.mubr.msk.f32.gmra.mrb[92].mxu0 %vm4523_vm6, %v4289_v32  ;;  %v5005_v32 = vld [vmem:[%s9824_s12 + $0x28] sm:$0xff] }
 0x37f   :  { %v4273_v42 = vadd.f32 %v9354_v29, %v4239_v41  ;;  %6552 = vmatprep.mubr.msk.f32.mxu0 %vm7146_vm2, %v10008_v35  ;;  %v6864_v43 = vpack.c.bf16 %v5005_v32, %v5004_v11  ;;  %v5007_v41 = vld [vmem:[%s9824_s12 + $0x38] sm:$0xff] }
 0x380   :  { %v4042_v22 = vpop.f32.mrb[30].mxu1  ;;  %v4243_v47 = vpop.f32.mrb[64].mxu0  ;;  %6862 = vmatpush3.bf16.msra.mxu0 %v6861_v18  ;;  %v6867_v37 = vpack.c.bf16 %v5007_v41, %v5006_v45 }
 0x381   :  { %v4290_v4 = vmax.f32 %v4273_v42, 0.0  ;;  %v4244_v20 = vadd.f32 %v4243_v47, %v4042_v22  ;;  %v6366_v55 = vpop.f32.mrb[31].mxu1  ;;  %v6441_v49 = vpop.f32.mrb[65].mxu0  ;;  %6863 = vmatprep.subr.bf16.mxu0 %v9937_v16  ;;  %v9487_v22 = vld [vmem:[%s9825_s9] ss:$0 sm:$0xff] }
 0x383   :  { %v4274_v26 = vadd.f32 %v9354_v29, %v4244_v20  ;;  %6553 = vmatmul.mubr.msk.f32.gmra.mrb[94].mxu0 %vm4523_vm6, %v4290_v4 }
 0x384   :  { %6555 = vmatprep.mubr.msk.f32.mxu0 %vm7146_vm2, %v10008_v35  ;;  %6865 = vmatpush3.bf16.msra.mxu0 %v6864_v43 }
 0x385   :  { %v4291_v13 = vmax.f32 %v4274_v26, 0.0  ;;  %6866 = vmatprep.subr.bf16.mxu0 %v9937_v16 }
 0x387   :  { %v4047_v48 = vpop.f32.mrb[32].mxu1  ;;  %6556 = vmatmul.mubr.msk.f32.gmra.mrb[96].mxu0 %vm4523_vm6, %v4291_v13 }
 0x388   :  { %v6369_v59 = vpop.f32.mrb[33].mxu1  ;;  %6558 = vmatprep.mubr.msk.f32.mxu0 %vm7146_vm2, %v10008_v35  ;;  %6868 = vmatpush3.bf16.msra.mxu0 %v6867_v37 }
 0x389   :  { %6901 = vmatprep.subr.bf16.mxu0 %v9937_v16 }
 0x38b   :  { %v4248_v58 = vpop.f32.mrb[34].mxu1 }
 0x38c   :  { %v4249_v56 = vadd.f32 %v4248_v58, %v4047_v48  ;;  %v6444_v52 = vpop.f32.mrb[35].mxu1 }
 0x38e   :  { %v4275_v33 = vadd.f32 %v9354_v29, %v4249_v56 }
 0x38f   :  { %v4439_v9 = vpop.f32.mrb[36].mxu1 }
 0x390   :  { %v4292_v38 = vmax.f32 %v4275_v33, 0.0  ;;  %v6449_v7 = vpop.f32.mrb[37].mxu1 }
 0x392   :  { %6559 = vmatmul.mubr.msk.f32.gmra.mrb[98].mxu0 %vm4523_vm6, %v4292_v38 }
 0x393   :  { %6644 = vmatprep.mubr.msk.f32.mxu0 %vm7146_vm2, %v10008_v35  ;;  %v9424_v12 = vpop.f32.mrb[38].mxu1 }
 0x394   :  { %v6452_v14 = vpop.f32.mrb[39].mxu1 }
 0x397   :  { %v9426_v44 = vpop.f32.mrb[40].mxu1 }
 0x398   :  { %v6455_v8 = vpop.f32.mrb[41].mxu1 }
 0x39b   :  { %v9428_v5 = vpop.f32.mrb[42].mxu1 }
 0x39c   :  { %v6458_v19 = vpop.f32.mrb[43].mxu1 }
 0x39f   :  { %v9430_v54 = vpop.f32.mrb[44].mxu1 }
 0x3a0   :  { %v6461_v29 = vpop.f32.mrb[45].mxu1 }
 0x3a3   :  { %v9432_v17 = vpop.f32.mrb[46].mxu1 }
 0x3a4   :  { %v6464_v1 = vpop.f32.mrb[47].mxu1 }
 0x3a7   :  { %v9434_v31 = vpop.f32.mrb[48].mxu1 }
 0x3a8   :  { %v6467_v62 = vpop.f32.mrb[49].mxu1 }
 0x3ab   :  { %v9436_v0 = vpop.f32.mrb[50].mxu1 }
 0x3ac   :  { %v6470_v34 = vpop.f32.mrb[51].mxu1 }
 0x3af   :  { %v9438_v15 = vpop.f32.mrb[52].mxu1 }
 0x3b0   :  { %v6473_v53 = vpop.f32.mrb[53].mxu1 }
 0x3b3   :  { %v9440_v63 = vpop.f32.mrb[54].mxu1 }
 0x3b4   :  { %v6476_v40 = vpop.f32.mrb[55].mxu1 }
 0x3b7   :  { %v9442_v60 = vpop.f32.mrb[56].mxu1 }
 0x3b8   :  { %v6479_v57 = vpop.f32.mrb[57].mxu1 }
 0x3bb   :  { %v9444_v21 = vpop.f32.mrb[58].mxu1 }
 0x3bc   :  { %v6482_v30 = vpop.f32.mrb[59].mxu1 }
 0x3bf   :  { %v9446_v6 = vpop.f32.mrb[60].mxu1 }
 0x3c0   :  { %v6485_v27 = vpop.f32.mrb[61].mxu1 }
 0x3c3   :  { %v9448_v61 = vpop.f32.mrb[62].mxu1 }
 0x3c4   :  { %v6488_v3 = vpop.f32.mrb[63].mxu1 }
 0x3c7   :  { %v9450_v23 = vpop.f32.mrb[64].mxu1 }
 0x3c8   :  { %v6491_v39 = vpop.f32.mrb[65].mxu1 }
 0x3cb   :  { %v9452_v25 = vpop.f32.mrb[66].mxu1 }
 0x3cc   :  { %v6494_v51 = vpop.f32.mrb[67].mxu1 }
 0x3cf   :  { %v9454_v2 = vpop.f32.mrb[68].mxu1 }
 0x3d0   :  { %v6497_v50 = vpop.f32.mrb[69].mxu1 }
 0x404   :  { %v4641_v42 = vpop.f32.mrb[66].mxu0 }
 0x405   :  { %v4642_v47 = vadd.f32 %v4641_v42, %v4439_v9  ;;  %v6512_v4 = vpop.f32.mrb[67].mxu0 }
 0x407   :  { %v4732_v20 = vadd.f32 %v9487_v22, %v4642_v47 }
 0x409   :  { %v4749_v55 = vmax.f32 %v4732_v20, 0.0 }
 0x40b   :  { %6578 = vmatmul.mubr.msk.f32.vlgmr.msra.gmra.mrb[70].mxu1 %vm4781_vm7, %v4749_v55 }
 0x40c   :  { %6580 = vmatprep.mubr.msk.f32.mxu1 %vm7146_vm2, %v10008_v35 }
 0x40d   :  { %v4646_v49 = vpop.f32.mrb[68].mxu0 }
 0x40e   :  { %v4647_v26 = vadd.f32 %v4646_v49, %v9424_v12  ;;  %v6515_v13 = vpop.f32.mrb[69].mxu0 }
 0x410   :  { %v4733_v48 = vadd.f32 %v9487_v22, %v4647_v26 }
 0x412   :  { %v4750_v59 = vmax.f32 %v4733_v48, 0.0 }
 0x414   :  { %6581 = vmatmul.mubr.msk.f32.gmra.mrb[72].mxu1 %vm4781_vm7, %v4750_v59 }
 0x415   :  { %6583 = vmatprep.mubr.msk.f32.mxu1 %vm7146_vm2, %v10008_v35 }
 0x417   :  { %v4651_v58 = vpop.f32.mrb[70].mxu0 }
 0x418   :  { %v4652_v56 = vadd.f32 %v4651_v58, %v9426_v44  ;;  %v6518_v52 = vpop.f32.mrb[71].mxu0 }
 0x41a   :  { %v4734_v33 = vadd.f32 %v9487_v22, %v4652_v56 }
 0x41c   :  { %v4751_v9 = vmax.f32 %v4734_v33, 0.0  ;;  %v4656_v38 = vpop.f32.mrb[72].mxu0 }
 0x41d   :  { %v4657_v7 = vadd.f32 %v4656_v38, %v9428_v5  ;;  %v6521_v12 = vpop.f32.mrb[73].mxu0 }
 0x41e   :  { %6584 = vmatmul.mubr.msk.f32.gmra.mrb[74].mxu1 %vm4781_vm7, %v4751_v9 }
 0x41f   :  { %v4735_v14 = vadd.f32 %v9487_v22, %v4657_v7  ;;  %6586 = vmatprep.mubr.msk.f32.mxu1 %vm7146_vm2, %v10008_v35 }
 0x421   :  { %v4752_v8 = vmax.f32 %v4735_v14, 0.0 }
 0x422   :  { %v4661_v19 = vpop.f32.mrb[74].mxu0 }
 0x423   :  { %v4662_v29 = vadd.f32 %v4661_v19, %v9430_v54  ;;  %v6524_v44 = vpop.f32.mrb[75].mxu0  ;;  %6587 = vmatmul.mubr.msk.f32.gmra.mrb[76].mxu1 %vm4781_vm7, %v4752_v8 }
 0x424   :  { %6589 = vmatprep.mubr.msk.f32.mxu1 %vm7146_vm2, %v10008_v35 }
 0x425   :  { %v4736_v5 = vadd.f32 %v9487_v22, %v4662_v29 }
 0x427   :  { %v4753_v1 = vmax.f32 %v4736_v5, 0.0 }
 0x428   :  { %v4666_v62 = vpop.f32.mrb[76].mxu0 }
 0x429   :  { %v4667_v34 = vadd.f32 %v4666_v62, %v9432_v17  ;;  %v6527_v53 = vpop.f32.mrb[77].mxu0  ;;  %6590 = vmatmul.mubr.msk.f32.gmra.mrb[78].mxu1 %vm4781_vm7, %v4753_v1  ;;  %v9576_v62 = vld [vmem:[%s9826_s11] ss:$0 sm:$0xff] }
 0x42a   :  { %6592 = vmatprep.mubr.msk.f32.mxu1 %vm7146_vm2, %v10008_v35 }
 0x42b   :  { %v4737_v54 = vadd.f32 %v9487_v22, %v4667_v34 }
 0x42d   :  { %v4754_v40 = vmax.f32 %v4737_v54, 0.0 }
 0x42e   :  { %v4671_v57 = vpop.f32.mrb[78].mxu0 }
 0x42f   :  { %v4672_v30 = vadd.f32 %v4671_v57, %v9434_v31  ;;  %v6530_v27 = vpop.f32.mrb[79].mxu0  ;;  %6593 = vmatmul.mubr.msk.f32.gmra.mrb[80].mxu1 %vm4781_vm7, %v4754_v40 }
 0x430   :  { %6595 = vmatprep.mubr.msk.f32.mxu1 %vm7146_vm2, %v10008_v35 }
 0x431   :  { %v4738_v17 = vadd.f32 %v9487_v22, %v4672_v30 }
 0x433   :  { %v4755_v3 = vmax.f32 %v4738_v17, 0.0  ;;  %v4676_v39 = vpop.f32.mrb[80].mxu0 }
 0x434   :  { %v4677_v51 = vadd.f32 %v4676_v39, %v9436_v0  ;;  %v6533_v50 = vpop.f32.mrb[81].mxu0 }
 0x435   :  { %6596 = vmatmul.mubr.msk.f32.gmra.mrb[82].mxu1 %vm4781_vm7, %v4755_v3 }
 0x436   :  { %v4739_v28 = vadd.f32 %v9487_v22, %v4677_v51  ;;  %6598 = vmatprep.mubr.msk.f32.mxu1 %vm7146_vm2, %v10008_v35 }
 0x438   :  { %v4756_v31 = vmax.f32 %v4739_v28, 0.0  ;;  %v4681_v24 = vpop.f32.mrb[82].mxu0 }
 0x439   :  { %v4682_v10 = vadd.f32 %v4681_v24, %v9438_v15  ;;  %v6536_v46 = vpop.f32.mrb[83].mxu0 }
 0x43a   :  { %6599 = vmatmul.mubr.msk.f32.gmra.mrb[84].mxu1 %vm4781_vm7, %v4756_v31 }
 0x43b   :  { %v4740_v36 = vadd.f32 %v9487_v22, %v4682_v10  ;;  %6601 = vmatprep.mubr.msk.f32.mxu1 %vm7146_vm2, %v10008_v35 }
 0x43c   :  { %v4686_v0 = vpop.f32.mrb[84].mxu0 }
 0x43d   :  { %v4757_v18 = vmax.f32 %v4740_v36, 0.0  ;;  %v4687_v11 = vadd.f32 %v4686_v0, %v9440_v63  ;;  %v6539_v32 = vpop.f32.mrb[85].mxu0 }
 0x43f   :  { %v4741_v43 = vadd.f32 %v9487_v22, %v4687_v11  ;;  %6602 = vmatmul.mubr.msk.f32.gmra.mrb[86].mxu1 %vm4781_vm7, %v4757_v18 }
 0x440   :  { %6604 = vmatprep.mubr.msk.f32.mxu1 %vm7146_vm2, %v10008_v35 }
 0x441   :  { %v4758_v15 = vmax.f32 %v4741_v43, 0.0 }
 0x442   :  { %v4691_v45 = vpop.f32.mrb[86].mxu0 }
 0x443   :  { %v4692_v41 = vadd.f32 %v4691_v45, %v9442_v60  ;;  %v6542_v37 = vpop.f32.mrb[87].mxu0  ;;  %6605 = vmatmul.mubr.msk.f32.gmra.mrb[88].mxu1 %vm4781_vm7, %v4758_v15 }
 0x444   :  { %6607 = vmatprep.mubr.msk.f32.mxu1 %vm7146_vm2, %v10008_v35 }
 0x445   :  { %v4742_v63 = vadd.f32 %v9487_v22, %v4692_v41 }
 0x446   :  { %v4696_v42 = vpop.f32.mrb[88].mxu0 }
 0x447   :  { %v4759_v47 = vmax.f32 %v4742_v63, 0.0  ;;  %v4697_v4 = vadd.f32 %v4696_v42, %v9444_v21  ;;  %v6545_v20 = vpop.f32.mrb[89].mxu0 }
 0x449   :  { %v4743_v55 = vadd.f32 %v9487_v22, %v4697_v4  ;;  %6608 = vmatmul.mubr.msk.f32.gmra.mrb[90].mxu1 %vm4781_vm7, %v4759_v47 }
 0x44a   :  { %6610 = vmatprep.mubr.msk.f32.mxu1 %vm7146_vm2, %v10008_v35 }
 0x44b   :  { %v4760_v60 = vmax.f32 %v4743_v55, 0.0 }
 0x44c   :  { %v4701_v49 = vpop.f32.mrb[90].mxu0 }
 0x44d   :  { %v4702_v26 = vadd.f32 %v4701_v49, %v9446_v6  ;;  %v6548_v13 = vpop.f32.mrb[91].mxu0  ;;  %6611 = vmatmul.mubr.msk.f32.gmra.mrb[92].mxu1 %vm4781_vm7, %v4760_v60 }
 0x44e   :  { %6613 = vmatprep.mubr.msk.f32.mxu1 %vm7146_vm2, %v10008_v35 }
 0x44f   :  { %v4744_v21 = vadd.f32 %v9487_v22, %v4702_v26 }
 0x451   :  { %v4761_v48 = vmax.f32 %v4744_v21, 0.0  ;;  %v4706_v59 = vpop.f32.mrb[92].mxu0 }
 0x452   :  { %v4707_v58 = vadd.f32 %v4706_v59, %v9448_v61  ;;  %v6551_v56 = vpop.f32.mrb[93].mxu0 }
 0x453   :  { %6614 = vmatmul.mubr.msk.f32.gmra.mrb[94].mxu1 %vm4781_vm7, %v4761_v48 }
 0x454   :  { %v4745_v52 = vadd.f32 %v9487_v22, %v4707_v58  ;;  %6616 = vmatprep.mubr.msk.f32.mxu1 %vm7146_vm2, %v10008_v35 }
 0x456   :  { %v4762_v6 = vmax.f32 %v4745_v52, 0.0  ;;  %v4711_v33 = vpop.f32.mrb[94].mxu0 }
 0x457   :  { %v4712_v9 = vadd.f32 %v4711_v33, %v9450_v23  ;;  %v6554_v38 = vpop.f32.mrb[95].mxu0 }
 0x458   :  { %6617 = vmatmul.mubr.msk.f32.gmra.mrb[96].mxu1 %vm4781_vm7, %v4762_v6 }
 0x459   :  { %v4746_v7 = vadd.f32 %v9487_v22, %v4712_v9  ;;  %6619 = vmatprep.mubr.msk.f32.mxu1 %vm7146_vm2, %v10008_v35 }
 0x45a   :  { %v4716_v61 = vpop.f32.mrb[96].mxu0 }
 0x45b   :  { %v4763_v12 = vmax.f32 %v4746_v7, 0.0  ;;  %v4717_v14 = vadd.f32 %v4716_v61, %v9452_v25  ;;  %v6557_v8 = vpop.f32.mrb[97].mxu0 }
 0x45d   :  { %v4747_v19 = vadd.f32 %v9487_v22, %v4717_v14  ;;  %6620 = vmatmul.mubr.msk.f32.gmra.mrb[98].mxu1 %vm4781_vm7, %v4763_v12 }
 0x45e   :  { %6622 = vmatprep.mubr.msk.f32.mxu1 %vm7146_vm2, %v10008_v35 }
 0x45f   :  { %v4764_v23 = vmax.f32 %v4747_v19, 0.0 }
 0x461   :  { %6623 = vmatmul.mubr.msk.f32.gmra.mrb[100].mxu1 %vm4781_vm7, %v4764_v23 }
 0x462   :  { %6625 = vmatprep.mubr.msk.f32.mxu1 %vm7146_vm2, %v10008_v35 }
 0x465   :  { %v4721_v29 = vpop.f32.mrb[98].mxu0 }
 0x466   :  { %v4722_v44 = vadd.f32 %v4721_v29, %v9454_v2  ;;  %v6560_v5 = vpop.f32.mrb[99].mxu0 }
 0x468   :  { %v4748_v25 = vadd.f32 %v9487_v22, %v4722_v44 }
 0x46a   :  { %v4765_v1 = vmax.f32 %v4748_v25, 0.0 }
 0x46c   :  { %6626 = vmatmul.mubr.msk.f32.gmra.mrb[102].mxu1 %vm4781_vm7, %v4765_v1 }
 0x46d   :  { %6727 = vmatprep.mubr.msk.f32.mxu1 %vm7146_vm2, %v10008_v35 }
 0x4de   :  { %v4899_v34 = vpop.f32.mrb[70].mxu1 }
 0x4df   :  { %v4900_v53 = vadd.f32 %v9576_v62, %v4899_v34  ;;  %v6579_v54 = vpop.f32.mrb[71].mxu1 }
 0x4e1   :  { %v4983_v40 = vmax.f32 %v4900_v53, 0.0 }
 0x4e3   :  { %6645 = vmatmul.mubr.msk.f32.vlgmr.msra.gmra.mrb[100].mxu0 %vm4781_vm7, %v4983_v40 }
 0x4e4   :  { %6647 = vmatprep.mubr.msk.f32.mxu0 %vm7146_vm2, %v10008_v35 }
 0x4e7   :  { %v4904_v2 = vpop.f32.mrb[72].mxu1 }
 0x4e8   :  { %v4905_v22 = vadd.f32 %v9576_v62, %v4904_v2  ;;  %v6582_v57 = vpop.f32.mrb[73].mxu1 }
 0x4ea   :  { %v4984_v30 = vmax.f32 %v4905_v22, 0.0 }
 0x4ec   :  { %6648 = vmatmul.mubr.msk.f32.gmra.mrb[102].mxu0 %vm4781_vm7, %v4984_v30  ;;  %v9649_v30 = vld [vmem:[%s9827_s13] ss:$0 sm:$0xff] }
 0x4ed   :  { %6650 = vmatprep.mubr.msk.f32.mxu0 %vm7146_vm2, %v10008_v35 }
 0x4f1   :  { %v4909_v27 = vpop.f32.mrb[74].mxu1 }
 0x4f2   :  { %v4910_v17 = vadd.f32 %v9576_v62, %v4909_v27  ;;  %v6585_v3 = vpop.f32.mrb[75].mxu1 }
 0x4f4   :  { %v4985_v39 = vmax.f32 %v4910_v17, 0.0 }
 0x4f6   :  { %v4914_v51 = vpop.f32.mrb[76].mxu1  ;;  %6651 = vmatmul.mubr.msk.f32.gmra.mrb[104].mxu0 %vm4781_vm7, %v4985_v39 }
 0x4f7   :  { %v4915_v50 = vadd.f32 %v9576_v62, %v4914_v51  ;;  %v6588_v28 = vpop.f32.mrb[77].mxu1  ;;  %6653 = vmatprep.mubr.msk.f32.mxu0 %vm7146_vm2, %v10008_v35 }
 0x4f9   :  { %v4986_v31 = vmax.f32 %v4915_v50, 0.0 }
 0x4fb   :  { %6654 = vmatmul.mubr.msk.f32.gmra.mrb[106].mxu0 %vm4781_vm7, %v4986_v31 }
 0x4fc   :  { %v4919_v24 = vpop.f32.mrb[78].mxu1  ;;  %6656 = vmatprep.mubr.msk.f32.mxu0 %vm7146_vm2, %v10008_v35 }
 0x4fd   :  { %v4920_v10 = vadd.f32 %v9576_v62, %v4919_v24  ;;  %v6591_v46 = vpop.f32.mrb[79].mxu1 }
 0x4fe   :  { %v5512_v46 = vld [vmem:[%s9828_s2 + $0x48] sm:$0xff] }
 0x4ff   :  { %v4987_v36 = vmax.f32 %v4920_v10, 0.0 }
 0x501   :  { %6657 = vmatmul.mubr.msk.f32.gmra.mrb[108].mxu0 %vm4781_vm7, %v4987_v36  ;;  %v7155_v36 = vmov 0  }
 0x502   :  { %v4924_v0 = vpop.f32.mrb[80].mxu1  ;;  %6659 = vmatprep.mubr.msk.f32.mxu0 %vm7146_vm2, %v10008_v35  ;;  %7050 = vset.pattern.permute.xlu0 %v7155_v36 }
 0x503   :  { %v4925_v18 = vadd.f32 %v9576_v62, %v4924_v0  ;;  %v6594_v11 = vpop.f32.mrb[81].mxu1  ;;  %v5503_v0 = vld [vmem:[%s9828_s2] sm:$0xff]  ;;  %7051 = vset.pattern.permute.xlu1 %v7155_v36 }
 0x504   :  { %5522 = vperm.xlu0 %7050, %v5503_v0  }
 0x505   :  { %v4988_v32 = vmax.f32 %v4925_v18, 0.0 }
 0x507   :  { %6660 = vmatmul.mubr.msk.f32.gmra.mrb[110].mxu0 %vm4781_vm7, %v4988_v32 }
 0x508   :  { %v4929_v43 = vpop.f32.mrb[82].mxu1  ;;  %6662 = vmatprep.mubr.msk.f32.mxu0 %vm7146_vm2, %v10008_v35 }
 0x509   :  { %v4930_v15 = vadd.f32 %v9576_v62, %v4929_v43  ;;  %v6597_v45 = vpop.f32.mrb[83].mxu1  ;;  %v5504_v43 = vld [vmem:[%s9828_s2 + $0x8] sm:$0xff] }
 0x50a   :  { %5525 = vperm.xlu0 %7050, %v5504_v43  }
 0x50b   :  { %v4989_v41 = vmax.f32 %v4930_v15, 0.0  ;;  %v5509_v15 = vld [vmem:[%s9828_s2 + $0x30] sm:$0xff] }
 0x50d   :  { %v4934_v37 = vpop.f32.mrb[84].mxu1  ;;  %6663 = vmatmul.mubr.msk.f32.gmra.mrb[112].mxu0 %vm4781_vm7, %v4989_v41 }
 0x50e   :  { %v4935_v63 = vadd.f32 %v9576_v62, %v4934_v37  ;;  %v6600_v42 = vpop.f32.mrb[85].mxu1  ;;  %6665 = vmatprep.mubr.msk.f32.mxu0 %vm7146_vm2, %v10008_v35 }
 0x50f   :  { %v5505_v42 = vld [vmem:[%s9828_s2 + $0x10] sm:$0xff] }
 0x510   :  { %v4990_v47 = vmax.f32 %v4935_v63, 0.0  ;;  %v5510_v63 = vld [vmem:[%s9828_s2 + $0x38] sm:$0xff]  ;;  %5528 = vperm.xlu0 %7050, %v5505_v42  }
 0x512   :  { %v4939_v4 = vpop.f32.mrb[86].mxu1  ;;  %6666 = vmatmul.mubr.msk.f32.gmra.mrb[114].mxu0 %vm4781_vm7, %v4990_v47 }
 0x513   :  { %v4940_v20 = vadd.f32 %v9576_v62, %v4939_v4  ;;  %v6603_v55 = vpop.f32.mrb[87].mxu1  ;;  %6668 = vmatprep.mubr.msk.f32.mxu0 %vm7146_vm2, %v10008_v35 }
 0x515   :  { %v4991_v60 = vmax.f32 %v4940_v20, 0.0 }
 0x516   :  { %v4944_v49 = vpop.f32.mrb[88].mxu1 }
 0x517   :  { %v4945_v26 = vadd.f32 %v9576_v62, %v4944_v49  ;;  %v6606_v13 = vpop.f32.mrb[89].mxu1  ;;  %6669 = vmatmul.mubr.msk.f32.gmra.mrb[116].mxu0 %vm4781_vm7, %v4991_v60  ;;  %v5506_v60 = vld [vmem:[%s9828_s2 + $0x18] sm:$0xff] }
 0x518   :  { %6671 = vmatprep.mubr.msk.f32.mxu0 %vm7146_vm2, %v10008_v35  ;;  %5531 = vperm.xlu0 %7050, %v5506_v60  }
 0x519   :  { %v4992_v21 = vmax.f32 %v4945_v26, 0.0 }
 0x51b   :  { %6672 = vmatmul.mubr.msk.f32.gmra.mrb[118].mxu0 %vm4781_vm7, %v4992_v21 }
 0x51c   :  { %v4949_v48 = vpop.f32.mrb[90].mxu1  ;;  %6674 = vmatprep.mubr.msk.f32.mxu0 %vm7146_vm2, %v10008_v35 }
 0x51d   :  { %v4950_v59 = vadd.f32 %v9576_v62, %v4949_v48  ;;  %v6609_v58 = vpop.f32.mrb[91].mxu1  ;;  %v5507_v48 = vld [vmem:[%s9828_s2 + $0x20] sm:$0xff] }
 0x51e   :  { %5534 = vperm.xlu0 %7050, %v5507_v48  }
 0x51f   :  { %v4993_v56 = vmax.f32 %v4950_v59, 0.0 }
 0x520   :  { %v4954_v52 = vpop.f32.mrb[92].mxu1 }
 0x521   :  { %v4955_v6 = vadd.f32 %v9576_v62, %v4954_v52  ;;  %v6612_v33 = vpop.f32.mrb[93].mxu1  ;;  %6675 = vmatmul.mubr.msk.f32.gmra.mrb[120].mxu0 %vm4781_vm7, %v4993_v56  ;;  %v5508_v56 = vld [vmem:[%s9828_s2 + $0x28] sm:$0xff] }
 0x522   :  { %6677 = vmatprep.mubr.msk.f32.mxu0 %vm7146_vm2, %v10008_v35  ;;  %5537 = vperm.xlu0 %7050, %v5508_v56   ;;  %v7156_v56 = vmov 1.0  }
 0x523   :  { %v4994_v9 = vmax.f32 %v4955_v6, 0.0 }
 0x525   :  { %6678 = vmatmul.mubr.msk.f32.gmra.mrb[122].mxu0 %vm4781_vm7, %v4994_v9 }
 0x526   :  { %v4959_v38 = vpop.f32.mrb[94].mxu1  ;;  %6680 = vmatprep.mubr.msk.f32.mxu0 %vm7146_vm2, %v10008_v35 }
 0x527   :  { %v4960_v7 = vadd.f32 %v9576_v62, %v4959_v38  ;;  %v6615_v61 = vpop.f32.mrb[95].mxu1 }
 0x529   :  { %v4995_v12 = vmax.f32 %v4960_v7, 0.0 }
 0x52b   :  { %v4964_v14 = vpop.f32.mrb[96].mxu1  ;;  %6681 = vmatmul.mubr.msk.f32.gmra.mrb[124].mxu0 %vm4781_vm7, %v4995_v12 }
 0x52c   :  { %v4965_v8 = vadd.f32 %v9576_v62, %v4964_v14  ;;  %v6618_v19 = vpop.f32.mrb[97].mxu1  ;;  %6683 = vmatprep.mubr.msk.f32.mxu0 %vm7146_vm2, %v10008_v35 }
 0x52e   :  { %v4996_v23 = vmax.f32 %v4965_v8, 0.0 }
 0x530   :  { %v4969_v29 = vpop.f32.mrb[98].mxu1  ;;  %6684 = vmatmul.mubr.msk.f32.gmra.mrb[126].mxu0 %vm4781_vm7, %v4996_v23 }
 0x531   :  { %v4970_v44 = vadd.f32 %v9576_v62, %v4969_v29  ;;  %v6621_v5 = vpop.f32.mrb[99].mxu1  ;;  %6686 = vmatprep.mubr.msk.f32.mxu0 %vm7146_vm2, %v10008_v35 }
 0x533   :  { %v4997_v25 = vmax.f32 %v4970_v44, 0.0 }
 0x534   :  { %v4974_v1 = vpop.f32.mrb[100].mxu1 }
 0x535   :  { %v4975_v34 = vadd.f32 %v9576_v62, %v4974_v1  ;;  %v6624_v53 = vpop.f32.mrb[101].mxu1  ;;  %6687 = vmatmul.mubr.msk.f32.gmra.mrb[128].mxu0 %vm4781_vm7, %v4997_v25 }
 0x536   :  { %6689 = vmatprep.mubr.msk.f32.mxu0 %vm7146_vm2, %v10008_v35 }
 0x537   :  { %v4998_v54 = vmax.f32 %v4975_v34, 0.0 }
 0x539   :  { %6690 = vmatmul.mubr.msk.f32.gmra.mrb[130].mxu0 %vm4781_vm7, %v4998_v54 }
 0x53a   :  { %6692 = vmatprep.mubr.msk.f32.mxu0 %vm7146_vm2, %v10008_v35 }
 0x53f   :  { %v4979_v40 = vpop.f32.mrb[102].mxu1 }
 0x540   :  { %v4980_v2 = vadd.f32 %v9576_v62, %v4979_v40  ;;  %v6627_v22 = vpop.f32.mrb[103].mxu1 }
 0x542   :  { %v4999_v57 = vmax.f32 %v4980_v2, 0.0 }
 0x544   :  { %6693 = vmatmul.mubr.msk.f32.gmra.mrb[132].mxu0 %vm4781_vm7, %v4999_v57 }
 0x545   :  { %6762 = vmatprep.mubr.msk.f32.mxu0 %vm7146_vm2, %v10008_v35 }
 0x5b6   :  { %v5132_v27 = vpop.f32.mrb[100].mxu0 }
 0x5b7   :  { %v9652_v17 = vadd.f32 %v9649_v30, %v5132_v27  ;;  %v6646_v3 = vpop.f32.mrb[101].mxu0 }
 0x5b9   :  { %v5216_v62 = vmul.f32 %v9652_v17, %v9652_v17 }
 0x5bb   :  { %v5218_v39 = vsel %vm5217_vm14, %v5216_v62, 0.0 }
 0x5bc   :  { %5219 = vadd.xlane.f32.xlu1 %v5218_v39 }
 0x5bf   :  { %v5137_v51 = vpop.f32.mrb[102].mxu0 }
 0x5c0   :  { %v6649_v50 = vpop.f32.mrb[103].mxu0  ;;  %v5138_v28 = vadd.f32 %v9649_v30, %v5137_v51 }
 0x5c2   :  { %v5221_v18 = vmul.f32 %v5138_v28, %v5138_v28 }
 0x5c9   :  { %v5142_v31 = vpop.f32.mrb[104].mxu0 }
 0x5ca   :  { %v5143_v24 = vadd.f32 %v9649_v30, %v5142_v31  ;;  %v6652_v10 = vpop.f32.mrb[105].mxu0 }
 0x5cc   :  { %v5222_v11 = vmul.f32 %v5143_v24, %v5143_v24  ;;  %v6902_v32 = vpack.c.bf16 %v5143_v24, %v5138_v28 }
 0x5cd   :  { %5540 = vperm.xlu1 %7051, %v5509_v15  }
 0x5ce   :  { %v6870_v45 = vpack.c.bf16 %v5222_v11, %v5221_v18  ;;  %v5147_v41 = vpop.f32.mrb[106].mxu0  ;;  %6904 = vmatpush3.bf16.xpose.msk.msra.mxu0 %vm9661_vm8, %v6902_v32 }
 0x5cf   :  { %v6655_v37 = vpop.f32.mrb[107].mxu0  ;;  %6905 = vmatprep.subr.bf16.mxu0 %v9937_v16  ;;  %v5148_v47 = vadd.f32 %v9649_v30, %v5147_v41 }
 0x5d0   :  { %6872 = vmatpush3.bf16.xpose.msk.msra.mxu1 %vm9661_vm8, %v6870_v45 }
 0x5d1   :  { %6873 = vmatprep.subr.bf16.mxu1 %v9937_v16  ;;  %5543 = vperm.xlu1 %7051, %v5510_v63   ;;  %v5223_v49 = vmul.f32 %v5148_v47, %v5148_v47 }
 0x5d4   :  { %v5152_v4 = vpop.f32.mrb[108].mxu0 }
 0x5d5   :  { %v5153_v20 = vadd.f32 %v9649_v30, %v5152_v4  ;;  %v6658_v55 = vpop.f32.mrb[109].mxu0 }
 0x5d7   :  { %v5224_v26 = vmul.f32 %v5153_v20, %v5153_v20  ;;  %v6906_v13 = vpack.c.bf16 %v5153_v20, %v5148_v47 }
 0x5d9   :  { %v6874_v21 = vpack.c.bf16 %v5224_v26, %v5223_v49  ;;  %6908 = vmatpush3.bf16.xpose.msk.msra.mxu0 %vm9661_vm8, %v6906_v13 }
 0x5da   :  { %v5157_v59 = vpop.f32.mrb[110].mxu0  ;;  %6909 = vmatprep.subr.bf16.mxu0 %v9937_v16 }
 0x5db   :  { %v6661_v58 = vpop.f32.mrb[111].mxu0  ;;  %6876 = vmatpush3.bf16.xpose.msk.msra.mxu1 %vm9661_vm8, %v6874_v21  ;;  %v5158_v52 = vadd.f32 %v9649_v30, %v5157_v59 }
 0x5dc   :  { %6877 = vmatprep.subr.bf16.mxu1 %v9937_v16 }
 0x5dd   :  { %v5225_v38 = vmul.f32 %v5158_v52, %v5158_v52 }
 0x5e0   :  { %v5162_v6 = vpop.f32.mrb[112].mxu0 }
 0x5e1   :  { %v5163_v33 = vadd.f32 %v9649_v30, %v5162_v6  ;;  %v6664_v9 = vpop.f32.mrb[113].mxu0  ;;  %v5517_v6 = vld [vmem:[%s9828_s2 + $0x70] sm:$0xff] }
 0x5e2   :  { %v5479_v9 = vlaneseq }
 0x5e3   :  { %v5226_v7 = vmul.f32 %v5163_v33, %v5163_v33  ;;  %v6910_v61 = vpack.c.bf16 %v5163_v33, %v5158_v52  ;;  %v5515_v52 = vld [vmem:[%s9828_s2 + $0x60] sm:$0xff]  ;;  %v5518_v33 = vld [vmem:[%s9828_s2 + $0x78] sm:$0xff] }
 0x5e5   :  { %v6878_v12 = vpack.c.bf16 %v5226_v7, %v5225_v38  ;;  %v5167_v14 = vpop.f32.mrb[114].mxu0  ;;  %6912 = vmatpush3.bf16.xpose.msk.msra.mxu0 %vm9661_vm8, %v6910_v61  ;;  %v9776_v38 = vand.u32 127, %v5479_v9  ;;  %v5523_v7 = vpop.permute.xlu0 %5522 }
 0x5e6   :  { %v6667_v8 = vpop.f32.mrb[115].mxu0  ;;  %6913 = vmatprep.subr.bf16.mxu0 %v9937_v16  ;;  %v5168_v19 = vadd.f32 %v9649_v30, %v5167_v14 }
 0x5e7   :  { %6880 = vmatpush3.bf16.xpose.msk.msra.mxu1 %vm9661_vm8, %v6878_v12  ;;  %v7157_v12 = vmov 1.0|1.0  }
 0x5e8   :  { %6881 = vmatprep.subr.bf16.mxu1 %v9937_v16  ;;  %v5227_v5 = vmul.f32 %v5168_v19, %v5168_v19 }
 0x5e9   :  { %v5526_v61 = vpop.permute.xlu0 %5525 }
 0x5ea   :  { %v5172_v23 = vpop.f32.mrb[116].mxu0  ;;  %vm5570_vm1 = vcmp.eq.s32.totalorder %v5526_v61, %v9776_v38 }
 0x5eb   :  { %v5173_v29 = vadd.f32 %v9649_v30, %v5172_v23  ;;  %v6670_v44 = vpop.f32.mrb[117].mxu0 }
 0x5ed   :  { %v5228_v25 = vmul.f32 %v5173_v29, %v5173_v29  ;;  %v6914_v1 = vpack.c.bf16 %v5173_v29, %v5168_v19  ;;  %v5529_v14 = vpop.permute.xlu0 %5528 }
 0x5ee   :  { %v5177_v34 = vpop.f32.mrb[118].mxu0  ;;  %vm5571_vm3 = vcmp.eq.s32.totalorder %v5529_v14, %v9776_v38 }
 0x5ef   :  { %v6882_v53 = vpack.c.bf16 %v5228_v25, %v5227_v5  ;;  %v6673_v54 = vpop.f32.mrb[119].mxu0  ;;  %6916 = vmatpush3.bf16.xpose.msk.msra.mxu0 %vm9661_vm8, %v6914_v1  ;;  %v5178_v40 = vadd.f32 %v9649_v30, %v5177_v34  ;;  %v5480_v25 = vshrl.u32 %v5479_v9, 7 }
 0x5f0   :  { %6917 = vmatprep.subr.bf16.mxu0 %v9937_v16 }
 0x5f1   :  { %6884 = vmatpush3.bf16.xpose.msk.msra.mxu1 %vm9661_vm8, %v6882_v53  ;;  %v5229_v27 = vmul.f32 %v5178_v40, %v5178_v40  ;;  %v5532_v19 = vpop.permute.xlu0 %5531  ;;  %v5481_v1 = vsub.s32 0, %v5480_v25 }
 0x5f2   :  { %6885 = vmatprep.subr.bf16.mxu1 %v9937_v16  ;;  %vm5572_vm5 = vcmp.eq.s32.totalorder %v5532_v19, %v9776_v38 }
 0x5f3   :  { %vm6937_vm4 = vmpackc.low %vm5572_vm5, %vm5571_vm3 }
 0x5f4   :  { %v5182_v2 = vpop.f32.mrb[120].mxu0 }
 0x5f5   :  { %v5183_v22 = vadd.f32 %v9649_v30, %v5182_v2  ;;  %v6676_v57 = vpop.f32.mrb[121].mxu0  ;;  %v5535_v29 = vpop.permute.xlu0 %5534 }
 0x5f6   :  { %vm5573_vm0 = vcmp.eq.s32.totalorder %v5535_v29, %v9776_v38 }
 0x5f7   :  { %v5230_v3 = vmul.f32 %v5183_v22, %v5183_v22  ;;  %v6918_v62 = vpack.c.bf16 %v5183_v22, %v5178_v40 }
 0x5f8   :  { %v5187_v39 = vpop.f32.mrb[122].mxu0 }
 0x5f9   :  { %v6886_v51 = vpack.c.bf16 %v5230_v3, %v5229_v27  ;;  %v6679_v50 = vpop.f32.mrb[123].mxu0  ;;  %6920 = vmatpush3.bf16.xpose.msk.msra.mxu0 %vm9661_vm8, %v6918_v62  ;;  %v5188_v28 = vadd.f32 %v9649_v30, %v5187_v39  ;;  %v5538_v44 = vpop.permute.xlu0 %5537 }
 0x5fa   :  { %6921 = vmatprep.subr.bf16.mxu0 %v9937_v16  ;;  %vm5574_vm12 = vcmp.eq.s32.totalorder %v5538_v44, %v9776_v38 }
 0x5fb   :  { %6888 = vmatpush3.bf16.xpose.msk.msra.mxu1 %vm9661_vm8, %v6886_v51  ;;  %v5231_v36 = vmul.f32 %v5188_v28, %v5188_v28  ;;  %vm6940_vm11 = vmpackc.low %vm5574_vm12, %vm5573_vm0 }
 0x5fc   :  { %6889 = vmatprep.subr.bf16.mxu1 %v9937_v16 }
 0x5fe   :  { %v5192_v31 = vpop.f32.mrb[124].mxu0 }
 0x5ff   :  { %v5193_v24 = vadd.f32 %v9649_v30, %v5192_v31  ;;  %v6682_v10 = vpop.f32.mrb[125].mxu0 }
 0x601   :  { %v5232_v0 = vmul.f32 %v5193_v24, %v5193_v24  ;;  %v6922_v18 = vpack.c.bf16 %v5193_v24, %v5188_v28 }
 0x603   :  { %v6890_v11 = vpack.c.bf16 %v5232_v0, %v5231_v36  ;;  %v5197_v32 = vpop.f32.mrb[126].mxu0  ;;  %6924 = vmatpush3.bf16.xpose.msk.msra.mxu0 %vm9661_vm8, %v6922_v18  ;;  %v5513_v36 = vld [vmem:[%s9828_s2 + $0x50] sm:$0xff] }
 0x604   :  { %v6685_v43 = vpop.f32.mrb[127].mxu0  ;;  %6925 = vmatprep.subr.bf16.mxu0 %v9937_v16  ;;  %v5198_v15 = vadd.f32 %v9649_v30, %v5197_v32 }
 0x605   :  { %6892 = vmatpush3.bf16.xpose.msk.msra.mxu1 %vm9661_vm8, %v6890_v11 }
 0x606   :  { %6893 = vmatprep.subr.bf16.mxu1 %v9937_v16  ;;  %v5233_v63 = vmul.f32 %v5198_v15, %v5198_v15 }
 0x608   :  { %v5202_v45 = vpop.f32.mrb[128].mxu0 }
 0x609   :  { %v5203_v41 = vadd.f32 %v9649_v30, %v5202_v45  ;;  %v6688_v37 = vpop.f32.mrb[129].mxu0 }
 0x60b   :  { %v5234_v42 = vmul.f32 %v5203_v41, %v5203_v41  ;;  %v6926_v47 = vpack.c.bf16 %v5203_v41, %v5198_v15 }
 0x60c   :  { %v5207_v4 = vpop.f32.mrb[130].mxu0 }
 0x60d   :  { %v6894_v20 = vpack.c.bf16 %v5234_v42, %v5233_v63  ;;  %v6691_v55 = vpop.f32.mrb[131].mxu0  ;;  %6928 = vmatpush3.bf16.xpose.msk.msra.mxu0 %vm9661_vm8, %v6926_v47  ;;  %v5208_v60 = vadd.f32 %v9649_v30, %v5207_v4 }
 0x60e   :  { %6929 = vmatprep.subr.bf16.mxu0 %v9937_v16 }
 0x60f   :  { %6896 = vmatpush3.bf16.xpose.msk.msra.mxu1 %vm9661_vm8, %v6894_v20  ;;  %v5235_v21 = vmul.f32 %v5208_v60, %v5208_v60 }
 0x610   :  { %6897 = vmatprep.subr.bf16.mxu1 %v9937_v16 }
 0x617   :  { %v5212_v49 = vpop.f32.mrb[132].mxu0 }
 0x618   :  { %v5213_v26 = vadd.f32 %v9649_v30, %v5212_v49  ;;  %v6694_v13 = vpop.f32.mrb[133].mxu0  ;;  %v5511_v30 = vld [vmem:[%s9828_s2 + $0x40] sm:$0xff] }
 0x619   :  { %5546 = vperm.xlu1 %7051, %v5511_v30  }
 0x61a   :  { %v5236_v48 = vmul.f32 %v5213_v26, %v5213_v26  ;;  %v6930_v59 = vpack.c.bf16 %v5213_v26, %v5208_v60 }
 0x61c   :  { %v6898_v58 = vpack.c.bf16 %v5236_v48, %v5235_v21  ;;  %6932 = vmatpush3.bf16.xpose.msk.msra.mxu0 %vm9661_vm8, %v6930_v59 }
 0x61d   :  { %5549 = vperm.xlu1 %7051, %v5512_v46  }
 0x61e   :  { %6900 = vmatpush3.bf16.xpose.msk.msra.mxu1 %vm9661_vm8, %v6898_v58 }
 0x61f   :  { %6933 = vmatprep.subr.bf16.mxu1 %v9937_v16 }
 0x623   :  { %6763 = vmatmul.mubr.msk.f32.vlgmr.msra.gmra.mrb[134].mxu0 %vm5217_vm14, %v9652_v17  ;;  %v5514_v17 = vld [vmem:[%s9828_s2 + $0x58] sm:$0xff] }
 0x624   :  { %5555 = vperm.xlu1 %7051, %v5514_v17  }
 0x625   :  { %6728 = vmatmul.mubr.msk.f32.vlgmr.msra.gmra.mrb[104].mxu1 %vm5217_vm14, %v7156_v56 }
 0x626   :  { %6797 = vmatprep.mubr.msk.f32.mxu1 %vm7146_vm2, %v10008_v35  ;;  %v5516_v35 = vld [vmem:[%s9828_s2 + $0x68] sm:$0xff]  ;;  %vm5569_vm2 = vcmp.eq.s32.totalorder %v5523_v7, %v9776_v38 }
 0x627   :  { %vm6934_vm15 = vmpackc.low %vm5570_vm1, %vm5569_vm2 }
 0x628   :  { %5558 = vperm.xlu1 %7051, %v5515_v52   ;;  %6935 = vmatpush3.bf16.msk.msra.mxu1 %vm6934_vm15, %v7157_v12 }
 0x629   :  { %6936 = vmatprep.subr.bf16.mxu1 %v9937_v16 }
 0x62c   :  { %5561 = vperm.xlu1 %7051, %v5516_v35   ;;  %6938 = vmatpush3.bf16.msk.msra.mxu1 %vm6937_vm4, %v7157_v12 }
 0x62d   :  { %6939 = vmatprep.subr.bf16.mxu1 %v9937_v16 }
 0x630   :  { %5564 = vperm.xlu1 %7051, %v5517_v6   ;;  %6941 = vmatpush3.bf16.msk.msra.mxu1 %vm6940_vm11, %v7157_v12  ;;  %vm5691_vm11 = vcmask 23552  }
 0x631   :  { %6942 = vmatprep.subr.bf16.mxu1 %v9937_v16 }
 0x634   :  { %5567 = vperm.xlu1 %7051, %v5518_v33  }
 0x649   :  { %v5220_v8 = vpop.xlane.xlu1 %5219 }
 0x64d   :  { %v5541_v23 = vpop.permute.xlu1 %5540 }
 0x64e   :  { %vm5575_vm10 = vcmp.eq.s32.totalorder %v5541_v23, %v9776_v38 }
 0x651   :  { %v5544_v5 = vpop.permute.xlu1 %5543 }
 0x652   :  { %vm5576_vm9 = vcmp.eq.s32.totalorder %v5544_v5, %v9776_v38 }
 0x653   :  { %vm6943_vm13 = vmpackc.low %vm5576_vm9, %vm5575_vm10 }
 0x654   :  { %6944 = vmatpush3.bf16.msk.msra.mxu1 %vm6943_vm13, %v7157_v12 }
 0x655   :  { %6945 = vmatprep.subr.bf16.mxu1 %v9937_v16 }
 0x698   :  { %v5547_v62 = vpop.permute.xlu1 %5546 }
 0x699   :  { %vm5577_vm6 = vcmp.eq.s32.totalorder %v5547_v62, %v9776_v38 }
 0x69c   :  { %v5550_v39 = vpop.permute.xlu1 %5549 }
 0x69d   :  { %vm5578_vm7 = vcmp.eq.s32.totalorder %v5550_v39, %v9776_v38 }
 0x69e   :  { %vm6946_vm14 = vmpackc.low %vm5578_vm7, %vm5577_vm6 }
 0x69f   :  { %6947 = vmatpush3.bf16.msk.msra.mxu1 %vm6946_vm14, %v7157_v12 }
 0x6a0   :  { %6948 = vmatprep.subr.bf16.mxu1 %v9937_v16 }
 0x6a3   :  { %v5556_v0 = vpop.permute.xlu1 %5555 }
 0x6a4   :  { %vm5580_vm1 = vcmp.eq.s32.totalorder %v5556_v0, %v9776_v38 }
 0x6a7   :  { %v5559_v18 = vpop.permute.xlu1 %5558 }
 0x6a8   :  { %vm5581_vm5 = vcmp.eq.s32.totalorder %v5559_v18, %v9776_v38 }
 0x6ab   :  { %v5562_v11 = vpop.permute.xlu1 %5561 }
 0x6ac   :  { %vm5582_vm4 = vcmp.eq.s32.totalorder %v5562_v11, %v9776_v38 }
 0x6ad   :  { %vm6952_vm0 = vmpackc.low %vm5582_vm4, %vm5581_vm5 }
 0x6af   :  { %v5565_v45 = vpop.permute.xlu1 %5564 }
 0x6b0   :  { %vm5583_vm12 = vcmp.eq.s32.totalorder %v5565_v45, %v9776_v38 }
 0x6b3   :  { %v5568_v37 = vpop.permute.xlu1 %5567 }
 0x6b4   :  { %vm5584_vm10 = vcmp.eq.s32.totalorder %v5568_v37, %v9776_v38 }
 0x6b5   :  { %vm6955_vm9 = vmpackc.low %vm5584_vm10, %vm5583_vm12 }
 0x6f6   :  { %v5475_v34 = vpop.f32.mrb[134].mxu0 }
 0x6f7   :  { %v6764_v53 = vpop.f32.mrb[135].mxu0  ;;  %v5484_v22 = vmul.f32 2.0, %v5475_v34 }
 0x6f8   :  { %v5354_v54 = vpop.f32.mrb[104].mxu1 }
 0x6f9   :  { %v5482_v40 = vrot.slane %v5354_v54, %v5481_v1  ;;  %v6729_v2 = vpop.f32.mrb[105].mxu1 }
 0x6fb   :  { %v5483_v57 = vadd.f32 %v5482_v40, %v5220_v8 }
 0x6fd   :  { %v5485_v27 = vsub.f32 %v5483_v57, %v5484_v22 }
 0x6ff   :  { %v5486_v3 = vmax.f32 %v5485_v27, 0.0 }
 0x701   :  { %7120 = vrsqrt.f32 %v5486_v3  ;;  %vm5489_vm8 = vcmp.eq.f32.partialorder %v5486_v3, inf  ;;  %v5492_v28 = vand.u32 2147483648, %v5486_v3  ;;  %vm5491_vm2 = vcmp.eq.f32.partialorder %v5486_v3, 0.0 }
 0x70b   :  { %v7121_v51 = vpop.eup %7120 }
 0x70c   :  { %v5488_v50 = vmul.f32 %v7121_v51, %v5486_v3 }
 0x70e   :  { %v5490_v31 = vsel %vm5489_vm8, %v5486_v3, %v5488_v50 }
 0x70f   :  { %v5493_v24 = vsel %vm5491_vm2, %v5492_v28, %v5490_v31 }
 0x710   :  { %v5494_v10 = vsub.f32 0.0, %v5493_v24 }
 0x712   :  { %5495 = vmax.xlane.f32.xlu0 %v5494_v10 }
 0x728   :  { %5552 = vperm.xlu0 %7050, %v5513_v36  }
 0x79f   :  { %v5496_v32 = vpop.xlane.xlu0 %5495 }
 0x7a0   :  { %v5497_v43 = vsub.f32 %v5494_v10, %v5496_v32 }
 0x7a2   :  { %v5498_v15 = vmul.f32 1.442695, %v5497_v43 }
 0x7a4   :  { %7122 = vpow2.f32 %v5498_v15 }
 0x7a7   :  { %v5553_v41 = vpop.permute.xlu0 %5552 }
 0x7a8   :  { %vm5579_vm15 = vcmp.eq.s32.totalorder %v5553_v41, %v9776_v38 }
 0x7a9   :  { %vm6949_vm3 = vmpackc.low %vm5580_vm1, %vm5579_vm15 }
 0x7aa   :  { %6950 = vmatpush3.bf16.msk.msra.mxu1 %vm6949_vm3, %v7157_v12 }
 0x7ab   :  { %6951 = vmatprep.subr.bf16.mxu1 %v9937_v16 }
 0x7ae   :  { %v7123_v63 = vpop.eup %7122  ;;  %6953 = vmatpush3.bf16.msk.msra.mxu1 %vm6952_vm0, %v7157_v12 }
 0x7af   :  { %5500 = vadd.xlane.f32.xlu0 %v7123_v63  ;;  %6954 = vmatprep.subr.bf16.mxu1 %v9937_v16 }
 0x7b2   :  { %6956 = vmatpush3.bf16.msk.msra.mxu1 %vm6955_vm9, %v7157_v12 }
 0x7b5   :  { %6798 = vmatmul.mubr.f32.vlgmr.msra.gmra.mrb[106].mxu1 %v7123_v63 }
 0x83c   :  { %v5501_v42 = vpop.xlane.xlu0 %5500 }
 0x83d   :  { %7124 = vrcp.f32 %v5501_v42 }
 0x847   :  { %v7125_v47 = vpop.eup %7124 }
 0x888   :  { %v5683_v4 = vpop.f32.mrb[106].mxu1 }
 0x889   :  { %v5687_v20 = vmul.f32 %v7125_v47, %v5683_v4  ;;  %v6799_v55 = vpop.f32.mrb[107].mxu1 }
 0x88b   :  { %v5688_v60 = vadd.f32 1e-07, %v5687_v20 }
 0x88d   :  { %7126 = vlog2.f32 %v5688_v60 }
 0x897   :  { %v7127_v49 = vpop.eup %7126 }
 0x898   :  { %v5690_v26 = vmul.f32 0.6931472, %v7127_v49 }
 0x89a   :  { %5692 = vst.msk [vmem:[%s9829_s14] sm:$0xff] %vm5691_vm11, %v5690_v26 }

</bundles_post_ra>
